<compile_context>
chip_gen: v7x
topology: tpu7x:2x2x1
jax: 0.10.0
libtpu: 0.0.40
codegen_flags: <defaults>
</compile_context>

<pallas_src>
import functools

import jax
import jax.numpy as jnp
from jax.experimental import pallas as pl
from jax.experimental.pallas import tpu as pltpu

LANE = 128
_VMEM_LIMIT = 48 * 1024 * 1024   # explicit scoped-VMEM cap; leaves headroom on v7x (64 MiB)


def _round_up(x, m):
    return ((x + m - 1) // m) * m


def _pick_row_block(n, target):
    """Largest row-tile <= target that divides n (keeps blocks (8,128)-legal w/o masking)."""
    if n <= target:
        return n
    br = target
    while br >= 8:
        if n % br == 0:
            return br
        br //= 2
    return n  # TODO(synk): mask the ragged tail instead of a whole-array fallback.


def _cparams(*sem):
    return pltpu.CompilerParams(dimension_semantics=sem, vmem_limit_bytes=_VMEM_LIMIT)


# ----------------------------------------------------------------------------
# Pallas kernels
# ----------------------------------------------------------------------------

def _mm_kernel(a_ref, b_ref, bias_ref, *out_refs, pre_relu, with_stats, n_valid, tm):
    """o = (relu?(a)) @ b + bias, optionally emitting per-tile BN partial sum / sum-of-sq.
    a/b are bf16 (f32 MXU accumulation); bias f32; output cast to o_ref.dtype."""
    a = a_ref[...]
    if pre_relu:                       # folds the ReLU that precedes a conv into the matmul
        a = jnp.maximum(a, 0.0)
    y = jnp.dot(a.astype(jnp.bfloat16), b_ref[...],
                preferred_element_type=jnp.float32) + bias_ref[...]
    if with_stats:
        o_ref, sum_ref, sq_ref = out_refs
        if n_valid is not None:        # padded M tail: keep bias rows out of the statistics
            row = jax.lax.broadcasted_iota(jnp.int32, y.shape, 0) + pl.program_id(0) * tm
            ys = jnp.where(row < n_valid, y, 0.0)
        else:
            ys = y
        sum_ref[...] = jnp.sum(ys, axis=0, keepdims=True)
        sq_ref[...] = jnp.sum(ys * ys, axis=0, keepdims=True)
    else:
        (o_ref,) = out_refs
    o_ref[...] = y.astype(o_ref.dtype)


def _bn_apply_kernel(*refs, inv_n, eps, relu, has_res):
    """BN apply: reduce the tiny per-tile partials in-kernel, normalize (+ReLU) (+residual)."""
    if has_res:
        x_ref, psum_ref, psq_ref, g_ref, b_ref, res_ref, o_ref = refs
    else:
        x_ref, psum_ref, psq_ref, g_ref, b_ref, o_ref = refs
        res_ref = None
    s = jnp.sum(psum_ref[...], axis=0, keepdims=True)
    q = jnp.sum(psq_ref[...], axis=0, keepdims=True)
    mean = s * inv_n
    var = jnp.maximum(q * inv_n - mean * mean, 0.0)   # biased var (PyTorch training BN)
    x = x_ref[...].astype(jnp.float32)
    y = (x - mean) * jax.lax.rsqrt(var + eps) * g_ref[...] + b_ref[...]
    if relu:
        y = jnp.maximum(y, 0.0)
    if has_res:
        y = y + res_ref[...].astype(jnp.float32)
    o_ref[...] = y.astype(o_ref.dtype)


def _vq_kernel(z_ref, et_ref, esq_ref, idx_ref):
    """Nearest-codebook indices: argmin_k ||z - e_k||^2 (first min).  ||z||^2 dropped."""
    z = z_ref[...].astype(jnp.bfloat16)
    # et is the pre-transposed bf16 codebook (Dp, Kcp); padded codes carry esq = 1e30.
    score = esq_ref[...] - 2.0 * jnp.dot(z, et_ref[...], preferred_element_type=jnp.float32)
    nr, kc = score.shape
    col = jax.lax.broadcasted_iota(jnp.int32, (nr, kc), 1)
    mins = jnp.min(score, axis=1, keepdims=True)
    idx_ref[...] = jnp.min(jnp.where(score <= mins, col, kc), axis=1, keepdims=True)


def _cpc_kernel(gi_ref, h0_ref, whh_ref, bhh_ref, enc_ref, wk_ref, bk_ref,
                nce_ref, acc_ref, *, T, Khp, fw, B, Dp):
    """Fused GRU (gate order r,z,n; input projections precomputed) + CPC InfoNCE head."""
    whh = whh_ref[...]            # bf16
    bhh = bhh_ref[...]            # f32

    def step(t, h):
        gi = gi_ref[t]                                              # (Bp, 3*Khp)
        gh = jnp.dot(h.astype(jnp.bfloat16), whh,
                     preferred_element_type=jnp.float32) + bhh
        r = jax.nn.sigmoid(gi[:, :Khp] + gh[:, :Khp])
        u = jax.nn.sigmoid(gi[:, Khp:2 * Khp] + gh[:, Khp:2 * Khp])
        n = jnp.tanh(gi[:, 2 * Khp:] + r * gh[:, 2 * Khp:])
        return (1.0 - u) * n + u * h

    h = jax.lax.fori_loop(0, T, step, h0_ref[...], unroll=True)
    c_t = h[:B]                                                     # drop padded batch rows
    pred_all = jnp.dot(c_t.astype(jnp.bfloat16), wk_ref[...],
                       preferred_element_type=jnp.float32) + bk_ref[...]   # (B, fw*Dp)

    row = jax.lax.broadcasted_iota(jnp.int32, (B, B), 0)
    col = jax.lax.broadcasted_iota(jnp.int32, (B, B), 1)
    eye = (row == col).astype(jnp.float32)
    col_idx = jax.lax.broadcasted_iota(jnp.int32, (1, B), 1)
    nce = jnp.zeros((1, 1), jnp.float32)
    correct = jnp.zeros((1, 1), jnp.float32)
    for i in range(fw):                                             # static unroll, fw small
        pred = pred_all[:, i * Dp:(i + 1) * Dp]                     # lane-aligned slice
        total = jax.lax.dot_general(enc_ref[i], pred.astype(jnp.bfloat16),
                                    (((1,), (1,)), ((), ())),
                                    preferred_element_type=jnp.float32)    # (B, B)
        m = jnp.max(total, axis=1, keepdims=True)
        ex = jnp.exp(total - m)
        denom = jnp.sum(ex, axis=1, keepdims=True)
        lsm = (total - m) - jnp.log(denom)                          # log_softmax, dim=1
        sm = ex / denom                                             # softmax, dim=1 (exact)
        nce = nce + jnp.sum(lsm * eye, keepdims=True)
        # torch.argmax(dim=0) semantics: first row achieving the column max.
        col_max = jnp.max(sm, axis=0, keepdims=True)                # (1, B)
        first_row = jnp.min(jnp.where(sm >= col_max, row, B), axis=0, keepdims=True)
        correct = jnp.sum((first_row == col_idx).astype(jnp.float32),
                          axis=1, keepdims=True)                    # last step only (CDCK2)
    nce_ref[...] = nce * (-1.0 / (B * fw))
    acc_ref[...] = correct * (1.0 / B)


# ----------------------------------------------------------------------------
# Wrappers: matmul / BN / conv / VQ / CPC
# ----------------------------------------------------------------------------

def matmul_bias(a, b, bias, *, pre_relu=False, with_stats=False,
                out_dtype=jnp.float32, tm=256):
    """Row-tiled matmul + bias (optionally fused BN statistics).  tm=256 safe on v7x;
    raise toward 512 on v5e/v6e (128 MiB VMEM)."""
    M, Kd = a.shape
    N = b.shape[1]
    if M <= tm:
        tm_eff, Mp = M, M                          # single full block, no pad / no slice
    else:
        tm_eff = tm
        Mp = pl.cdiv(M, tm) * tm
    a_p = a if Mp == M else jnp.pad(a, ((0, Mp - M), (0, 0)))
    nt = Mp // tm_eff
    n_valid = None if Mp == M else M

    out_shape = [jax.ShapeDtypeStruct((Mp, N), out_dtype)]
    out_specs = [pl.BlockSpec((tm_eff, N), lambda i: (i, 0))]
    if with_stats:
        out_shape += [jax.ShapeDtypeStruct((nt, N), jnp.float32)] * 2
        out_specs += [pl.BlockSpec((1, N), lambda i: (i, 0)),
                      pl.BlockSpec((1, N), lambda i: (i, 0))]

    outs = pl.pallas_call(
        functools.partial(_mm_kernel, pre_relu=pre_relu, with_stats=with_stats,
                          n_valid=n_valid, tm=tm_eff),
        out_shape=tuple(out_shape) if with_stats else out_shape[0],
        grid=(nt,),
        in_specs=[pl.BlockSpec((tm_eff, Kd), lambda i: (i, 0)),
                  pl.BlockSpec((Kd, N), lambda i: (0, 0)),
                  pl.BlockSpec((1, N), lambda i: (0, 0))],
        out_specs=tuple(out_specs) if with_stats else out_specs[0],
        compiler_params=_cparams("parallel"),
    )(a_p, b, bias)

    if with_stats:
        y, psum, psq = outs
        if Mp != M:
            y = y[:M]
        return y, psum, psq
    return outs if Mp == M else outs[:M]


def batchnorm2d(x_nhwc, psum, psq, gamma, beta, *, relu, residual=None,
                out_dtype=jnp.bfloat16, block_rows=512):
    B, H, W, C = x_nhwc.shape
    N = B * H * W
    x2 = x_nhwc.reshape(N, C)
    br = _pick_row_block(N, block_rows)
    nt = N // br
    has_res = residual is not None
    stat_shape = psum.shape

    ins = [x2, psum, psq, gamma.reshape(1, C), beta.reshape(1, C)]
    in_specs = [pl.BlockSpec((br, C), lambda i: (i, 0)),
                pl.BlockSpec(stat_shape, lambda i: (0, 0)),
                pl.BlockSpec(stat_shape, lambda i: (0, 0)),
                pl.BlockSpec((1, C), lambda i: (0, 0)),
                pl.BlockSpec((1, C), lambda i: (0, 0))]
    if has_res:
        ins.append(residual.reshape(N, C))
        in_specs.append(pl.BlockSpec((br, C), lambda i: (i, 0)))

    out = pl.pallas_call(
        functools.partial(_bn_apply_kernel, inv_n=1.0 / N, eps=1e-5, relu=relu,
                          has_res=has_res),
        out_shape=jax.ShapeDtypeStruct((N, C), out_dtype),
        grid=(nt,),
        in_specs=in_specs,
        out_specs=pl.BlockSpec((br, C), lambda i: (i, 0)),
        compiler_params=_cparams("parallel"),
    )(*ins)
    return out.reshape(B, H, W, C)


def _im2col_nhwc(x, kh, kw, stride, pad, c_in, k_pad):
    """bf16 im2col over the LOGICAL channels only, K padded to k_pad in one concatenate.
    Feature order = (kh, kw, C).
    TODO(synk): replace with an in-kernel kh*kw tap accumulation to avoid materializing it."""
    B, H, W, _ = x.shape
    xl = x[..., :c_in]
    xp = jnp.pad(xl, ((0, 0), (pad, pad), (pad, pad), (0, 0)))
    Ho = (H + 2 * pad - kh) // stride + 1
    Wo = (W + 2 * pad - kw) // stride + 1
    cols = []
    for i in range(kh):
        for j in range(kw):
            cols.append(xp[:, i:i + stride * Ho:stride, j:j + stride * Wo:stride, :])
    k_log = kh * kw * c_in
    if k_pad > k_log:
        cols.append(jnp.zeros((B, Ho, Wo, k_pad - k_log), x.dtype))
    col = jnp.concatenate(cols, axis=-1)
    return col.reshape(B * Ho * Wo, k_pad), Ho, Wo


def conv2d(x_nhwc, w2, b2, *, kh, kw, stride, pad, c_in, pre_relu=False,
           with_stats=False, out_dtype=jnp.bfloat16, tm=256):
    B = x_nhwc.shape[0]
    Kp, Op = w2.shape
    a, Ho, Wo = _im2col_nhwc(x_nhwc, kh, kw, stride, pad, c_in, Kp)
    res = matmul_bias(a, w2, b2, pre_relu=pre_relu, with_stats=with_stats,
                      out_dtype=out_dtype, tm=tm)
    if with_stats:
        y, psum, psq = res
        return y.reshape(B, Ho, Wo, Op), psum, psq
    return res.reshape(B, Ho, Wo, Op)


def encoder_forward(pp, x_nchw, *, input_dim, dim):
    x = jnp.transpose(x_nchw, (0, 2, 3, 1)).astype(jnp.bfloat16)    # NCHW -> NHWC bf16
    y, s, q = conv2d(x, pp["conv1_w2"], pp["conv1_b2"], kh=4, kw=4, stride=2, pad=1,
                     c_in=input_dim, with_stats=True)
    h = batchnorm2d(y, s, q, pp["bn1_g"], pp["bn1_b"], relu=True)
    h = conv2d(h, pp["conv2_w2"], pp["conv2_b2"], kh=4, kw=4, stride=2, pad=1,
               c_in=dim, with_stats=False)
    for r in (1, 2):                                    # two ResBlocks
        t, s, q = conv2d(h, pp[f"res{r}_c3_w2"], pp[f"res{r}_c3_b2"], kh=3, kw=3,
                         stride=1, pad=1, c_in=dim, pre_relu=True, with_stats=True)
        t = batchnorm2d(t, s, q, pp[f"res{r}_bn1_g"], pp[f"res{r}_bn1_b"], relu=True)
        t, s, q = conv2d(t, pp[f"res{r}_c1_w2"], pp[f"res{r}_c1_b2"], kh=1, kw=1,
                         stride=1, pad=0, c_in=dim, with_stats=True)
        h = batchnorm2d(t, s, q, pp[f"res{r}_bn2_g"], pp[f"res{r}_bn2_b"], relu=False,
                        residual=h,                      # residual add fused into BN apply
                        out_dtype=(jnp.float32 if r == 2 else jnp.bfloat16))
    return h                                            # z_e_x, NHWC f32 (padded channels 0)


def vq_quantize(pp, z_e_nhwc, *, block_rows=512):
    B, H, W, Dp = z_e_nhwc.shape
    N = B * H * W
    e_t = pp["codebook_t_bf16"]                         # (Dp, Kcp) bf16, pre-transposed
    esq = pp["codebook_sq_p"]                           # (1, Kcp) f32, padded codes = 1e30
    Kcp = e_t.shape[1]
    br = _pick_row_block(N, block_rows)
    idx = pl.pallas_call(
        _vq_kernel,
        out_shape=jax.ShapeDtypeStruct((N, 1), jnp.int32),
        grid=(N // br,),
        in_specs=[pl.BlockSpec((br, Dp), lambda i: (i, 0)),
                  pl.BlockSpec((Dp, Kcp), lambda i: (0, 0)),
                  pl.BlockSpec((1, Kcp), lambda i: (0, 0))],
        out_specs=pl.BlockSpec((br, 1), lambda i: (i, 0)),
        compiler_params=_cparams("parallel"),
    )(z_e_nhwc.reshape(N, Dp), e_t, esq)
    # Exact f32 code rows gathered outside the kernel (no f32 onehot @ e MXU matmul).
    zq = jnp.take(pp["codebook_f32_p"], idx[:, 0], axis=0)
    return zq.reshape(B, H, W, Dp)                      # forward values of z_q_x_st == z_q_x


def cpc_forward(pp, z_q_nhwc, hidden, *, future_window, t_sample):
    B, H, W, Dp = z_q_nhwc.shape
    Khp = pp["gru_whh_cat"].shape[0]
    K_h = hidden.shape[-1]
    fw = future_window
    z_seq = z_q_nhwc.reshape(B, H * W, Dp)              # == NCHW .view(B,D,T).transpose(1,2)
    enc = jnp.transpose(z_seq[:, t_sample + 1:t_sample + 1 + fw, :], (1, 0, 2))
    Tp = t_sample + 1
    fwd = jnp.transpose(z_seq[:, :Tp, :], (1, 0, 2)).reshape(Tp * B, Dp)

    # GRU input projections hoisted out of the recurrence: one lane-dense matmul.
    gi = matmul_bias(fwd.astype(jnp.bfloat16), pp["gru_wih_cat"], pp["gru_bih_cat"],
                     out_dtype=jnp.float32)
    gi = gi.reshape(Tp, B, 3 * Khp)
    Bp = _round_up(B, 8)                                # pad batch to 8 sublanes
    if Bp != B:
        gi = jnp.pad(gi, ((0, 0), (0, Bp - B), (0, 0)))
    h0 = jnp.pad(hidden[0], ((0, Bp - B), (0, Khp - K_h)))

    # Fused GRU + InfoNCE in one grid=(1,) call (no c_t HBM round trip, one launch fewer).
    nce, acc = pl.pallas_call(
        functools.partial(_cpc_kernel, T=Tp, Khp=Khp, fw=fw, B=B, Dp=Dp),
        out_shape=(jax.ShapeDtypeStruct((1, 1), jnp.float32),
                   jax.ShapeDtypeStruct((1, 1), jnp.float32)),
        grid=(1,),
        in_specs=[pl.BlockSpec((Tp, Bp, 3 * Khp), lambda i: (0, 0, 0)),
                  pl.BlockSpec((Bp, Khp), lambda i: (0, 0)),
                  pl.BlockSpec((Khp, 3 * Khp), lambda i: (0, 0)),
                  pl.BlockSpec((1, 3 * Khp), lambda i: (0, 0)),
                  pl.BlockSpec((fw, B, Dp), lambda i: (0, 0, 0)),
                  pl.BlockSpec((Khp, fw * Dp), lambda i: (0, 0)),
                  pl.BlockSpec((1, fw * Dp), lambda i: (0, 0))],
        out_specs=(pl.BlockSpec((1, 1), lambda i: (0, 0)),
                   pl.BlockSpec((1, 1), lambda i: (0, 0))),
        compiler_params=_cparams("arbitrary"),
    )(gi, h0, pp["gru_whh_cat"], pp["gru_bhh_cat"], enc.astype(jnp.bfloat16),
      pp["wk_cat"], pp["bk_cat"])
    return acc[0, 0], nce[0, 0]


def cpcvqvae_forward(pp, x_nchw, hidden, *, input_dim, dim, future_window, t_sample):
    z_e = encoder_forward(pp, x_nchw, input_dim=input_dim, dim=dim)
    z_q = vq_quantize(pp, z_e)
    acc, nce = cpc_forward(pp, z_q, hidden, future_window=future_window, t_sample=t_sample)
    z_e_nchw = jnp.transpose(z_e[..., :dim], (0, 3, 1, 2))   # drop padded channels
    z_q_nchw = jnp.transpose(z_q[..., :dim], (0, 3, 1, 2))
    return acc, nce, z_e_nchw, z_q_nchw


# ----------------------------------------------------------------------------
# Parameter init / packing
# ----------------------------------------------------------------------------

def init_hidden(batch_size, K_h):
    return jnp.zeros((1, batch_size, K_h), jnp.float32)


def init_params(key, input_dim, dim, K, K_h, future_window):
    ks = list(jax.random.split(key, 24))

    def nrm(shape, s=0.1):
        return jax.random.normal(ks.pop(), shape, jnp.float32) * s

    p = {
        "conv1_w": nrm((dim, input_dim, 4, 4)), "conv1_b": nrm((dim,), 0.01),
        "bn1_g": jnp.ones((dim,), jnp.float32), "bn1_b": jnp.zeros((dim,), jnp.float32),
        "conv2_w": nrm((dim, dim, 4, 4)), "conv2_b": nrm((dim,), 0.01),
    }
    for r in (1, 2):
        p[f"res{r}_c3_w"] = nrm((dim, dim, 3, 3)); p[f"res{r}_c3_b"] = nrm((dim,), 0.01)
        p[f"res{r}_bn1_g"] = jnp.ones((dim,), jnp.float32)
        p[f"res{r}_bn1_b"] = jnp.zeros((dim,), jnp.float32)
        p[f"res{r}_c1_w"] = nrm((dim, dim, 1, 1)); p[f"res{r}_c1_b"] = nrm((dim,), 0.01)
        p[f"res{r}_bn2_g"] = jnp.ones((dim,), jnp.float32)
        p[f"res{r}_bn2_b"] = jnp.zeros((dim,), jnp.float32)
    p["codebook"] = jax.random.uniform(ks.pop(), (K, dim), jnp.float32, -1.0 / K, 1.0 / K)
    p["gru_wih"] = nrm((3, dim, K_h))          # gate order (r, z, n), stored transposed
    p["gru_whh"] = nrm((3, K_h, K_h))
    p["gru_bih"] = jnp.zeros((3, 1, K_h), jnp.float32)
    p["gru_bhh"] = jnp.zeros((3, 1, K_h), jnp.float32)
    p["wk_w"] = nrm((future_window, K_h, dim)) # Linear(K_h -> dim) per future step
    p["wk_b"] = jnp.zeros((future_window, 1, dim), jnp.float32)
    return p


def prepare_params(p, *, input_dim, dim, K, K_h, future_window):
    """Pack / lane-pad / bf16-cast parameters once (outside jit)."""
    Dp = _round_up(dim, LANE)
    Khp = _round_up(K_h, LANE)
    Kcp = _round_up(K, LANE)

    def pack_conv(w, b):
        # Flatten only the logical (I, kh, kw) contraction, order (kh, kw, I), pad K to 128k.
        O, I, kh, kw = w.shape
        k_log = I * kh * kw
        k_pad = _round_up(k_log, LANE)
        w2 = jnp.transpose(w, (0, 2, 3, 1)).reshape(O, k_log)
        w2 = jnp.pad(w2, ((0, Dp - O), (0, k_pad - k_log))).T.astype(jnp.bfloat16)
        b2 = jnp.pad(b, (0, Dp - O)).reshape(1, Dp).astype(jnp.float32)
        return w2, b2

    def pad_vec(v, n):
        return jnp.pad(v, (0, n - v.shape[0]))

    pp = {}
    pp["conv1_w2"], pp["conv1_b2"] = pack_conv(p["conv1_w"], p["conv1_b"])
    pp["conv2_w2"], pp["conv2_b2"] = pack_conv(p["conv2_w"], p["conv2_b"])
    pp["bn1_g"] = pad_vec(p["bn1_g"], Dp); pp["bn1_b"] = pad_vec(p["bn1_b"], Dp)
    for r in (1, 2):
        pp[f"res{r}_c3_w2"], pp[f"res{r}_c3_b2"] = pack_conv(p[f"res{r}_c3_w"],
                                                             p[f"res{r}_c3_b"])
        pp[f"res{r}_c1_w2"], pp[f"res{r}_c1_b2"] = pack_conv(p[f"res{r}_c1_w"],
                                                             p[f"res{r}_c1_b"])
        for bn in (1, 2):
            pp[f"res{r}_bn{bn}_g"] = pad_vec(p[f"res{r}_bn{bn}_g"], Dp)
            pp[f"res{r}_bn{bn}_b"] = pad_vec(p[f"res{r}_bn{bn}_b"], Dp)

    # Codebook: exact f32 copy for the gather, pre-transposed bf16 copy for the scoring.
    emb = p["codebook"]
    emb_p = jnp.pad(emb, ((0, Kcp - K), (0, Dp - dim)))
    pp["codebook_f32_p"] = emb_p
    pp["codebook_t_bf16"] = emb_p.T.astype(jnp.bfloat16)
    esq = jnp.sum(emb * emb, axis=1)
    pp["codebook_sq_p"] = jnp.pad(esq, (0, Kcp - K), constant_values=1e30).reshape(1, Kcp)

    # GRU: gates concatenated at lane-aligned [g*Khp, g*Khp+K_h) slabs (order r, z, n).
    wih_cat = jnp.zeros((Dp, 3 * Khp), jnp.float32)
    whh_cat = jnp.zeros((Khp, 3 * Khp), jnp.float32)
    bih_cat = jnp.zeros((1, 3 * Khp), jnp.float32)
    bhh_cat = jnp.zeros((1, 3 * Khp), jnp.float32)
    for g in range(3):
        wih_cat = wih_cat.at[:dim, g * Khp:g * Khp + K_h].set(p["gru_wih"][g])
        whh_cat = whh_cat.at[:K_h, g * Khp:g * Khp + K_h].set(p["gru_whh"][g])
        bih_cat = bih_cat.at[:, g * Khp:g * Khp + K_h].set(p["gru_bih"][g])
        bhh_cat = bhh_cat.at[:, g * Khp:g * Khp + K_h].set(p["gru_bhh"][g])
    pp["gru_wih_cat"] = wih_cat.astype(jnp.bfloat16)
    pp["gru_whh_cat"] = whh_cat.astype(jnp.bfloat16)
    pp["gru_bih_cat"] = bih_cat
    pp["gru_bhh_cat"] = bhh_cat

    # CPC prediction heads stacked along the lane axis: (Khp, fw*Dp).
    wk_cat = jnp.zeros((Khp, future_window * Dp), jnp.float32)
    bk_cat = jnp.zeros((1, future_window * Dp), jnp.float32)
    for i in range(future_window):
        wk_cat = wk_cat.at[:K_h, i * Dp:i * Dp + dim].set(p["wk_w"][i])
        bk_cat = bk_cat.at[:, i * Dp:i * Dp + dim].set(p["wk_b"][i])
    pp["wk_cat"] = wk_cat.astype(jnp.bfloat16)
    pp["bk_cat"] = bk_cat
    return pp


if __name__ == "__main__":
    # Small shapes consistent with the module: 16x16 image -> 4x4 latent grid (img_window=16).
    B, C, H, W = 2, 3, 16, 16
    dim, K, K_h, future_window = 16, 32, 16, 4

    key = jax.random.PRNGKey(0)
    pkey, xkey = jax.random.split(key)
    params = init_params(pkey, C, dim, K, K_h, future_window)
    pparams = prepare_params(params, input_dim=C, dim=dim, K=K, K_h=K_h,
                             future_window=future_window)
    x = jax.random.normal(xkey, (B, C, H, W), jnp.float32)
    hidden = init_hidden(B, K_h)

    # TODO(synk): original CPCModule samples the context cut point with torch.randint;
    # fixed here for determinism (valid range: [0, img_window - future_window - 1]).
    t_sample = 7

    fwd = jax.jit(functools.partial(cpcvqvae_forward, input_dim=C, dim=dim,
                                    future_window=future_window, t_sample=t_sample))
    acc, nce, z_e_x, z_q_x = fwd(pparams, x, hidden)
    jax.block_until_ready((acc, nce, z_e_x, z_q_x))
    assert z_e_x.shape == (B, dim, 4, 4) and z_q_x.shape == (B, dim, 4, 4)
    assert bool(jnp.isfinite(nce)) and bool(jnp.isfinite(acc))
    print("KERNEL_OK")
</pallas_src>

<mosaic_0001>
module attributes {stable_mosaic.version = 11 : i64} {
  func.func @_mm_kernel(%arg0: i32, %arg1: memref<128x128xbf16, #tpu.memory_space<vmem>>, %arg2: memref<128x128xbf16, #tpu.memory_space<vmem>>, %arg3: memref<1x128xf32, #tpu.memory_space<vmem>>, %arg4: memref<128x128xbf16, #tpu.memory_space<vmem>>, %arg5: memref<1x128xf32, #tpu.memory_space<vmem>>, %arg6: memref<1x128xf32, #tpu.memory_space<vmem>>) attributes {dimension_semantics = [#tpu.dimension_semantics<parallel>], iteration_bounds = array<i64: 1>, scalar_prefetch = 0 : i64, scratch_operands = 0 : i64, tpu.core_type = #tpu.core_type<tc>, window_params = [{transform_indices = @transform_0, window_bounds = array<i64: 128, 128>}, {pipeline_mode = #tpu.pipeline_mode<synchronous>, transform_indices = @transform_1, window_bounds = array<i64: 128, 128>}, {pipeline_mode = #tpu.pipeline_mode<synchronous>, transform_indices = @transform_2, window_bounds = array<i64: 1, 128>}, {transform_indices = @transform_3, window_bounds = array<i64: 128, 128>}, {transform_indices = @transform_4, window_bounds = array<i64: 1, 128>}, {transform_indices = @transform_5, window_bounds = array<i64: 1, 128>}]} {
    %c0 = arith.constant 0 : index
    %c0_0 = arith.constant 0 : index
    %0 = vector.load %arg1[%c0, %c0_0] : memref<128x128xbf16, #tpu.memory_space<vmem>>, vector<128x128xbf16>
    %c0_1 = arith.constant 0 : index
    %c0_2 = arith.constant 0 : index
    %1 = vector.load %arg2[%c0_1, %c0_2] : memref<128x128xbf16, #tpu.memory_space<vmem>>, vector<128x128xbf16>
    %cst = arith.constant dense<0.000000e+00> : vector<128x128xf32>
    %2 = tpu.matmul %0, %1, %cst {dimension_numbers = #tpu.dot_dimension_numbers<[1], [0], [0], [1], [0, 0, 1, 1], [], []>} : vector<128x128xbf16>, vector<128x128xbf16>, vector<128x128xf32> -> vector<128x128xf32>
    %c0_3 = arith.constant 0 : index
    %c0_4 = arith.constant 0 : index
    %3 = vector.load %arg3[%c0_3, %c0_4] : memref<1x128xf32, #tpu.memory_space<vmem>>, vector<1x128xf32>
    %4 = vector.broadcast %3 : vector<1x128xf32> to vector<128x128xf32>
    %5 = arith.addf %2, %4 : vector<128x128xf32>
    %cst_5 = arith.constant dense<0.000000e+00> : vector<128xf32>
    %6 = vector.multi_reduction <add>, %5, %cst_5 [0] : vector<128x128xf32> to vector<128xf32>
    %7 = vector.shape_cast %6 : vector<128xf32> to vector<1x128xf32>
    %c0_6 = arith.constant 0 : index
    %c0_7 = arith.constant 0 : index
    %8 = vector.load %arg5[%c0_6, %c0_7] : memref<1x128xf32, #tpu.memory_space<vmem>>, vector<1x128xf32>
    tpu.vector_store %arg5[%c0_6, %c0_7], %7 {strides = array<i32>} : memref<1x128xf32, #tpu.memory_space<vmem>>, vector<1x128xf32>,
    %9 = arith.mulf %5, %5 : vector<128x128xf32>
    %cst_8 = arith.constant dense<0.000000e+00> : vector<128xf32>
    %10 = vector.multi_reduction <add>, %9, %cst_8 [0] : vector<128x128xf32> to vector<128xf32>
    %11 = vector.shape_cast %10 : vector<128xf32> to vector<1x128xf32>
    %c0_9 = arith.constant 0 : index
    %c0_10 = arith.constant 0 : index
    %12 = vector.load %arg6[%c0_9, %c0_10] : memref<1x128xf32, #tpu.memory_space<vmem>>, vector<1x128xf32>
    tpu.vector_store %arg6[%c0_9, %c0_10], %11 {strides = array<i32>} : memref<1x128xf32, #tpu.memory_space<vmem>>, vector<1x128xf32>,
    %13 = arith.truncf %5 : vector<128x128xf32> to vector<128x128xbf16>
    %c0_11 = arith.constant 0 : index
    %c0_12 = arith.constant 0 : index
    %14 = vector.load %arg4[%c0_11, %c0_12] : memref<128x128xbf16, #tpu.memory_space<vmem>>, vector<128x128xbf16>
    tpu.vector_store %arg4[%c0_11, %c0_12], %13 {strides = array<i32>} : memref<128x128xbf16, #tpu.memory_space<vmem>>, vector<128x128xbf16>,
    return
  }
  func.func @transform_0(%arg0: i32) -> (i32, i32) {
    %c0_i32 = arith.constant 0 : i32
    %c0_i32_0 = arith.constant 0 : i32
    return %arg0, %c0_i32 : i32, i32
  }
  func.func @transform_1(%arg0: i32) -> (i32, i32) {
    %c0_i32 = arith.constant 0 : i32
    %c0_i32_0 = arith.constant 0 : i32
    %c0_i32_1 = arith.constant 0 : i32
    return %c0_i32, %c0_i32_0 : i32, i32
  }
  func.func @transform_2(%arg0: i32) -> (i32, i32) {
    %c0_i32 = arith.constant 0 : i32
    %c0_i32_0 = arith.constant 0 : i32
    %c0_i32_1 = arith.constant 0 : i32
    return %c0_i32, %c0_i32_0 : i32, i32
  }
  func.func @transform_3(%arg0: i32) -> (i32, i32) {
    %c0_i32 = arith.constant 0 : i32
    %c0_i32_0 = arith.constant 0 : i32
    return %arg0, %c0_i32 : i32, i32
  }
  func.func @transform_4(%arg0: i32) -> (i32, i32) {
    %c0_i32 = arith.constant 0 : i32
    %c0_i32_0 = arith.constant 0 : i32
    return %arg0, %c0_i32 : i32, i32
  }
  func.func @transform_5(%arg0: i32) -> (i32, i32) {
    %c0_i32 = arith.constant 0 : i32
    %c0_i32_0 = arith.constant 0 : i32
    return %arg0, %c0_i32 : i32, i32
  }
}

module attributes {stable_mosaic.version = 11 : i64} {
  func.func @_bn_apply_kernel(%arg0: i32, %arg1: memref<128x128xbf16, #tpu.memory_space<vmem>>, %arg2: memref<1x128xf32, #tpu.memory_space<vmem>>, %arg3: memref<1x128xf32, #tpu.memory_space<vmem>>, %arg4: memref<1x128xf32, #tpu.memory_space<vmem>>, %arg5: memref<1x128xf32, #tpu.memory_space<vmem>>, %arg6: memref<128x128xbf16, #tpu.memory_space<vmem>>) attributes {dimension_semantics = [#tpu.dimension_semantics<parallel>], iteration_bounds = array<i64: 1>, scalar_prefetch = 0 : i64, scratch_operands = 0 : i64, tpu.core_type = #tpu.core_type<tc>, window_params = [{transform_indices = @transform_0, window_bounds = array<i64: 128, 128>}, {pipeline_mode = #tpu.pipeline_mode<synchronous>, transform_indices = @transform_1, window_bounds = array<i64: 1, 128>}, {pipeline_mode = #tpu.pipeline_mode<synchronous>, transform_indices = @transform_2, window_bounds = array<i64: 1, 128>}, {pipeline_mode = #tpu.pipeline_mode<synchronous>, transform_indices = @transform_3, window_bounds = array<i64: 1, 128>}, {pipeline_mode = #tpu.pipeline_mode<synchronous>, transform_indices = @transform_4, window_bounds = array<i64: 1, 128>}, {transform_indices = @transform_5, window_bounds = array<i64: 128, 128>}]} {
    %c0 = arith.constant 0 : index
    %c0_0 = arith.constant 0 : index
    %0 = vector.load %arg2[%c0, %c0_0] : memref<1x128xf32, #tpu.memory_space<vmem>>, vector<1x128xf32>
    %cst = arith.constant dense<0.000000e+00> : vector<128xf32>
    %1 = vector.multi_reduction <add>, %0, %cst [0] : vector<1x128xf32> to vector<128xf32>
    %2 = vector.shape_cast %1 : vector<128xf32> to vector<1x128xf32>
    %c0_1 = arith.constant 0 : index
    %c0_2 = arith.constant 0 : index
    %3 = vector.load %arg3[%c0_1, %c0_2] : memref<1x128xf32, #tpu.memory_space<vmem>>, vector<1x128xf32>
    %cst_3 = arith.constant dense<0.000000e+00> : vector<128xf32>
    %4 = vector.multi_reduction <add>, %3, %cst_3 [0] : vector<1x128xf32> to vector<128xf32>
    %5 = vector.shape_cast %4 : vector<128xf32> to vector<1x128xf32>
    %cst_4 = arith.constant 7.812500e-03 : f32
    %6 = vector.broadcast %cst_4 : f32 to vector<1x128xf32>
    %7 = arith.mulf %2, %6 : vector<1x128xf32>
    %cst_5 = arith.constant 7.812500e-03 : f32
    %8 = vector.broadcast %cst_5 : f32 to vector<1x128xf32>
    %9 = arith.mulf %5, %8 : vector<1x128xf32>
    %10 = arith.mulf %7, %7 : vector<1x128xf32>
    %11 = arith.subf %9, %10 : vector<1x128xf32>
    %cst_6 = arith.constant 0.000000e+00 : f32
    %12 = vector.broadcast %cst_6 : f32 to vector<1x128xf32>
    %13 = arith.maximumf %11, %12 : vector<1x128xf32>
    %c0_7 = arith.constant 0 : index
    %c0_8 = arith.constant 0 : index
    %14 = vector.load %arg1[%c0_7, %c0_8] : memref<128x128xbf16, #tpu.memory_space<vmem>>, vector<128x128xbf16>
    %15 = arith.extf %14 : vector<128x128xbf16> to vector<128x128xf32>
    %16 = vector.broadcast %7 : vector<1x128xf32> to vector<128x128xf32>
    %17 = arith.subf %15, %16 : vector<128x128xf32>
    %cst_9 = arith.constant 9.99999974E-6 : f32
    %18 = vector.broadcast %cst_9 : f32 to vector<1x128xf32>
    %19 = arith.addf %13, %18 : vector<1x128xf32>
    %20 = math.rsqrt %19 : vector<1x128xf32>
    %21 = vector.broadcast %20 : vector<1x128xf32> to vector<128x128xf32>
    %22 = arith.mulf %17, %21 : vector<128x128xf32>
    %c0_10 = arith.constant 0 : index
    %c0_11 = arith.constant 0 : index
    %23 = vector.load %arg4[%c0_10, %c0_11] : memref<1x128xf32, #tpu.memory_space<vmem>>, vector<1x128xf32>
    %24 = vector.broadcast %23 : vector<1x128xf32> to vector<128x128xf32>
    %25 = arith.mulf %22, %24 : vector<128x128xf32>
    %c0_12 = arith.constant 0 : index
    %c0_13 = arith.constant 0 : index
    %26 = vector.load %arg5[%c0_12, %c0_13] : memref<1x128xf32, #tpu.memory_space<vmem>>, vector<1x128xf32>
    %27 = vector.broadcast %26 : vector<1x128xf32> to vector<128x128xf32>
    %28 = arith.addf %25, %27 : vector<128x128xf32>
    %cst_14 = arith.constant 0.000000e+00 : f32
    %29 = vector.broadcast %cst_14 : f32 to vector<128x128xf32>
    %30 = arith.maximumf %28, %29 : vector<128x128xf32>
    %31 = arith.truncf %30 : vector<128x128xf32> to vector<128x128xbf16>
    %c0_15 = arith.constant 0 : index
    %c0_16 = arith.constant 0 : index
    %32 = vector.load %arg6[%c0_15, %c0_16] : memref<128x128xbf16, #tpu.memory_space<vmem>>, vector<128x128xbf16>
    tpu.vector_store %arg6[%c0_15, %c0_16], %31 {strides = array<i32>} : memref<128x128xbf16, #tpu.memory_space<vmem>>, vector<128x128xbf16>,
    return
  }
  func.func @transform_0(%arg0: i32) -> (i32, i32) {
    %c0_i32 = arith.constant 0 : i32
    %c0_i32_0 = arith.constant 0 : i32
    return %arg0, %c0_i32 : i32, i32
  }
  func.func @transform_1(%arg0: i32) -> (i32, i32) {
    %c0_i32 = arith.constant 0 : i32
    %c0_i32_0 = arith.constant 0 : i32
    %c0_i32_1 = arith.constant 0 : i32
    return %c0_i32, %c0_i32_0 : i32, i32
  }
  func.func @transform_2(%arg0: i32) -> (i32, i32) {
    %c0_i32 = arith.constant 0 : i32
    %c0_i32_0 = arith.constant 0 : i32
    %c0_i32_1 = arith.constant 0 : i32
    return %c0_i32, %c0_i32_0 : i32, i32
  }
  func.func @transform_3(%arg0: i32) -> (i32, i32) {
    %c0_i32 = arith.constant 0 : i32
    %c0_i32_0 = arith.constant 0 : i32
    %c0_i32_1 = arith.constant 0 : i32
    return %c0_i32, %c0_i32_0 : i32, i32
  }
  func.func @transform_4(%arg0: i32) -> (i32, i32) {
    %c0_i32 = arith.constant 0 : i32
    %c0_i32_0 = arith.constant 0 : i32
    %c0_i32_1 = arith.constant 0 : i32
    return %c0_i32, %c0_i32_0 : i32, i32
  }
  func.func @transform_5(%arg0: i32) -> (i32, i32) {
    %c0_i32 = arith.constant 0 : i32
    %c0_i32_0 = arith.constant 0 : i32
    return %arg0, %c0_i32 : i32, i32
  }
}

module attributes {stable_mosaic.version = 11 : i64} {
  func.func @_mm_kernel(%arg0: i32, %arg1: memref<32x256xbf16, #tpu.memory_space<vmem>>, %arg2: memref<256x128xbf16, #tpu.memory_space<vmem>>, %arg3: memref<1x128xf32, #tpu.memory_space<vmem>>, %arg4: memref<32x128xbf16, #tpu.memory_space<vmem>>) attributes {dimension_semantics = [#tpu.dimension_semantics<parallel>], iteration_bounds = array<i64: 1>, scalar_prefetch = 0 : i64, scratch_operands = 0 : i64, tpu.core_type = #tpu.core_type<tc>, window_params = [{transform_indices = @transform_0, window_bounds = array<i64: 32, 256>}, {pipeline_mode = #tpu.pipeline_mode<synchronous>, transform_indices = @transform_1, window_bounds = array<i64: 256, 128>}, {pipeline_mode = #tpu.pipeline_mode<synchronous>, transform_indices = @transform_2, window_bounds = array<i64: 1, 128>}, {transform_indices = @transform_3, window_bounds = array<i64: 32, 128>}]} {
    %c0 = arith.constant 0 : index
    %c0_0 = arith.constant 0 : index
    %0 = vector.load %arg1[%c0, %c0_0] : memref<32x256xbf16, #tpu.memory_space<vmem>>, vector<32x256xbf16>
    %c0_1 = arith.constant 0 : index
    %c0_2 = arith.constant 0 : index
    %1 = vector.load %arg2[%c0_1, %c0_2] : memref<256x128xbf16, #tpu.memory_space<vmem>>, vector<256x128xbf16>
    %cst = arith.constant dense<0.000000e+00> : vector<32x128xf32>
    %2 = tpu.matmul %0, %1, %cst {dimension_numbers = #tpu.dot_dimension_numbers<[1], [0], [0], [1], [0, 0, 1, 1], [], []>} : vector<32x256xbf16>, vector<256x128xbf16>, vector<32x128xf32> -> vector<32x128xf32>
    %c0_3 = arith.constant 0 : index
    %c0_4 = arith.constant 0 : index
    %3 = vector.load %arg3[%c0_3, %c0_4] : memref<1x128xf32, #tpu.memory_space<vmem>>, vector<1x128xf32>
    %4 = vector.broadcast %3 : vector<1x128xf32> to vector<32x128xf32>
    %5 = arith.addf %2, %4 : vector<32x128xf32>
    %6 = arith.truncf %5 : vector<32x128xf32> to vector<32x128xbf16>
    %c0_5 = arith.constant 0 : index
    %c0_6 = arith.constant 0 : index
    %7 = vector.load %arg4[%c0_5, %c0_6] : memref<32x128xbf16, #tpu.memory_space<vmem>>, vector<32x128xbf16>
    tpu.vector_store %arg4[%c0_5, %c0_6], %6 {strides = array<i32>} : memref<32x128xbf16, #tpu.memory_space<vmem>>, vector<32x128xbf16>,
    return
  }
  func.func @transform_0(%arg0: i32) -> (i32, i32) {
    %c0_i32 = arith.constant 0 : i32
    %c0_i32_0 = arith.constant 0 : i32
    return %arg0, %c0_i32 : i32, i32
  }
  func.func @transform_1(%arg0: i32) -> (i32, i32) {
    %c0_i32 = arith.constant 0 : i32
    %c0_i32_0 = arith.constant 0 : i32
    %c0_i32_1 = arith.constant 0 : i32
    return %c0_i32, %c0_i32_0 : i32, i32
  }
  func.func @transform_2(%arg0: i32) -> (i32, i32) {
    %c0_i32 = arith.constant 0 : i32
    %c0_i32_0 = arith.constant 0 : i32
    %c0_i32_1 = arith.constant 0 : i32
    return %c0_i32, %c0_i32_0 : i32, i32
  }
  func.func @transform_3(%arg0: i32) -> (i32, i32) {
    %c0_i32 = arith.constant 0 : i32
    %c0_i32_0 = arith.constant 0 : i32
    return %arg0, %c0_i32 : i32, i32
  }
}

module attributes {stable_mosaic.version = 11 : i64} {
  func.func @_bn_apply_kernel(%arg0: i32, %arg1: memref<32x128xbf16, #tpu.memory_space<vmem>>, %arg2: memref<1x128xf32, #tpu.memory_space<vmem>>, %arg3: memref<1x128xf32, #tpu.memory_space<vmem>>, %arg4: memref<1x128xf32, #tpu.memory_space<vmem>>, %arg5: memref<1x128xf32, #tpu.memory_space<vmem>>, %arg6: memref<32x128xbf16, #tpu.memory_space<vmem>>) attributes {dimension_semantics = [#tpu.dimension_semantics<parallel>], iteration_bounds = array<i64: 1>, scalar_prefetch = 0 : i64, scratch_operands = 0 : i64, tpu.core_type = #tpu.core_type<tc>, window_params = [{transform_indices = @transform_0, window_bounds = array<i64: 32, 128>}, {pipeline_mode = #tpu.pipeline_mode<synchronous>, transform_indices = @transform_1, window_bounds = array<i64: 1, 128>}, {pipeline_mode = #tpu.pipeline_mode<synchronous>, transform_indices = @transform_2, window_bounds = array<i64: 1, 128>}, {pipeline_mode = #tpu.pipeline_mode<synchronous>, transform_indices = @transform_3, window_bounds = array<i64: 1, 128>}, {pipeline_mode = #tpu.pipeline_mode<synchronous>, transform_indices = @transform_4, window_bounds = array<i64: 1, 128>}, {transform_indices = @transform_5, window_bounds = array<i64: 32, 128>}]} {
    %c0 = arith.constant 0 : index
    %c0_0 = arith.constant 0 : index
    %0 = vector.load %arg2[%c0, %c0_0] : memref<1x128xf32, #tpu.memory_space<vmem>>, vector<1x128xf32>
    %cst = arith.constant dense<0.000000e+00> : vector<128xf32>
    %1 = vector.multi_reduction <add>, %0, %cst [0] : vector<1x128xf32> to vector<128xf32>
    %2 = vector.shape_cast %1 : vector<128xf32> to vector<1x128xf32>
    %c0_1 = arith.constant 0 : index
    %c0_2 = arith.constant 0 : index
    %3 = vector.load %arg3[%c0_1, %c0_2] : memref<1x128xf32, #tpu.memory_space<vmem>>, vector<1x128xf32>
    %cst_3 = arith.constant dense<0.000000e+00> : vector<128xf32>
    %4 = vector.multi_reduction <add>, %3, %cst_3 [0] : vector<1x128xf32> to vector<128xf32>
    %5 = vector.shape_cast %4 : vector<128xf32> to vector<1x128xf32>
    %cst_4 = arith.constant 3.125000e-02 : f32
    %6 = vector.broadcast %cst_4 : f32 to vector<1x128xf32>
    %7 = arith.mulf %2, %6 : vector<1x128xf32>
    %cst_5 = arith.constant 3.125000e-02 : f32
    %8 = vector.broadcast %cst_5 : f32 to vector<1x128xf32>
    %9 = arith.mulf %5, %8 : vector<1x128xf32>
    %10 = arith.mulf %7, %7 : vector<1x128xf32>
    %11 = arith.subf %9, %10 : vector<1x128xf32>
    %cst_6 = arith.constant 0.000000e+00 : f32
    %12 = vector.broadcast %cst_6 : f32 to vector<1x128xf32>
    %13 = arith.maximumf %11, %12 : vector<1x128xf32>
    %c0_7 = arith.constant 0 : index
    %c0_8 = arith.constant 0 : index
    %14 = vector.load %arg1[%c0_7, %c0_8] : memref<32x128xbf16, #tpu.memory_space<vmem>>, vector<32x128xbf16>
    %15 = arith.extf %14 : vector<32x128xbf16> to vector<32x128xf32>
    %16 = vector.broadcast %7 : vector<1x128xf32> to vector<32x128xf32>
    %17 = arith.subf %15, %16 : vector<32x128xf32>
    %cst_9 = arith.constant 9.99999974E-6 : f32
    %18 = vector.broadcast %cst_9 : f32 to vector<1x128xf32>
    %19 = arith.addf %13, %18 : vector<1x128xf32>
    %20 = math.rsqrt %19 : vector<1x128xf32>
    %21 = vector.broadcast %20 : vector<1x128xf32> to vector<32x128xf32>
    %22 = arith.mulf %17, %21 : vector<32x128xf32>
    %c0_10 = arith.constant 0 : index
    %c0_11 = arith.constant 0 : index
    %23 = vector.load %arg4[%c0_10, %c0_11] : memref<1x128xf32, #tpu.memory_space<vmem>>, vector<1x128xf32>
    %24 = vector.broadcast %23 : vector<1x128xf32> to vector<32x128xf32>
    %25 = arith.mulf %22, %24 : vector<32x128xf32>
    %c0_12 = arith.constant 0 : index
    %c0_13 = arith.constant 0 : index
    %26 = vector.load %arg5[%c0_12, %c0_13] : memref<1x128xf32, #tpu.memory_space<vmem>>, vector<1x128xf32>
    %27 = vector.broadcast %26 : vector<1x128xf32> to vector<32x128xf32>
    %28 = arith.addf %25, %27 : vector<32x128xf32>
    %cst_14 = arith.constant 0.000000e+00 : f32
    %29 = vector.broadcast %cst_14 : f32 to vector<32x128xf32>
    %30 = arith.maximumf %28, %29 : vector<32x128xf32>
    %31 = arith.truncf %30 : vector<32x128xf32> to vector<32x128xbf16>
    %c0_15 = arith.constant 0 : index
    %c0_16 = arith.constant 0 : index
    %32 = vector.load %arg6[%c0_15, %c0_16] : memref<32x128xbf16, #tpu.memory_space<vmem>>, vector<32x128xbf16>
    tpu.vector_store %arg6[%c0_15, %c0_16], %31 {strides = array<i32>} : memref<32x128xbf16, #tpu.memory_space<vmem>>, vector<32x128xbf16>,
    return
  }
  func.func @transform_0(%arg0: i32) -> (i32, i32) {
    %c0_i32 = arith.constant 0 : i32
    %c0_i32_0 = arith.constant 0 : i32
    return %arg0, %c0_i32 : i32, i32
  }
  func.func @transform_1(%arg0: i32) -> (i32, i32) {
    %c0_i32 = arith.constant 0 : i32
    %c0_i32_0 = arith.constant 0 : i32
    %c0_i32_1 = arith.constant 0 : i32
    return %c0_i32, %c0_i32_0 : i32, i32
  }
  func.func @transform_2(%arg0: i32) -> (i32, i32) {
    %c0_i32 = arith.constant 0 : i32
    %c0_i32_0 = arith.constant 0 : i32
    %c0_i32_1 = arith.constant 0 : i32
    return %c0_i32, %c0_i32_0 : i32, i32
  }
  func.func @transform_3(%arg0: i32) -> (i32, i32) {
    %c0_i32 = arith.constant 0 : i32
    %c0_i32_0 = arith.constant 0 : i32
    %c0_i32_1 = arith.constant 0 : i32
    return %c0_i32, %c0_i32_0 : i32, i32
  }
  func.func @transform_4(%arg0: i32) -> (i32, i32) {
    %c0_i32 = arith.constant 0 : i32
    %c0_i32_0 = arith.constant 0 : i32
    %c0_i32_1 = arith.constant 0 : i32
    return %c0_i32, %c0_i32_0 : i32, i32
  }
  func.func @transform_5(%arg0: i32) -> (i32, i32) {
    %c0_i32 = arith.constant 0 : i32
    %c0_i32_0 = arith.constant 0 : i32
    return %arg0, %c0_i32 : i32, i32
  }
}

module attributes {stable_mosaic.version = 11 : i64} {
  func.func @_mm_kernel(%arg0: i32, %arg1: memref<32x256xbf16, #tpu.memory_space<vmem>>, %arg2: memref<256x128xbf16, #tpu.memory_space<vmem>>, %arg3: memref<1x128xf32, #tpu.memory_space<vmem>>, %arg4: memref<32x128xbf16, #tpu.memory_space<vmem>>, %arg5: memref<1x128xf32, #tpu.memory_space<vmem>>, %arg6: memref<1x128xf32, #tpu.memory_space<vmem>>) attributes {dimension_semantics = [#tpu.dimension_semantics<parallel>], iteration_bounds = array<i64: 1>, scalar_prefetch = 0 : i64, scratch_operands = 0 : i64, tpu.core_type = #tpu.core_type<tc>, window_params = [{transform_indices = @transform_0, window_bounds = array<i64: 32, 256>}, {pipeline_mode = #tpu.pipeline_mode<synchronous>, transform_indices = @transform_1, window_bounds = array<i64: 256, 128>}, {pipeline_mode = #tpu.pipeline_mode<synchronous>, transform_indices = @transform_2, window_bounds = array<i64: 1, 128>}, {transform_indices = @transform_3, window_bounds = array<i64: 32, 128>}, {transform_indices = @transform_4, window_bounds = array<i64: 1, 128>}, {transform_indices = @transform_5, window_bounds = array<i64: 1, 128>}]} {
    %c0 = arith.constant 0 : index
    %c0_0 = arith.constant 0 : index
    %0 = vector.load %arg1[%c0, %c0_0] : memref<32x256xbf16, #tpu.memory_space<vmem>>, vector<32x256xbf16>
    %cst = arith.constant 0.000000e+00 : bf16
    %1 = vector.broadcast %cst : bf16 to vector<32x256xbf16>
    %2 = arith.maximumf %0, %1 : vector<32x256xbf16>
    %c0_1 = arith.constant 0 : index
    %c0_2 = arith.constant 0 : index
    %3 = vector.load %arg2[%c0_1, %c0_2] : memref<256x128xbf16, #tpu.memory_space<vmem>>, vector<256x128xbf16>
    %cst_3 = arith.constant dense<0.000000e+00> : vector<32x128xf32>
    %4 = tpu.matmul %2, %3, %cst_3 {dimension_numbers = #tpu.dot_dimension_numbers<[1], [0], [0], [1], [0, 0, 1, 1], [], []>} : vector<32x256xbf16>, vector<256x128xbf16>, vector<32x128xf32> -> vector<32x128xf32>
    %c0_4 = arith.constant 0 : index
    %c0_5 = arith.constant 0 : index
    %5 = vector.load %arg3[%c0_4, %c0_5] : memref<1x128xf32, #tpu.memory_space<vmem>>, vector<1x128xf32>
    %6 = vector.broadcast %5 : vector<1x128xf32> to vector<32x128xf32>
    %7 = arith.addf %4, %6 : vector<32x128xf32>
    %cst_6 = arith.constant dense<0.000000e+00> : vector<128xf32>
    %8 = vector.multi_reduction <add>, %7, %cst_6 [0] : vector<32x128xf32> to vector<128xf32>
    %9 = vector.shape_cast %8 : vector<128xf32> to vector<1x128xf32>
    %c0_7 = arith.constant 0 : index
    %c0_8 = arith.constant 0 : index
    %10 = vector.load %arg5[%c0_7, %c0_8] : memref<1x128xf32, #tpu.memory_space<vmem>>, vector<1x128xf32>
    tpu.vector_store %arg5[%c0_7, %c0_8], %9 {strides = array<i32>} : memref<1x128xf32, #tpu.memory_space<vmem>>, vector<1x128xf32>,
    %11 = arith.mulf %7, %7 : vector<32x128xf32>
    %cst_9 = arith.constant dense<0.000000e+00> : vector<128xf32>
    %12 = vector.multi_reduction <add>, %11, %cst_9 [0] : vector<32x128xf32> to vector<128xf32>
    %13 = vector.shape_cast %12 : vector<128xf32> to vector<1x128xf32>
    %c0_10 = arith.constant 0 : index
    %c0_11 = arith.constant 0 : index
    %14 = vector.load %arg6[%c0_10, %c0_11] : memref<1x128xf32, #tpu.memory_space<vmem>>, vector<1x128xf32>
    tpu.vector_store %arg6[%c0_10, %c0_11], %13 {strides = array<i32>} : memref<1x128xf32, #tpu.memory_space<vmem>>, vector<1x128xf32>,
    %15 = arith.truncf %7 : vector<32x128xf32> to vector<32x128xbf16>
    %c0_12 = arith.constant 0 : index
    %c0_13 = arith.constant 0 : index
    %16 = vector.load %arg4[%c0_12, %c0_13] : memref<32x128xbf16, #tpu.memory_space<vmem>>, vector<32x128xbf16>
    tpu.vector_store %arg4[%c0_12, %c0_13], %15 {strides = array<i32>} : memref<32x128xbf16, #tpu.memory_space<vmem>>, vector<32x128xbf16>,
    return
  }
  func.func @transform_0(%arg0: i32) -> (i32, i32) {
    %c0_i32 = arith.constant 0 : i32
    %c0_i32_0 = arith.constant 0 : i32
    return %arg0, %c0_i32 : i32, i32
  }
  func.func @transform_1(%arg0: i32) -> (i32, i32) {
    %c0_i32 = arith.constant 0 : i32
    %c0_i32_0 = arith.constant 0 : i32
    %c0_i32_1 = arith.constant 0 : i32
    return %c0_i32, %c0_i32_0 : i32, i32
  }
  func.func @transform_2(%arg0: i32) -> (i32, i32) {
    %c0_i32 = arith.constant 0 : i32
    %c0_i32_0 = arith.constant 0 : i32
    %c0_i32_1 = arith.constant 0 : i32
    return %c0_i32, %c0_i32_0 : i32, i32
  }
  func.func @transform_3(%arg0: i32) -> (i32, i32) {
    %c0_i32 = arith.constant 0 : i32
    %c0_i32_0 = arith.constant 0 : i32
    return %arg0, %c0_i32 : i32, i32
  }
  func.func @transform_4(%arg0: i32) -> (i32, i32) {
    %c0_i32 = arith.constant 0 : i32
    %c0_i32_0 = arith.constant 0 : i32
    return %arg0, %c0_i32 : i32, i32
  }
  func.func @transform_5(%arg0: i32) -> (i32, i32) {
    %c0_i32 = arith.constant 0 : i32
    %c0_i32_0 = arith.constant 0 : i32
    return %arg0, %c0_i32 : i32, i32
  }
}

module attributes {stable_mosaic.version = 11 : i64} {
  func.func @_bn_apply_kernel(%arg0: i32, %arg1: memref<32x128xbf16, #tpu.memory_space<vmem>>, %arg2: memref<1x128xf32, #tpu.memory_space<vmem>>, %arg3: memref<1x128xf32, #tpu.memory_space<vmem>>, %arg4: memref<1x128xf32, #tpu.memory_space<vmem>>, %arg5: memref<1x128xf32, #tpu.memory_space<vmem>>, %arg6: memref<32x128xbf16, #tpu.memory_space<vmem>>, %arg7: memref<32x128xf32, #tpu.memory_space<vmem>>) attributes {dimension_semantics = [#tpu.dimension_semantics<parallel>], iteration_bounds = array<i64: 1>, scalar_prefetch = 0 : i64, scratch_operands = 0 : i64, tpu.core_type = #tpu.core_type<tc>, window_params = [{transform_indices = @transform_0, window_bounds = array<i64: 32, 128>}, {pipeline_mode = #tpu.pipeline_mode<synchronous>, transform_indices = @transform_1, window_bounds = array<i64: 1, 128>}, {pipeline_mode = #tpu.pipeline_mode<synchronous>, transform_indices = @transform_2, window_bounds = array<i64: 1, 128>}, {pipeline_mode = #tpu.pipeline_mode<synchronous>, transform_indices = @transform_3, window_bounds = array<i64: 1, 128>}, {pipeline_mode = #tpu.pipeline_mode<synchronous>, transform_indices = @transform_4, window_bounds = array<i64: 1, 128>}, {transform_indices = @transform_5, window_bounds = array<i64: 32, 128>}, {transform_indices = @transform_6, window_bounds = array<i64: 32, 128>}]} {
    %c0 = arith.constant 0 : index
    %c0_0 = arith.constant 0 : index
    %0 = vector.load %arg2[%c0, %c0_0] : memref<1x128xf32, #tpu.memory_space<vmem>>, vector<1x128xf32>
    %cst = arith.constant dense<0.000000e+00> : vector<128xf32>
    %1 = vector.multi_reduction <add>, %0, %cst [0] : vector<1x128xf32> to vector<128xf32>
    %2 = vector.shape_cast %1 : vector<128xf32> to vector<1x128xf32>
    %c0_1 = arith.constant 0 : index
    %c0_2 = arith.constant 0 : index
    %3 = vector.load %arg3[%c0_1, %c0_2] : memref<1x128xf32, #tpu.memory_space<vmem>>, vector<1x128xf32>
    %cst_3 = arith.constant dense<0.000000e+00> : vector<128xf32>
    %4 = vector.multi_reduction <add>, %3, %cst_3 [0] : vector<1x128xf32> to vector<128xf32>
    %5 = vector.shape_cast %4 : vector<128xf32> to vector<1x128xf32>
    %cst_4 = arith.constant 3.125000e-02 : f32
    %6 = vector.broadcast %cst_4 : f32 to vector<1x128xf32>
    %7 = arith.mulf %2, %6 : vector<1x128xf32>
    %cst_5 = arith.constant 3.125000e-02 : f32
    %8 = vector.broadcast %cst_5 : f32 to vector<1x128xf32>
    %9 = arith.mulf %5, %8 : vector<1x128xf32>
    %10 = arith.mulf %7, %7 : vector<1x128xf32>
    %11 = arith.subf %9, %10 : vector<1x128xf32>
    %cst_6 = arith.constant 0.000000e+00 : f32
    %12 = vector.broadcast %cst_6 : f32 to vector<1x128xf32>
    %13 = arith.maximumf %11, %12 : vector<1x128xf32>
    %c0_7 = arith.constant 0 : index
    %c0_8 = arith.constant 0 : index
    %14 = vector.load %arg1[%c0_7, %c0_8] : memref<32x128xbf16, #tpu.memory_space<vmem>>, vector<32x128xbf16>
    %15 = arith.extf %14 : vector<32x128xbf16> to vector<32x128xf32>
    %16 = vector.broadcast %7 : vector<1x128xf32> to vector<32x128xf32>
    %17 = arith.subf %15, %16 : vector<32x128xf32>
    %cst_9 = arith.constant 9.99999974E-6 : f32
    %18 = vector.broadcast %cst_9 : f32 to vector<1x128xf32>
    %19 = arith.addf %13, %18 : vector<1x128xf32>
    %20 = math.rsqrt %19 : vector<1x128xf32>
    %21 = vector.broadcast %20 : vector<1x128xf32> to vector<32x128xf32>
    %22 = arith.mulf %17, %21 : vector<32x128xf32>
    %c0_10 = arith.constant 0 : index
    %c0_11 = arith.constant 0 : index
    %23 = vector.load %arg4[%c0_10, %c0_11] : memref<1x128xf32, #tpu.memory_space<vmem>>, vector<1x128xf32>
    %24 = vector.broadcast %23 : vector<1x128xf32> to vector<32x128xf32>
    %25 = arith.mulf %22, %24 : vector<32x128xf32>
    %c0_12 = arith.constant 0 : index
    %c0_13 = arith.constant 0 : index
    %26 = vector.load %arg5[%c0_12, %c0_13] : memref<1x128xf32, #tpu.memory_space<vmem>>, vector<1x128xf32>
    %27 = vector.broadcast %26 : vector<1x128xf32> to vector<32x128xf32>
    %28 = arith.addf %25, %27 : vector<32x128xf32>
    %c0_14 = arith.constant 0 : index
    %c0_15 = arith.constant 0 : index
    %29 = vector.load %arg6[%c0_14, %c0_15] : memref<32x128xbf16, #tpu.memory_space<vmem>>, vector<32x128xbf16>
    %30 = arith.extf %29 : vector<32x128xbf16> to vector<32x128xf32>
    %31 = arith.addf %28, %30 : vector<32x128xf32>
    %c0_16 = arith.constant 0 : index
    %c0_17 = arith.constant 0 : index
    %32 = vector.load %arg7[%c0_16, %c0_17] : memref<32x128xf32, #tpu.memory_space<vmem>>, vector<32x128xf32>
    tpu.vector_store %arg7[%c0_16, %c0_17], %31 {strides = array<i32>} : memref<32x128xf32, #tpu.memory_space<vmem>>, vector<32x128xf32>,
    return
  }
  func.func @transform_0(%arg0: i32) -> (i32, i32) {
    %c0_i32 = arith.constant 0 : i32
    %c0_i32_0 = arith.constant 0 : i32
    return %arg0, %c0_i32 : i32, i32
  }
  func.func @transform_1(%arg0: i32) -> (i32, i32) {
    %c0_i32 = arith.constant 0 : i32
    %c0_i32_0 = arith.constant 0 : i32
    %c0_i32_1 = arith.constant 0 : i32
    return %c0_i32, %c0_i32_0 : i32, i32
  }
  func.func @transform_2(%arg0: i32) -> (i32, i32) {
    %c0_i32 = arith.constant 0 : i32
    %c0_i32_0 = arith.constant 0 : i32
    %c0_i32_1 = arith.constant 0 : i32
    return %c0_i32, %c0_i32_0 : i32, i32
  }
  func.func @transform_3(%arg0: i32) -> (i32, i32) {
    %c0_i32 = arith.constant 0 : i32
    %c0_i32_0 = arith.constant 0 : i32
    %c0_i32_1 = arith.constant 0 : i32
    return %c0_i32, %c0_i32_0 : i32, i32
  }
  func.func @transform_4(%arg0: i32) -> (i32, i32) {
    %c0_i32 = arith.constant 0 : i32
    %c0_i32_0 = arith.constant 0 : i32
    %c0_i32_1 = arith.constant 0 : i32
    return %c0_i32, %c0_i32_0 : i32, i32
  }
  func.func @transform_5(%arg0: i32) -> (i32, i32) {
    %c0_i32 = arith.constant 0 : i32
    %c0_i32_0 = arith.constant 0 : i32
    return %arg0, %c0_i32 : i32, i32
  }
  func.func @transform_6(%arg0: i32) -> (i32, i32) {
    %c0_i32 = arith.constant 0 : i32
    %c0_i32_0 = arith.constant 0 : i32
    return %arg0, %c0_i32 : i32, i32
  }
}

module attributes {stable_mosaic.version = 11 : i64} {
  func.func @_bn_apply_kernel(%arg0: i32, %arg1: memref<32x128xbf16, #tpu.memory_space<vmem>>, %arg2: memref<1x128xf32, #tpu.memory_space<vmem>>, %arg3: memref<1x128xf32, #tpu.memory_space<vmem>>, %arg4: memref<1x128xf32, #tpu.memory_space<vmem>>, %arg5: memref<1x128xf32, #tpu.memory_space<vmem>>, %arg6: memref<32x128xbf16, #tpu.memory_space<vmem>>, %arg7: memref<32x128xbf16, #tpu.memory_space<vmem>>) attributes {dimension_semantics = [#tpu.dimension_semantics<parallel>], iteration_bounds = array<i64: 1>, scalar_prefetch = 0 : i64, scratch_operands = 0 : i64, tpu.core_type = #tpu.core_type<tc>, window_params = [{transform_indices = @transform_0, window_bounds = array<i64: 32, 128>}, {pipeline_mode = #tpu.pipeline_mode<synchronous>, transform_indices = @transform_1, window_bounds = array<i64: 1, 128>}, {pipeline_mode = #tpu.pipeline_mode<synchronous>, transform_indices = @transform_2, window_bounds = array<i64: 1, 128>}, {pipeline_mode = #tpu.pipeline_mode<synchronous>, transform_indices = @transform_3, window_bounds = array<i64: 1, 128>}, {pipeline_mode = #tpu.pipeline_mode<synchronous>, transform_indices = @transform_4, window_bounds = array<i64: 1, 128>}, {transform_indices = @transform_5, window_bounds = array<i64: 32, 128>}, {transform_indices = @transform_6, window_bounds = array<i64: 32, 128>}]} {
    %c0 = arith.constant 0 : index
    %c0_0 = arith.constant 0 : index
    %0 = vector.load %arg2[%c0, %c0_0] : memref<1x128xf32, #tpu.memory_space<vmem>>, vector<1x128xf32>
    %cst = arith.constant dense<0.000000e+00> : vector<128xf32>
    %1 = vector.multi_reduction <add>, %0, %cst [0] : vector<1x128xf32> to vector<128xf32>
    %2 = vector.shape_cast %1 : vector<128xf32> to vector<1x128xf32>
    %c0_1 = arith.constant 0 : index
    %c0_2 = arith.constant 0 : index
    %3 = vector.load %arg3[%c0_1, %c0_2] : memref<1x128xf32, #tpu.memory_space<vmem>>, vector<1x128xf32>
    %cst_3 = arith.constant dense<0.000000e+00> : vector<128xf32>
    %4 = vector.multi_reduction <add>, %3, %cst_3 [0] : vector<1x128xf32> to vector<128xf32>
    %5 = vector.shape_cast %4 : vector<128xf32> to vector<1x128xf32>
    %cst_4 = arith.constant 3.125000e-02 : f32
    %6 = vector.broadcast %cst_4 : f32 to vector<1x128xf32>
    %7 = arith.mulf %2, %6 : vector<1x128xf32>
    %cst_5 = arith.constant 3.125000e-02 : f32
    %8 = vector.broadcast %cst_5 : f32 to vector<1x128xf32>
    %9 = arith.mulf %5, %8 : vector<1x128xf32>
    %10 = arith.mulf %7, %7 : vector<1x128xf32>
    %11 = arith.subf %9, %10 : vector<1x128xf32>
    %cst_6 = arith.constant 0.000000e+00 : f32
    %12 = vector.broadcast %cst_6 : f32 to vector<1x128xf32>
    %13 = arith.maximumf %11, %12 : vector<1x128xf32>
    %c0_7 = arith.constant 0 : index
    %c0_8 = arith.constant 0 : index
    %14 = vector.load %arg1[%c0_7, %c0_8] : memref<32x128xbf16, #tpu.memory_space<vmem>>, vector<32x128xbf16>
    %15 = arith.extf %14 : vector<32x128xbf16> to vector<32x128xf32>
    %16 = vector.broadcast %7 : vector<1x128xf32> to vector<32x128xf32>
    %17 = arith.subf %15, %16 : vector<32x128xf32>
    %cst_9 = arith.constant 9.99999974E-6 : f32
    %18 = vector.broadcast %cst_9 : f32 to vector<1x128xf32>
    %19 = arith.addf %13, %18 : vector<1x128xf32>
    %20 = math.rsqrt %19 : vector<1x128xf32>
    %21 = vector.broadcast %20 : vector<1x128xf32> to vector<32x128xf32>
    %22 = arith.mulf %17, %21 : vector<32x128xf32>
    %c0_10 = arith.constant 0 : index
    %c0_11 = arith.constant 0 : index
    %23 = vector.load %arg4[%c0_10, %c0_11] : memref<1x128xf32, #tpu.memory_space<vmem>>, vector<1x128xf32>
    %24 = vector.broadcast %23 : vector<1x128xf32> to vector<32x128xf32>
    %25 = arith.mulf %22, %24 : vector<32x128xf32>
    %c0_12 = arith.constant 0 : index
    %c0_13 = arith.constant 0 : index
    %26 = vector.load %arg5[%c0_12, %c0_13] : memref<1x128xf32, #tpu.memory_space<vmem>>, vector<1x128xf32>
    %27 = vector.broadcast %26 : vector<1x128xf32> to vector<32x128xf32>
    %28 = arith.addf %25, %27 : vector<32x128xf32>
    %c0_14 = arith.constant 0 : index
    %c0_15 = arith.constant 0 : index
    %29 = vector.load %arg6[%c0_14, %c0_15] : memref<32x128xbf16, #tpu.memory_space<vmem>>, vector<32x128xbf16>
    %30 = arith.extf %29 : vector<32x128xbf16> to vector<32x128xf32>
    %31 = arith.addf %28, %30 : vector<32x128xf32>
    %32 = arith.truncf %31 : vector<32x128xf32> to vector<32x128xbf16>
    %c0_16 = arith.constant 0 : index
    %c0_17 = arith.constant 0 : index
    %33 = vector.load %arg7[%c0_16, %c0_17] : memref<32x128xbf16, #tpu.memory_space<vmem>>, vector<32x128xbf16>
    tpu.vector_store %arg7[%c0_16, %c0_17], %32 {strides = array<i32>} : memref<32x128xbf16, #tpu.memory_space<vmem>>, vector<32x128xbf16>,
    return
  }
  func.func @transform_0(%arg0: i32) -> (i32, i32) {
    %c0_i32 = arith.constant 0 : i32
    %c0_i32_0 = arith.constant 0 : i32
    return %arg0, %c0_i32 : i32, i32
  }
  func.func @transform_1(%arg0: i32) -> (i32, i32) {
    %c0_i32 = arith.constant 0 : i32
    %c0_i32_0 = arith.constant 0 : i32
    %c0_i32_1 = arith.constant 0 : i32
    return %c0_i32, %c0_i32_0 : i32, i32
  }
  func.func @transform_2(%arg0: i32) -> (i32, i32) {
    %c0_i32 = arith.constant 0 : i32
    %c0_i32_0 = arith.constant 0 : i32
    %c0_i32_1 = arith.constant 0 : i32
    return %c0_i32, %c0_i32_0 : i32, i32
  }
  func.func @transform_3(%arg0: i32) -> (i32, i32) {
    %c0_i32 = arith.constant 0 : i32
    %c0_i32_0 = arith.constant 0 : i32
    %c0_i32_1 = arith.constant 0 : i32
    return %c0_i32, %c0_i32_0 : i32, i32
  }
  func.func @transform_4(%arg0: i32) -> (i32, i32) {
    %c0_i32 = arith.constant 0 : i32
    %c0_i32_0 = arith.constant 0 : i32
    %c0_i32_1 = arith.constant 0 : i32
    return %c0_i32, %c0_i32_0 : i32, i32
  }
  func.func @transform_5(%arg0: i32) -> (i32, i32) {
    %c0_i32 = arith.constant 0 : i32
    %c0_i32_0 = arith.constant 0 : i32
    return %arg0, %c0_i32 : i32, i32
  }
  func.func @transform_6(%arg0: i32) -> (i32, i32) {
    %c0_i32 = arith.constant 0 : i32
    %c0_i32_0 = arith.constant 0 : i32
    return %arg0, %c0_i32 : i32, i32
  }
}

module attributes {stable_mosaic.version = 11 : i64} {
  func.func @_mm_kernel(%arg0: i32, %arg1: memref<32x128xbf16, #tpu.memory_space<vmem>>, %arg2: memref<128x128xbf16, #tpu.memory_space<vmem>>, %arg3: memref<1x128xf32, #tpu.memory_space<vmem>>, %arg4: memref<32x128xbf16, #tpu.memory_space<vmem>>, %arg5: memref<1x128xf32, #tpu.memory_space<vmem>>, %arg6: memref<1x128xf32, #tpu.memory_space<vmem>>) attributes {dimension_semantics = [#tpu.dimension_semantics<parallel>], iteration_bounds = array<i64: 1>, scalar_prefetch = 0 : i64, scratch_operands = 0 : i64, tpu.core_type = #tpu.core_type<tc>, window_params = [{transform_indices = @transform_0, window_bounds = array<i64: 32, 128>}, {pipeline_mode = #tpu.pipeline_mode<synchronous>, transform_indices = @transform_1, window_bounds = array<i64: 128, 128>}, {pipeline_mode = #tpu.pipeline_mode<synchronous>, transform_indices = @transform_2, window_bounds = array<i64: 1, 128>}, {transform_indices = @transform_3, window_bounds = array<i64: 32, 128>}, {transform_indices = @transform_4, window_bounds = array<i64: 1, 128>}, {transform_indices = @transform_5, window_bounds = array<i64: 1, 128>}]} {
    %c0 = arith.constant 0 : index
    %c0_0 = arith.constant 0 : index
    %0 = vector.load %arg1[%c0, %c0_0] : memref<32x128xbf16, #tpu.memory_space<vmem>>, vector<32x128xbf16>
    %c0_1 = arith.constant 0 : index
    %c0_2 = arith.constant 0 : index
    %1 = vector.load %arg2[%c0_1, %c0_2] : memref<128x128xbf16, #tpu.memory_space<vmem>>, vector<128x128xbf16>
    %cst = arith.constant dense<0.000000e+00> : vector<32x128xf32>
    %2 = tpu.matmul %0, %1, %cst {dimension_numbers = #tpu.dot_dimension_numbers<[1], [0], [0], [1], [0, 0, 1, 1], [], []>} : vector<32x128xbf16>, vector<128x128xbf16>, vector<32x128xf32> -> vector<32x128xf32>
    %c0_3 = arith.constant 0 : index
    %c0_4 = arith.constant 0 : index
    %3 = vector.load %arg3[%c0_3, %c0_4] : memref<1x128xf32, #tpu.memory_space<vmem>>, vector<1x128xf32>
    %4 = vector.broadcast %3 : vector<1x128xf32> to vector<32x128xf32>
    %5 = arith.addf %2, %4 : vector<32x128xf32>
    %cst_5 = arith.constant dense<0.000000e+00> : vector<128xf32>
    %6 = vector.multi_reduction <add>, %5, %cst_5 [0] : vector<32x128xf32> to vector<128xf32>
    %7 = vector.shape_cast %6 : vector<128xf32> to vector<1x128xf32>
    %c0_6 = arith.constant 0 : index
    %c0_7 = arith.constant 0 : index
    %8 = vector.load %arg5[%c0_6, %c0_7] : memref<1x128xf32, #tpu.memory_space<vmem>>, vector<1x128xf32>
    tpu.vector_store %arg5[%c0_6, %c0_7], %7 {strides = array<i32>} : memref<1x128xf32, #tpu.memory_space<vmem>>, vector<1x128xf32>,
    %9 = arith.mulf %5, %5 : vector<32x128xf32>
    %cst_8 = arith.constant dense<0.000000e+00> : vector<128xf32>
    %10 = vector.multi_reduction <add>, %9, %cst_8 [0] : vector<32x128xf32> to vector<128xf32>
    %11 = vector.shape_cast %10 : vector<128xf32> to vector<1x128xf32>
    %c0_9 = arith.constant 0 : index
    %c0_10 = arith.constant 0 : index
    %12 = vector.load %arg6[%c0_9, %c0_10] : memref<1x128xf32, #tpu.memory_space<vmem>>, vector<1x128xf32>
    tpu.vector_store %arg6[%c0_9, %c0_10], %11 {strides = array<i32>} : memref<1x128xf32, #tpu.memory_space<vmem>>, vector<1x128xf32>,
    %13 = arith.truncf %5 : vector<32x128xf32> to vector<32x128xbf16>
    %c0_11 = arith.constant 0 : index
    %c0_12 = arith.constant 0 : index
    %14 = vector.load %arg4[%c0_11, %c0_12] : memref<32x128xbf16, #tpu.memory_space<vmem>>, vector<32x128xbf16>
    tpu.vector_store %arg4[%c0_11, %c0_12], %13 {strides = array<i32>} : memref<32x128xbf16, #tpu.memory_space<vmem>>, vector<32x128xbf16>,
    return
  }
  func.func @transform_0(%arg0: i32) -> (i32, i32) {
    %c0_i32 = arith.constant 0 : i32
    %c0_i32_0 = arith.constant 0 : i32
    return %arg0, %c0_i32 : i32, i32
  }
  func.func @transform_1(%arg0: i32) -> (i32, i32) {
    %c0_i32 = arith.constant 0 : i32
    %c0_i32_0 = arith.constant 0 : i32
    %c0_i32_1 = arith.constant 0 : i32
    return %c0_i32, %c0_i32_0 : i32, i32
  }
  func.func @transform_2(%arg0: i32) -> (i32, i32) {
    %c0_i32 = arith.constant 0 : i32
    %c0_i32_0 = arith.constant 0 : i32
    %c0_i32_1 = arith.constant 0 : i32
    return %c0_i32, %c0_i32_0 : i32, i32
  }
  func.func @transform_3(%arg0: i32) -> (i32, i32) {
    %c0_i32 = arith.constant 0 : i32
    %c0_i32_0 = arith.constant 0 : i32
    return %arg0, %c0_i32 : i32, i32
  }
  func.func @transform_4(%arg0: i32) -> (i32, i32) {
    %c0_i32 = arith.constant 0 : i32
    %c0_i32_0 = arith.constant 0 : i32
    return %arg0, %c0_i32 : i32, i32
  }
  func.func @transform_5(%arg0: i32) -> (i32, i32) {
    %c0_i32 = arith.constant 0 : i32
    %c0_i32_0 = arith.constant 0 : i32
    return %arg0, %c0_i32 : i32, i32
  }
}

module attributes {stable_mosaic.version = 11 : i64} {
  func.func @_vq_kernel(%arg0: i32, %arg1: memref<32x128xf32, #tpu.memory_space<vmem>>, %arg2: memref<128x128xbf16, #tpu.memory_space<vmem>>, %arg3: memref<1x128xf32, #tpu.memory_space<vmem>>, %arg4: memref<32x1xi32, #tpu.memory_space<vmem>>) attributes {dimension_semantics = [#tpu.dimension_semantics<parallel>], iteration_bounds = array<i64: 1>, scalar_prefetch = 0 : i64, scratch_operands = 0 : i64, tpu.core_type = #tpu.core_type<tc>, window_params = [{transform_indices = @transform_0, window_bounds = array<i64: 32, 128>}, {pipeline_mode = #tpu.pipeline_mode<synchronous>, transform_indices = @transform_1, window_bounds = array<i64: 128, 128>}, {pipeline_mode = #tpu.pipeline_mode<synchronous>, transform_indices = @transform_2, window_bounds = array<i64: 1, 128>}, {transform_indices = @transform_3, window_bounds = array<i64: 32, 1>}]} {
    %c0 = arith.constant 0 : index
    %c0_0 = arith.constant 0 : index
    %0 = vector.load %arg1[%c0, %c0_0] : memref<32x128xf32, #tpu.memory_space<vmem>>, vector<32x128xf32>
    %1 = arith.truncf %0 : vector<32x128xf32> to vector<32x128xbf16>
    %c0_1 = arith.constant 0 : index
    %c0_2 = arith.constant 0 : index
    %2 = vector.load %arg3[%c0_1, %c0_2] : memref<1x128xf32, #tpu.memory_space<vmem>>, vector<1x128xf32>
    %c0_3 = arith.constant 0 : index
    %c0_4 = arith.constant 0 : index
    %3 = vector.load %arg2[%c0_3, %c0_4] : memref<128x128xbf16, #tpu.memory_space<vmem>>, vector<128x128xbf16>
    %cst = arith.constant dense<0.000000e+00> : vector<32x128xf32>
    %4 = tpu.matmul %1, %3, %cst {dimension_numbers = #tpu.dot_dimension_numbers<[1], [0], [0], [1], [0, 0, 1, 1], [], []>} : vector<32x128xbf16>, vector<128x128xbf16>, vector<32x128xf32> -> vector<32x128xf32>
    %cst_5 = arith.constant 2.000000e+00 : f32
    %5 = vector.broadcast %cst_5 : f32 to vector<32x128xf32>
    %6 = arith.mulf %5, %4 : vector<32x128xf32>
    %7 = vector.broadcast %2 : vector<1x128xf32> to vector<32x128xf32>
    %8 = arith.subf %7, %6 : vector<32x128xf32>
    %9 = tpu.iota {dimensions = array<i32: 1>} : vector<32x128xi32>
    %cst_6 = arith.constant dense<0x7F800000> : vector<32xf32>
    %10 = vector.multi_reduction <minimumf>, %8, %cst_6 [1] : vector<32x128xf32> to vector<32xf32>
    %11 = vector.shape_cast %10 : vector<32xf32> to vector<32x1xf32>
    %12 = vector.broadcast %11 : vector<32x1xf32> to vector<32x128xf32>
    %13 = arith.cmpf ole, %8, %12 : vector<32x128xf32>
    %c128_i32 = arith.constant 128 : i32
    %14 = vector.broadcast %c128_i32 : i32 to vector<32x128xi32>
    %15 = arith.select %13, %9, %14 : vector<32x128xi1>, vector<32x128xi32>
    %cst_7 = arith.constant dense<2147483647> : vector<32xi32>
    %16 = vector.multi_reduction <minsi>, %15, %cst_7 [1] : vector<32x128xi32> to vector<32xi32>
    %17 = vector.shape_cast %16 : vector<32xi32> to vector<32x1xi32>
    %c0_8 = arith.constant 0 : index
    %c0_9 = arith.constant 0 : index
    %18 = vector.load %arg4[%c0_8, %c0_9] : memref<32x1xi32, #tpu.memory_space<vmem>>, vector<32x1xi32>
    tpu.vector_store %arg4[%c0_8, %c0_9], %17 {strides = array<i32>} : memref<32x1xi32, #tpu.memory_space<vmem>>, vector<32x1xi32>,
    return
  }
  func.func @transform_0(%arg0: i32) -> (i32, i32) {
    %c0_i32 = arith.constant 0 : i32
    %c0_i32_0 = arith.constant 0 : i32
    return %arg0, %c0_i32 : i32, i32
  }
  func.func @transform_1(%arg0: i32) -> (i32, i32) {
    %c0_i32 = arith.constant 0 : i32
    %c0_i32_0 = arith.constant 0 : i32
    %c0_i32_1 = arith.constant 0 : i32
    return %c0_i32, %c0_i32_0 : i32, i32
  }
  func.func @transform_2(%arg0: i32) -> (i32, i32) {
    %c0_i32 = arith.constant 0 : i32
    %c0_i32_0 = arith.constant 0 : i32
    %c0_i32_1 = arith.constant 0 : i32
    return %c0_i32, %c0_i32_0 : i32, i32
  }
  func.func @transform_3(%arg0: i32) -> (i32, i32) {
    %c0_i32 = arith.constant 0 : i32
    %c0_i32_0 = arith.constant 0 : i32
    return %arg0, %c0_i32 : i32, i32
  }
}

module attributes {stable_mosaic.version = 11 : i64} {
  func.func @_mm_kernel(%arg0: i32, %arg1: memref<16x128xbf16, #tpu.memory_space<vmem>>, %arg2: memref<128x384xbf16, #tpu.memory_space<vmem>>, %arg3: memref<1x384xf32, #tpu.memory_space<vmem>>, %arg4: memref<16x384xf32, #tpu.memory_space<vmem>>) attributes {dimension_semantics = [#tpu.dimension_semantics<parallel>], iteration_bounds = array<i64: 1>, scalar_prefetch = 0 : i64, scratch_operands = 0 : i64, tpu.core_type = #tpu.core_type<tc>, window_params = [{transform_indices = @transform_0, window_bounds = array<i64: 16, 128>}, {pipeline_mode = #tpu.pipeline_mode<synchronous>, transform_indices = @transform_1, window_bounds = array<i64: 128, 384>}, {pipeline_mode = #tpu.pipeline_mode<synchronous>, transform_indices = @transform_2, window_bounds = array<i64: 1, 384>}, {transform_indices = @transform_3, window_bounds = array<i64: 16, 384>}]} {
    %c0 = arith.constant 0 : index
    %c0_0 = arith.constant 0 : index
    %0 = vector.load %arg1[%c0, %c0_0] : memref<16x128xbf16, #tpu.memory_space<vmem>>, vector<16x128xbf16>
    %c0_1 = arith.constant 0 : index
    %c0_2 = arith.constant 0 : index
    %1 = vector.load %arg2[%c0_1, %c0_2] : memref<128x384xbf16, #tpu.memory_space<vmem>>, vector<128x384xbf16>
    %cst = arith.constant dense<0.000000e+00> : vector<16x384xf32>
    %2 = tpu.matmul %0, %1, %cst {dimension_numbers = #tpu.dot_dimension_numbers<[1], [0], [0], [1], [0, 0, 1, 1], [], []>} : vector<16x128xbf16>, vector<128x384xbf16>, vector<16x384xf32> -> vector<16x384xf32>
    %c0_3 = arith.constant 0 : index
    %c0_4 = arith.constant 0 : index
    %3 = vector.load %arg3[%c0_3, %c0_4] : memref<1x384xf32, #tpu.memory_space<vmem>>, vector<1x384xf32>
    %4 = vector.broadcast %3 : vector<1x384xf32> to vector<16x384xf32>
    %5 = arith.addf %2, %4 : vector<16x384xf32>
    %c0_5 = arith.constant 0 : index
    %c0_6 = arith.constant 0 : index
    %6 = vector.load %arg4[%c0_5, %c0_6] : memref<16x384xf32, #tpu.memory_space<vmem>>, vector<16x384xf32>
    tpu.vector_store %arg4[%c0_5, %c0_6], %5 {strides = array<i32>} : memref<16x384xf32, #tpu.memory_space<vmem>>, vector<16x384xf32>,
    return
  }
  func.func @transform_0(%arg0: i32) -> (i32, i32) {
    %c0_i32 = arith.constant 0 : i32
    %c0_i32_0 = arith.constant 0 : i32
    return %arg0, %c0_i32 : i32, i32
  }
  func.func @transform_1(%arg0: i32) -> (i32, i32) {
    %c0_i32 = arith.constant 0 : i32
    %c0_i32_0 = arith.constant 0 : i32
    %c0_i32_1 = arith.constant 0 : i32
    return %c0_i32, %c0_i32_0 : i32, i32
  }
  func.func @transform_2(%arg0: i32) -> (i32, i32) {
    %c0_i32 = arith.constant 0 : i32
    %c0_i32_0 = arith.constant 0 : i32
    %c0_i32_1 = arith.constant 0 : i32
    return %c0_i32, %c0_i32_0 : i32, i32
  }
  func.func @transform_3(%arg0: i32) -> (i32, i32) {
    %c0_i32 = arith.constant 0 : i32
    %c0_i32_0 = arith.constant 0 : i32
    return %arg0, %c0_i32 : i32, i32
  }
}

module attributes {stable_mosaic.version = 11 : i64} {
  func.func @_cpc_kernel(%arg0: i32, %arg1: memref<8x8x384xf32, #tpu.memory_space<vmem>>, %arg2: memref<8x128xf32, #tpu.memory_space<vmem>>, %arg3: memref<128x384xbf16, #tpu.memory_space<vmem>>, %arg4: memref<1x384xf32, #tpu.memory_space<vmem>>, %arg5: memref<4x2x128xbf16, #tpu.memory_space<vmem>>, %arg6: memref<128x512xbf16, #tpu.memory_space<vmem>>, %arg7: memref<1x512xf32, #tpu.memory_space<vmem>>, %arg8: memref<1x1xf32, #tpu.memory_space<vmem>>, %arg9: memref<1x1xf32, #tpu.memory_space<vmem>>) attributes {dimension_semantics = [#tpu.dimension_semantics<arbitrary>], iteration_bounds = array<i64: 1>, scalar_prefetch = 0 : i64, scratch_operands = 0 : i64, tpu.core_type = #tpu.core_type<tc>, window_params = [{pipeline_mode = #tpu.pipeline_mode<synchronous>, transform_indices = @transform_0, window_bounds = array<i64: 8, 8, 384>}, {pipeline_mode = #tpu.pipeline_mode<synchronous>, transform_indices = @transform_1, window_bounds = array<i64: 8, 128>}, {pipeline_mode = #tpu.pipeline_mode<synchronous>, transform_indices = @transform_2, window_bounds = array<i64: 128, 384>}, {pipeline_mode = #tpu.pipeline_mode<synchronous>, transform_indices = @transform_3, window_bounds = array<i64: 1, 384>}, {pipeline_mode = #tpu.pipeline_mode<synchronous>, transform_indices = @transform_4, window_bounds = array<i64: 4, 2, 128>}, {pipeline_mode = #tpu.pipeline_mode<synchronous>, transform_indices = @transform_5, window_bounds = array<i64: 128, 512>}, {pipeline_mode = #tpu.pipeline_mode<synchronous>, transform_indices = @transform_6, window_bounds = array<i64: 1, 512>}, {pipeline_mode = #tpu.pipeline_mode<synchronous>, transform_indices = @transform_7, window_bounds = array<i64: 1, 1>}, {pipeline_mode = #tpu.pipeline_mode<synchronous>, transform_indices = @transform_8, window_bounds = array<i64: 1, 1>}]} {
    %c0 = arith.constant 0 : index
    %c0_0 = arith.constant 0 : index
    %0 = vector.load %arg3[%c0, %c0_0] : memref<128x384xbf16, #tpu.memory_space<vmem>>, vector<128x384xbf16>
    %c0_1 = arith.constant 0 : index
    %c0_2 = arith.constant 0 : index
    %1 = vector.load %arg4[%c0_1, %c0_2] : memref<1x384xf32, #tpu.memory_space<vmem>>, vector<1x384xf32>
    %c0_3 = arith.constant 0 : index
    %c0_4 = arith.constant 0 : index
    %2 = vector.load %arg2[%c0_3, %c0_4] : memref<8x128xf32, #tpu.memory_space<vmem>>, vector<8x128xf32>
    %c0_i32 = arith.constant 0 : i32
    %3 = arith.index_cast %c0_i32 : i32 to index
    %c0_5 = arith.constant 0 : index
    %c0_6 = arith.constant 0 : index
    %4 = vector.load %arg1[%3, %c0_5, %c0_6] : memref<8x8x384xf32, #tpu.memory_space<vmem>>, vector<1x8x384xf32>
    %5 = vector.shape_cast %4 : vector<1x8x384xf32> to vector<8x384xf32>
    %6 = arith.truncf %2 : vector<8x128xf32> to vector<8x128xbf16>
    %cst = arith.constant dense<0.000000e+00> : vector<8x384xf32>
    %7 = tpu.matmul %6, %0, %cst {dimension_numbers = #tpu.dot_dimension_numbers<[1], [0], [0], [1], [0, 0, 1, 1], [], []>} : vector<8x128xbf16>, vector<128x384xbf16>, vector<8x384xf32> -> vector<8x384xf32>
    %8 = vector.broadcast %1 : vector<1x384xf32> to vector<8x384xf32>
    %9 = arith.addf %7, %8 : vector<8x384xf32>
    %10 = vector.extract_strided_slice %5 {offsets = [0, 0], sizes = [8, 128], strides = [1, 1]} : vector<8x384xf32> to vector<8x128xf32>
    %11 = vector.extract_strided_slice %9 {offsets = [0, 0], sizes = [8, 128], strides = [1, 1]} : vector<8x384xf32> to vector<8x128xf32>
    %12 = arith.addf %10, %11 : vector<8x128xf32>
    %13 = arith.negf %12 : vector<8x128xf32>
    %14 = math.exp %13 : vector<8x128xf32>
    %cst_7 = arith.constant 1.000000e+00 : f32
    %15 = vector.broadcast %cst_7 : f32 to vector<8x128xf32>
    %16 = arith.addf %15, %14 : vector<8x128xf32>
    %17 = arith.divf %15, %16 : vector<8x128xf32>
    %18 = vector.extract_strided_slice %5 {offsets = [0, 128], sizes = [8, 128], strides = [1, 1]} : vector<8x384xf32> to vector<8x128xf32>
    %19 = vector.extract_strided_slice %9 {offsets = [0, 128], sizes = [8, 128], strides = [1, 1]} : vector<8x384xf32> to vector<8x128xf32>
    %20 = arith.addf %18, %19 : vector<8x128xf32>
    %21 = arith.negf %20 : vector<8x128xf32>
    %22 = math.exp %21 : vector<8x128xf32>
    %cst_8 = arith.constant 1.000000e+00 : f32
    %23 = vector.broadcast %cst_8 : f32 to vector<8x128xf32>
    %24 = arith.addf %23, %22 : vector<8x128xf32>
    %25 = arith.divf %23, %24 : vector<8x128xf32>
    %26 = vector.extract_strided_slice %5 {offsets = [0, 256], sizes = [8, 128], strides = [1, 1]} : vector<8x384xf32> to vector<8x128xf32>
    %27 = vector.extract_strided_slice %9 {offsets = [0, 256], sizes = [8, 128], strides = [1, 1]} : vector<8x384xf32> to vector<8x128xf32>
    %28 = arith.mulf %17, %27 : vector<8x128xf32>
    %29 = arith.addf %26, %28 : vector<8x128xf32>
    %30 = math.tanh %29 : vector<8x128xf32>
    %cst_9 = arith.constant 1.000000e+00 : f32
    %31 = vector.broadcast %cst_9 : f32 to vector<8x128xf32>
    %32 = arith.subf %31, %25 : vector<8x128xf32>
    %33 = arith.mulf %32, %30 : vector<8x128xf32>
    %34 = arith.mulf %25, %2 : vector<8x128xf32>
    %35 = arith.addf %33, %34 : vector<8x128xf32>
    %c1_i32 = arith.constant 1 : i32
    %36 = arith.index_cast %c1_i32 : i32 to index
    %c0_10 = arith.constant 0 : index
    %c0_11 = arith.constant 0 : index
    %37 = vector.load %arg1[%36, %c0_10, %c0_11] : memref<8x8x384xf32, #tpu.memory_space<vmem>>, vector<1x8x384xf32>
    %38 = vector.shape_cast %37 : vector<1x8x384xf32> to vector<8x384xf32>
    %39 = arith.truncf %35 : vector<8x128xf32> to vector<8x128xbf16>
    %cst_12 = arith.constant dense<0.000000e+00> : vector<8x384xf32>
    %40 = tpu.matmul %39, %0, %cst_12 {dimension_numbers = #tpu.dot_dimension_numbers<[1], [0], [0], [1], [0, 0, 1, 1], [], []>} : vector<8x128xbf16>, vector<128x384xbf16>, vector<8x384xf32> -> vector<8x384xf32>
    %41 = vector.broadcast %1 : vector<1x384xf32> to vector<8x384xf32>
    %42 = arith.addf %40, %41 : vector<8x384xf32>
    %43 = vector.extract_strided_slice %38 {offsets = [0, 0], sizes = [8, 128], strides = [1, 1]} : vector<8x384xf32> to vector<8x128xf32>
    %44 = vector.extract_strided_slice %42 {offsets = [0, 0], sizes = [8, 128], strides = [1, 1]} : vector<8x384xf32> to vector<8x128xf32>
    %45 = arith.addf %43, %44 : vector<8x128xf32>
    %46 = arith.negf %45 : vector<8x128xf32>
    %47 = math.exp %46 : vector<8x128xf32>
    %cst_13 = arith.constant 1.000000e+00 : f32
    %48 = vector.broadcast %cst_13 : f32 to vector<8x128xf32>
    %49 = arith.addf %48, %47 : vector<8x128xf32>
    %50 = arith.divf %48, %49 : vector<8x128xf32>
    %51 = vector.extract_strided_slice %38 {offsets = [0, 128], sizes = [8, 128], strides = [1, 1]} : vector<8x384xf32> to vector<8x128xf32>
    %52 = vector.extract_strided_slice %42 {offsets = [0, 128], sizes = [8, 128], strides = [1, 1]} : vector<8x384xf32> to vector<8x128xf32>
    %53 = arith.addf %51, %52 : vector<8x128xf32>
    %54 = arith.negf %53 : vector<8x128xf32>
    %55 = math.exp %54 : vector<8x128xf32>
    %cst_14 = arith.constant 1.000000e+00 : f32
    %56 = vector.broadcast %cst_14 : f32 to vector<8x128xf32>
    %57 = arith.addf %56, %55 : vector<8x128xf32>
    %58 = arith.divf %56, %57 : vector<8x128xf32>
    %59 = vector.extract_strided_slice %38 {offsets = [0, 256], sizes = [8, 128], strides = [1, 1]} : vector<8x384xf32> to vector<8x128xf32>
    %60 = vector.extract_strided_slice %42 {offsets = [0, 256], sizes = [8, 128], strides = [1, 1]} : vector<8x384xf32> to vector<8x128xf32>
    %61 = arith.mulf %50, %60 : vector<8x128xf32>
    %62 = arith.addf %59, %61 : vector<8x128xf32>
    %63 = math.tanh %62 : vector<8x128xf32>
    %cst_15 = arith.constant 1.000000e+00 : f32
    %64 = vector.broadcast %cst_15 : f32 to vector<8x128xf32>
    %65 = arith.subf %64, %58 : vector<8x128xf32>
    %66 = arith.mulf %65, %63 : vector<8x128xf32>
    %67 = arith.mulf %58, %35 : vector<8x128xf32>
    %68 = arith.addf %66, %67 : vector<8x128xf32>
    %c2_i32 = arith.constant 2 : i32
    %69 = arith.index_cast %c2_i32 : i32 to index
    %c0_16 = arith.constant 0 : index
    %c0_17 = arith.constant 0 : index
    %70 = vector.load %arg1[%69, %c0_16, %c0_17] : memref<8x8x384xf32, #tpu.memory_space<vmem>>, vector<1x8x384xf32>
    %71 = vector.shape_cast %70 : vector<1x8x384xf32> to vector<8x384xf32>
    %72 = arith.truncf %68 : vector<8x128xf32> to vector<8x128xbf16>
    %cst_18 = arith.constant dense<0.000000e+00> : vector<8x384xf32>
    %73 = tpu.matmul %72, %0, %cst_18 {dimension_numbers = #tpu.dot_dimension_numbers<[1], [0], [0], [1], [0, 0, 1, 1], [], []>} : vector<8x128xbf16>, vector<128x384xbf16>, vector<8x384xf32> -> vector<8x384xf32>
    %74 = vector.broadcast %1 : vector<1x384xf32> to vector<8x384xf32>
    %75 = arith.addf %73, %74 : vector<8x384xf32>
    %76 = vector.extract_strided_slice %71 {offsets = [0, 0], sizes = [8, 128], strides = [1, 1]} : vector<8x384xf32> to vector<8x128xf32>
    %77 = vector.extract_strided_slice %75 {offsets = [0, 0], sizes = [8, 128], strides = [1, 1]} : vector<8x384xf32> to vector<8x128xf32>
    %78 = arith.addf %76, %77 : vector<8x128xf32>
    %79 = arith.negf %78 : vector<8x128xf32>
    %80 = math.exp %79 : vector<8x128xf32>
    %cst_19 = arith.constant 1.000000e+00 : f32
    %81 = vector.broadcast %cst_19 : f32 to vector<8x128xf32>
    %82 = arith.addf %81, %80 : vector<8x128xf32>
    %83 = arith.divf %81, %82 : vector<8x128xf32>
    %84 = vector.extract_strided_slice %71 {offsets = [0, 128], sizes = [8, 128], strides = [1, 1]} : vector<8x384xf32> to vector<8x128xf32>
    %85 = vector.extract_strided_slice %75 {offsets = [0, 128], sizes = [8, 128], strides = [1, 1]} : vector<8x384xf32> to vector<8x128xf32>
    %86 = arith.addf %84, %85 : vector<8x128xf32>
    %87 = arith.negf %86 : vector<8x128xf32>
    %88 = math.exp %87 : vector<8x128xf32>
    %cst_20 = arith.constant 1.000000e+00 : f32
    %89 = vector.broadcast %cst_20 : f32 to vector<8x128xf32>
    %90 = arith.addf %89, %88 : vector<8x128xf32>
    %91 = arith.divf %89, %90 : vector<8x128xf32>
    %92 = vector.extract_strided_slice %71 {offsets = [0, 256], sizes = [8, 128], strides = [1, 1]} : vector<8x384xf32> to vector<8x128xf32>
    %93 = vector.extract_strided_slice %75 {offsets = [0, 256], sizes = [8, 128], strides = [1, 1]} : vector<8x384xf32> to vector<8x128xf32>
    %94 = arith.mulf %83, %93 : vector<8x128xf32>
    %95 = arith.addf %92, %94 : vector<8x128xf32>
    %96 = math.tanh %95 : vector<8x128xf32>
    %cst_21 = arith.constant 1.000000e+00 : f32
    %97 = vector.broadcast %cst_21 : f32 to vector<8x128xf32>
    %98 = arith.subf %97, %91 : vector<8x128xf32>
    %99 = arith.mulf %98, %96 : vector<8x128xf32>
    %100 = arith.mulf %91, %68 : vector<8x128xf32>
    %101 = arith.addf %99, %100 : vector<8x128xf32>
    %c3_i32 = arith.constant 3 : i32
    %102 = arith.index_cast %c3_i32 : i32 to index
    %c0_22 = arith.constant 0 : index
    %c0_23 = arith.constant 0 : index
    %103 = vector.load %arg1[%102, %c0_22, %c0_23] : memref<8x8x384xf32, #tpu.memory_space<vmem>>, vector<1x8x384xf32>
    %104 = vector.shape_cast %103 : vector<1x8x384xf32> to vector<8x384xf32>
    %105 = arith.truncf %101 : vector<8x128xf32> to vector<8x128xbf16>
    %cst_24 = arith.constant dense<0.000000e+00> : vector<8x384xf32>
    %106 = tpu.matmul %105, %0, %cst_24 {dimension_numbers = #tpu.dot_dimension_numbers<[1], [0], [0], [1], [0, 0, 1, 1], [], []>} : vector<8x128xbf16>, vector<128x384xbf16>, vector<8x384xf32> -> vector<8x384xf32>
    %107 = vector.broadcast %1 : vector<1x384xf32> to vector<8x384xf32>
    %108 = arith.addf %106, %107 : vector<8x384xf32>
    %109 = vector.extract_strided_slice %104 {offsets = [0, 0], sizes = [8, 128], strides = [1, 1]} : vector<8x384xf32> to vector<8x128xf32>
    %110 = vector.extract_strided_slice %108 {offsets = [0, 0], sizes = [8, 128], strides = [1, 1]} : vector<8x384xf32> to vector<8x128xf32>
    %111 = arith.addf %109, %110 : vector<8x128xf32>
    %112 = arith.negf %111 : vector<8x128xf32>
    %113 = math.exp %112 : vector<8x128xf32>
    %cst_25 = arith.constant 1.000000e+00 : f32
    %114 = vector.broadcast %cst_25 : f32 to vector<8x128xf32>
    %115 = arith.addf %114, %113 : vector<8x128xf32>
    %116 = arith.divf %114, %115 : vector<8x128xf32>
    %117 = vector.extract_strided_slice %104 {offsets = [0, 128], sizes = [8, 128], strides = [1, 1]} : vector<8x384xf32> to vector<8x128xf32>
    %118 = vector.extract_strided_slice %108 {offsets = [0, 128], sizes = [8, 128], strides = [1, 1]} : vector<8x384xf32> to vector<8x128xf32>
    %119 = arith.addf %117, %118 : vector<8x128xf32>
    %120 = arith.negf %119 : vector<8x128xf32>
    %121 = math.exp %120 : vector<8x128xf32>
    %cst_26 = arith.constant 1.000000e+00 : f32
    %122 = vector.broadcast %cst_26 : f32 to vector<8x128xf32>
    %123 = arith.addf %122, %121 : vector<8x128xf32>
    %124 = arith.divf %122, %123 : vector<8x128xf32>
    %125 = vector.extract_strided_slice %104 {offsets = [0, 256], sizes = [8, 128], strides = [1, 1]} : vector<8x384xf32> to vector<8x128xf32>
    %126 = vector.extract_strided_slice %108 {offsets = [0, 256], sizes = [8, 128], strides = [1, 1]} : vector<8x384xf32> to vector<8x128xf32>
    %127 = arith.mulf %116, %126 : vector<8x128xf32>
    %128 = arith.addf %125, %127 : vector<8x128xf32>
    %129 = math.tanh %128 : vector<8x128xf32>
    %cst_27 = arith.constant 1.000000e+00 : f32
    %130 = vector.broadcast %cst_27 : f32 to vector<8x128xf32>
    %131 = arith.subf %130, %124 : vector<8x128xf32>
    %132 = arith.mulf %131, %129 : vector<8x128xf32>
    %133 = arith.mulf %124, %101 : vector<8x128xf32>
    %134 = arith.addf %132, %133 : vector<8x128xf32>
    %c4_i32 = arith.constant 4 : i32
    %135 = arith.index_cast %c4_i32 : i32 to index
    %c0_28 = arith.constant 0 : index
    %c0_29 = arith.constant 0 : index
    %136 = vector.load %arg1[%135, %c0_28, %c0_29] : memref<8x8x384xf32, #tpu.memory_space<vmem>>, vector<1x8x384xf32>
    %137 = vector.shape_cast %136 : vector<1x8x384xf32> to vector<8x384xf32>
    %138 = arith.truncf %134 : vector<8x128xf32> to vector<8x128xbf16>
    %cst_30 = arith.constant dense<0.000000e+00> : vector<8x384xf32>
    %139 = tpu.matmul %138, %0, %cst_30 {dimension_numbers = #tpu.dot_dimension_numbers<[1], [0], [0], [1], [0, 0, 1, 1], [], []>} : vector<8x128xbf16>, vector<128x384xbf16>, vector<8x384xf32> -> vector<8x384xf32>
    %140 = vector.broadcast %1 : vector<1x384xf32> to vector<8x384xf32>
    %141 = arith.addf %139, %140 : vector<8x384xf32>
    %142 = vector.extract_strided_slice %137 {offsets = [0, 0], sizes = [8, 128], strides = [1, 1]} : vector<8x384xf32> to vector<8x128xf32>
    %143 = vector.extract_strided_slice %141 {offsets = [0, 0], sizes = [8, 128], strides = [1, 1]} : vector<8x384xf32> to vector<8x128xf32>
    %144 = arith.addf %142, %143 : vector<8x128xf32>
    %145 = arith.negf %144 : vector<8x128xf32>
    %146 = math.exp %145 : vector<8x128xf32>
    %cst_31 = arith.constant 1.000000e+00 : f32
    %147 = vector.broadcast %cst_31 : f32 to vector<8x128xf32>
    %148 = arith.addf %147, %146 : vector<8x128xf32>
    %149 = arith.divf %147, %148 : vector<8x128xf32>
    %150 = vector.extract_strided_slice %137 {offsets = [0, 128], sizes = [8, 128], strides = [1, 1]} : vector<8x384xf32> to vector<8x128xf32>
    %151 = vector.extract_strided_slice %141 {offsets = [0, 128], sizes = [8, 128], strides = [1, 1]} : vector<8x384xf32> to vector<8x128xf32>
    %152 = arith.addf %150, %151 : vector<8x128xf32>
    %153 = arith.negf %152 : vector<8x128xf32>
    %154 = math.exp %153 : vector<8x128xf32>
    %cst_32 = arith.constant 1.000000e+00 : f32
    %155 = vector.broadcast %cst_32 : f32 to vector<8x128xf32>
    %156 = arith.addf %155, %154 : vector<8x128xf32>
    %157 = arith.divf %155, %156 : vector<8x128xf32>
    %158 = vector.extract_strided_slice %137 {offsets = [0, 256], sizes = [8, 128], strides = [1, 1]} : vector<8x384xf32> to vector<8x128xf32>
    %159 = vector.extract_strided_slice %141 {offsets = [0, 256], sizes = [8, 128], strides = [1, 1]} : vector<8x384xf32> to vector<8x128xf32>
    %160 = arith.mulf %149, %159 : vector<8x128xf32>
    %161 = arith.addf %158, %160 : vector<8x128xf32>
    %162 = math.tanh %161 : vector<8x128xf32>
    %cst_33 = arith.constant 1.000000e+00 : f32
    %163 = vector.broadcast %cst_33 : f32 to vector<8x128xf32>
    %164 = arith.subf %163, %157 : vector<8x128xf32>
    %165 = arith.mulf %164, %162 : vector<8x128xf32>
    %166 = arith.mulf %157, %134 : vector<8x128xf32>
    %167 = arith.addf %165, %166 : vector<8x128xf32>
    %c5_i32 = arith.constant 5 : i32
    %168 = arith.index_cast %c5_i32 : i32 to index
    %c0_34 = arith.constant 0 : index
    %c0_35 = arith.constant 0 : index
    %169 = vector.load %arg1[%168, %c0_34, %c0_35] : memref<8x8x384xf32, #tpu.memory_space<vmem>>, vector<1x8x384xf32>
    %170 = vector.shape_cast %169 : vector<1x8x384xf32> to vector<8x384xf32>
    %171 = arith.truncf %167 : vector<8x128xf32> to vector<8x128xbf16>
    %cst_36 = arith.constant dense<0.000000e+00> : vector<8x384xf32>
    %172 = tpu.matmul %171, %0, %cst_36 {dimension_numbers = #tpu.dot_dimension_numbers<[1], [0], [0], [1], [0, 0, 1, 1], [], []>} : vector<8x128xbf16>, vector<128x384xbf16>, vector<8x384xf32> -> vector<8x384xf32>
    %173 = vector.broadcast %1 : vector<1x384xf32> to vector<8x384xf32>
    %174 = arith.addf %172, %173 : vector<8x384xf32>
    %175 = vector.extract_strided_slice %170 {offsets = [0, 0], sizes = [8, 128], strides = [1, 1]} : vector<8x384xf32> to vector<8x128xf32>
    %176 = vector.extract_strided_slice %174 {offsets = [0, 0], sizes = [8, 128], strides = [1, 1]} : vector<8x384xf32> to vector<8x128xf32>
    %177 = arith.addf %175, %176 : vector<8x128xf32>
    %178 = arith.negf %177 : vector<8x128xf32>
    %179 = math.exp %178 : vector<8x128xf32>
    %cst_37 = arith.constant 1.000000e+00 : f32
    %180 = vector.broadcast %cst_37 : f32 to vector<8x128xf32>
    %181 = arith.addf %180, %179 : vector<8x128xf32>
    %182 = arith.divf %180, %181 : vector<8x128xf32>
    %183 = vector.extract_strided_slice %170 {offsets = [0, 128], sizes = [8, 128], strides = [1, 1]} : vector<8x384xf32> to vector<8x128xf32>
    %184 = vector.extract_strided_slice %174 {offsets = [0, 128], sizes = [8, 128], strides = [1, 1]} : vector<8x384xf32> to vector<8x128xf32>
    %185 = arith.addf %183, %184 : vector<8x128xf32>
    %186 = arith.negf %185 : vector<8x128xf32>
    %187 = math.exp %186 : vector<8x128xf32>
    %cst_38 = arith.constant 1.000000e+00 : f32
    %188 = vector.broadcast %cst_38 : f32 to vector<8x128xf32>
    %189 = arith.addf %188, %187 : vector<8x128xf32>
    %190 = arith.divf %188, %189 : vector<8x128xf32>
    %191 = vector.extract_strided_slice %170 {offsets = [0, 256], sizes = [8, 128], strides = [1, 1]} : vector<8x384xf32> to vector<8x128xf32>
    %192 = vector.extract_strided_slice %174 {offsets = [0, 256], sizes = [8, 128], strides = [1, 1]} : vector<8x384xf32> to vector<8x128xf32>
    %193 = arith.mulf %182, %192 : vector<8x128xf32>
    %194 = arith.addf %191, %193 : vector<8x128xf32>
    %195 = math.tanh %194 : vector<8x128xf32>
    %cst_39 = arith.constant 1.000000e+00 : f32
    %196 = vector.broadcast %cst_39 : f32 to vector<8x128xf32>
    %197 = arith.subf %196, %190 : vector<8x128xf32>
    %198 = arith.mulf %197, %195 : vector<8x128xf32>
    %199 = arith.mulf %190, %167 : vector<8x128xf32>
    %200 = arith.addf %198, %199 : vector<8x128xf32>
    %c6_i32 = arith.constant 6 : i32
    %201 = arith.index_cast %c6_i32 : i32 to index
    %c0_40 = arith.constant 0 : index
    %c0_41 = arith.constant 0 : index
    %202 = vector.load %arg1[%201, %c0_40, %c0_41] : memref<8x8x384xf32, #tpu.memory_space<vmem>>, vector<1x8x384xf32>
    %203 = vector.shape_cast %202 : vector<1x8x384xf32> to vector<8x384xf32>
    %204 = arith.truncf %200 : vector<8x128xf32> to vector<8x128xbf16>
    %cst_42 = arith.constant dense<0.000000e+00> : vector<8x384xf32>
    %205 = tpu.matmul %204, %0, %cst_42 {dimension_numbers = #tpu.dot_dimension_numbers<[1], [0], [0], [1], [0, 0, 1, 1], [], []>} : vector<8x128xbf16>, vector<128x384xbf16>, vector<8x384xf32> -> vector<8x384xf32>
    %206 = vector.broadcast %1 : vector<1x384xf32> to vector<8x384xf32>
    %207 = arith.addf %205, %206 : vector<8x384xf32>
    %208 = vector.extract_strided_slice %203 {offsets = [0, 0], sizes = [8, 128], strides = [1, 1]} : vector<8x384xf32> to vector<8x128xf32>
    %209 = vector.extract_strided_slice %207 {offsets = [0, 0], sizes = [8, 128], strides = [1, 1]} : vector<8x384xf32> to vector<8x128xf32>
    %210 = arith.addf %208, %209 : vector<8x128xf32>
    %211 = arith.negf %210 : vector<8x128xf32>
    %212 = math.exp %211 : vector<8x128xf32>
    %cst_43 = arith.constant 1.000000e+00 : f32
    %213 = vector.broadcast %cst_43 : f32 to vector<8x128xf32>
    %214 = arith.addf %213, %212 : vector<8x128xf32>
    %215 = arith.divf %213, %214 : vector<8x128xf32>
    %216 = vector.extract_strided_slice %203 {offsets = [0, 128], sizes = [8, 128], strides = [1, 1]} : vector<8x384xf32> to vector<8x128xf32>
    %217 = vector.extract_strided_slice %207 {offsets = [0, 128], sizes = [8, 128], strides = [1, 1]} : vector<8x384xf32> to vector<8x128xf32>
    %218 = arith.addf %216, %217 : vector<8x128xf32>
    %219 = arith.negf %218 : vector<8x128xf32>
    %220 = math.exp %219 : vector<8x128xf32>
    %cst_44 = arith.constant 1.000000e+00 : f32
    %221 = vector.broadcast %cst_44 : f32 to vector<8x128xf32>
    %222 = arith.addf %221, %220 : vector<8x128xf32>
    %223 = arith.divf %221, %222 : vector<8x128xf32>
    %224 = vector.extract_strided_slice %203 {offsets = [0, 256], sizes = [8, 128], strides = [1, 1]} : vector<8x384xf32> to vector<8x128xf32>
    %225 = vector.extract_strided_slice %207 {offsets = [0, 256], sizes = [8, 128], strides = [1, 1]} : vector<8x384xf32> to vector<8x128xf32>
    %226 = arith.mulf %215, %225 : vector<8x128xf32>
    %227 = arith.addf %224, %226 : vector<8x128xf32>
    %228 = math.tanh %227 : vector<8x128xf32>
    %cst_45 = arith.constant 1.000000e+00 : f32
    %229 = vector.broadcast %cst_45 : f32 to vector<8x128xf32>
    %230 = arith.subf %229, %223 : vector<8x128xf32>
    %231 = arith.mulf %230, %228 : vector<8x128xf32>
    %232 = arith.mulf %223, %200 : vector<8x128xf32>
    %233 = arith.addf %231, %232 : vector<8x128xf32>
    %c7_i32 = arith.constant 7 : i32
    %234 = arith.index_cast %c7_i32 : i32 to index
    %c0_46 = arith.constant 0 : index
    %c0_47 = arith.constant 0 : index
    %235 = vector.load %arg1[%234, %c0_46, %c0_47] : memref<8x8x384xf32, #tpu.memory_space<vmem>>, vector<1x8x384xf32>
    %236 = vector.shape_cast %235 : vector<1x8x384xf32> to vector<8x384xf32>
    %237 = arith.truncf %233 : vector<8x128xf32> to vector<8x128xbf16>
    %cst_48 = arith.constant dense<0.000000e+00> : vector<8x384xf32>
    %238 = tpu.matmul %237, %0, %cst_48 {dimension_numbers = #tpu.dot_dimension_numbers<[1], [0], [0], [1], [0, 0, 1, 1], [], []>} : vector<8x128xbf16>, vector<128x384xbf16>, vector<8x384xf32> -> vector<8x384xf32>
    %239 = vector.broadcast %1 : vector<1x384xf32> to vector<8x384xf32>
    %240 = arith.addf %238, %239 : vector<8x384xf32>
    %241 = vector.extract_strided_slice %236 {offsets = [0, 0], sizes = [8, 128], strides = [1, 1]} : vector<8x384xf32> to vector<8x128xf32>
    %242 = vector.extract_strided_slice %240 {offsets = [0, 0], sizes = [8, 128], strides = [1, 1]} : vector<8x384xf32> to vector<8x128xf32>
    %243 = arith.addf %241, %242 : vector<8x128xf32>
    %244 = arith.negf %243 : vector<8x128xf32>
    %245 = math.exp %244 : vector<8x128xf32>
    %cst_49 = arith.constant 1.000000e+00 : f32
    %246 = vector.broadcast %cst_49 : f32 to vector<8x128xf32>
    %247 = arith.addf %246, %245 : vector<8x128xf32>
    %248 = arith.divf %246, %247 : vector<8x128xf32>
    %249 = vector.extract_strided_slice %236 {offsets = [0, 128], sizes = [8, 128], strides = [1, 1]} : vector<8x384xf32> to vector<8x128xf32>
    %250 = vector.extract_strided_slice %240 {offsets = [0, 128], sizes = [8, 128], strides = [1, 1]} : vector<8x384xf32> to vector<8x128xf32>
    %251 = arith.addf %249, %250 : vector<8x128xf32>
    %252 = arith.negf %251 : vector<8x128xf32>
    %253 = math.exp %252 : vector<8x128xf32>
    %cst_50 = arith.constant 1.000000e+00 : f32
    %254 = vector.broadcast %cst_50 : f32 to vector<8x128xf32>
    %255 = arith.addf %254, %253 : vector<8x128xf32>
    %256 = arith.divf %254, %255 : vector<8x128xf32>
    %257 = vector.extract_strided_slice %236 {offsets = [0, 256], sizes = [8, 128], strides = [1, 1]} : vector<8x384xf32> to vector<8x128xf32>
    %258 = vector.extract_strided_slice %240 {offsets = [0, 256], sizes = [8, 128], strides = [1, 1]} : vector<8x384xf32> to vector<8x128xf32>
    %259 = arith.mulf %248, %258 : vector<8x128xf32>
    %260 = arith.addf %257, %259 : vector<8x128xf32>
    %261 = math.tanh %260 : vector<8x128xf32>
    %cst_51 = arith.constant 1.000000e+00 : f32
    %262 = vector.broadcast %cst_51 : f32 to vector<8x128xf32>
    %263 = arith.subf %262, %256 : vector<8x128xf32>
    %264 = arith.mulf %263, %261 : vector<8x128xf32>
    %265 = arith.mulf %256, %233 : vector<8x128xf32>
    %266 = arith.addf %264, %265 : vector<8x128xf32>
    %c8_i32 = arith.constant 8 : i32
    %267 = vector.extract_strided_slice %266 {offsets = [0, 0], sizes = [2, 128], strides = [1, 1]} : vector<8x128xf32> to vector<2x128xf32>
    %268 = arith.truncf %267 : vector<2x128xf32> to vector<2x128xbf16>
    %c0_52 = arith.constant 0 : index
    %c0_53 = arith.constant 0 : index
    %269 = vector.load %arg6[%c0_52, %c0_53] : memref<128x512xbf16, #tpu.memory_space<vmem>>, vector<128x512xbf16>
    %cst_54 = arith.constant dense<0.000000e+00> : vector<2x512xf32>
    %270 = tpu.matmul %268, %269, %cst_54 {dimension_numbers = #tpu.dot_dimension_numbers<[1], [0], [0], [1], [0, 0, 1, 1], [], []>} : vector<2x128xbf16>, vector<128x512xbf16>, vector<2x512xf32> -> vector<2x512xf32>
    %c0_55 = arith.constant 0 : index
    %c0_56 = arith.constant 0 : index
    %271 = vector.load %arg7[%c0_55, %c0_56] : memref<1x512xf32, #tpu.memory_space<vmem>>, vector<1x512xf32>
    %272 = vector.broadcast %271 : vector<1x512xf32> to vector<2x512xf32>
    %273 = arith.addf %270, %272 : vector<2x512xf32>
    %274 = tpu.iota {dimensions = array<i32: 0>} : vector<2x2xi32>
    %275 = tpu.iota {dimensions = array<i32: 1>} : vector<2x2xi32>
    %276 = arith.cmpi eq, %274, %275 : vector<2x2xi32>
    %277 = arith.extui %276 : vector<2x2xi1> to vector<2x2xi32>
    %278 = arith.sitofp %277 : vector<2x2xi32> to vector<2x2xf32>
    %279 = tpu.iota {dimensions = array<i32: 1>} : vector<1x2xi32>
    %cst_57 = arith.constant 0.000000e+00 : f32
    %280 = vector.broadcast %cst_57 : f32 to vector<1x1xf32>
    %281 = vector.extract_strided_slice %273 {offsets = [0, 0], sizes = [2, 128], strides = [1, 1]} : vector<2x512xf32> to vector<2x128xf32>
    %c0_58 = arith.constant 0 : index
    %c0_59 = arith.constant 0 : index
    %c0_60 = arith.constant 0 : index
    %282 = vector.load %arg5[%c0_58, %c0_59, %c0_60] : memref<4x2x128xbf16, #tpu.memory_space<vmem>>, vector<1x2x128xbf16>
    %283 = vector.shape_cast %282 : vector<1x2x128xbf16> to vector<2x128xbf16>
    %284 = arith.truncf %281 : vector<2x128xf32> to vector<2x128xbf16>
    %cst_61 = arith.constant dense<0.000000e+00> : vector<2x2xf32>
    %285 = tpu.matmul %283, %284, %cst_61 {dimension_numbers = #tpu.dot_dimension_numbers<[1], [1], [0], [0], [0, 0, 1, 0], [], []>} : vector<2x128xbf16>, vector<2x128xbf16>, vector<2x2xf32> -> vector<2x2xf32>
    %cst_62 = arith.constant dense<0xFF800000> : vector<2xf32>
    %286 = vector.multi_reduction <maximumf>, %285, %cst_62 [1] : vector<2x2xf32> to vector<2xf32>
    %287 = vector.shape_cast %286 : vector<2xf32> to vector<2x1xf32>
    %288 = vector.broadcast %287 : vector<2x1xf32> to vector<2x2xf32>
    %289 = arith.subf %285, %288 : vector<2x2xf32>
    %290 = math.exp %289 : vector<2x2xf32>
    %cst_63 = arith.constant dense<0.000000e+00> : vector<2xf32>
    %291 = vector.multi_reduction <add>, %290, %cst_63 [1] : vector<2x2xf32> to vector<2xf32>
    %292 = vector.shape_cast %291 : vector<2xf32> to vector<2x1xf32>
    %293 = vector.broadcast %287 : vector<2x1xf32> to vector<2x2xf32>
    %294 = arith.subf %285, %293 : vector<2x2xf32>
    %295 = math.log %292 : vector<2x1xf32>
    %296 = vector.broadcast %295 : vector<2x1xf32> to vector<2x2xf32>
    %297 = arith.subf %294, %296 : vector<2x2xf32>
    %298 = arith.mulf %297, %278 : vector<2x2xf32>
    %299 = vector.shape_cast %298 : vector<2x2xf32> to vector<1x2x2xf32>
    %cst_64 = arith.constant dense<0.000000e+00> : vector<1xf32>
    %300 = vector.multi_reduction <add>, %299, %cst_64 [1, 2] : vector<1x2x2xf32> to vector<1xf32>
    %301 = vector.shape_cast %300 : vector<1xf32> to vector<1x1x1xf32>
    %302 = vector.extract %301[0, 0, 0] : f32 from vector<1x1x1xf32>
    %303 = vector.broadcast %302 : f32 to vector<1x1xf32>
    %304 = arith.addf %280, %303 : vector<1x1xf32>
    %305 = vector.extract_strided_slice %273 {offsets = [0, 128], sizes = [2, 128], strides = [1, 1]} : vector<2x512xf32> to vector<2x128xf32>
    %c1 = arith.constant 1 : index
    %c0_65 = arith.constant 0 : index
    %c0_66 = arith.constant 0 : index
    %306 = vector.load %arg5[%c1, %c0_65, %c0_66] : memref<4x2x128xbf16, #tpu.memory_space<vmem>>, vector<1x2x128xbf16>
    %307 = vector.shape_cast %306 : vector<1x2x128xbf16> to vector<2x128xbf16>
    %308 = arith.truncf %305 : vector<2x128xf32> to vector<2x128xbf16>
    %cst_67 = arith.constant dense<0.000000e+00> : vector<2x2xf32>
    %309 = tpu.matmul %307, %308, %cst_67 {dimension_numbers = #tpu.dot_dimension_numbers<[1], [1], [0], [0], [0, 0, 1, 0], [], []>} : vector<2x128xbf16>, vector<2x128xbf16>, vector<2x2xf32> -> vector<2x2xf32>
    %cst_68 = arith.constant dense<0xFF800000> : vector<2xf32>
    %310 = vector.multi_reduction <maximumf>, %309, %cst_68 [1] : vector<2x2xf32> to vector<2xf32>
    %311 = vector.shape_cast %310 : vector<2xf32> to vector<2x1xf32>
    %312 = vector.broadcast %311 : vector<2x1xf32> to vector<2x2xf32>
    %313 = arith.subf %309, %312 : vector<2x2xf32>
    %314 = math.exp %313 : vector<2x2xf32>
    %cst_69 = arith.constant dense<0.000000e+00> : vector<2xf32>
    %315 = vector.multi_reduction <add>, %314, %cst_69 [1] : vector<2x2xf32> to vector<2xf32>
    %316 = vector.shape_cast %315 : vector<2xf32> to vector<2x1xf32>
    %317 = vector.broadcast %311 : vector<2x1xf32> to vector<2x2xf32>
    %318 = arith.subf %309, %317 : vector<2x2xf32>
    %319 = math.log %316 : vector<2x1xf32>
    %320 = vector.broadcast %319 : vector<2x1xf32> to vector<2x2xf32>
    %321 = arith.subf %318, %320 : vector<2x2xf32>
    %322 = arith.mulf %321, %278 : vector<2x2xf32>
    %323 = vector.shape_cast %322 : vector<2x2xf32> to vector<1x2x2xf32>
    %cst_70 = arith.constant dense<0.000000e+00> : vector<1xf32>
    %324 = vector.multi_reduction <add>, %323, %cst_70 [1, 2] : vector<1x2x2xf32> to vector<1xf32>
    %325 = vector.shape_cast %324 : vector<1xf32> to vector<1x1x1xf32>
    %326 = vector.extract %325[0, 0, 0] : f32 from vector<1x1x1xf32>
    %327 = vector.broadcast %326 : f32 to vector<1x1xf32>
    %328 = arith.addf %304, %327 : vector<1x1xf32>
    %329 = vector.extract_strided_slice %273 {offsets = [0, 256], sizes = [2, 128], strides = [1, 1]} : vector<2x512xf32> to vector<2x128xf32>
    %c2 = arith.constant 2 : index
    %c0_71 = arith.constant 0 : index
    %c0_72 = arith.constant 0 : index
    %330 = vector.load %arg5[%c2, %c0_71, %c0_72] : memref<4x2x128xbf16, #tpu.memory_space<vmem>>, vector<1x2x128xbf16>
    %331 = vector.shape_cast %330 : vector<1x2x128xbf16> to vector<2x128xbf16>
    %332 = arith.truncf %329 : vector<2x128xf32> to vector<2x128xbf16>
    %cst_73 = arith.constant dense<0.000000e+00> : vector<2x2xf32>
    %333 = tpu.matmul %331, %332, %cst_73 {dimension_numbers = #tpu.dot_dimension_numbers<[1], [1], [0], [0], [0, 0, 1, 0], [], []>} : vector<2x128xbf16>, vector<2x128xbf16>, vector<2x2xf32> -> vector<2x2xf32>
    %cst_74 = arith.constant dense<0xFF800000> : vector<2xf32>
    %334 = vector.multi_reduction <maximumf>, %333, %cst_74 [1] : vector<2x2xf32> to vector<2xf32>
    %335 = vector.shape_cast %334 : vector<2xf32> to vector<2x1xf32>
    %336 = vector.broadcast %335 : vector<2x1xf32> to vector<2x2xf32>
    %337 = arith.subf %333, %336 : vector<2x2xf32>
    %338 = math.exp %337 : vector<2x2xf32>
    %cst_75 = arith.constant dense<0.000000e+00> : vector<2xf32>
    %339 = vector.multi_reduction <add>, %338, %cst_75 [1] : vector<2x2xf32> to vector<2xf32>
    %340 = vector.shape_cast %339 : vector<2xf32> to vector<2x1xf32>
    %341 = vector.broadcast %335 : vector<2x1xf32> to vector<2x2xf32>
    %342 = arith.subf %333, %341 : vector<2x2xf32>
    %343 = math.log %340 : vector<2x1xf32>
    %344 = vector.broadcast %343 : vector<2x1xf32> to vector<2x2xf32>
    %345 = arith.subf %342, %344 : vector<2x2xf32>
    %346 = arith.mulf %345, %278 : vector<2x2xf32>
    %347 = vector.shape_cast %346 : vector<2x2xf32> to vector<1x2x2xf32>
    %cst_76 = arith.constant dense<0.000000e+00> : vector<1xf32>
    %348 = vector.multi_reduction <add>, %347, %cst_76 [1, 2] : vector<1x2x2xf32> to vector<1xf32>
    %349 = vector.shape_cast %348 : vector<1xf32> to vector<1x1x1xf32>
    %350 = vector.extract %349[0, 0, 0] : f32 from vector<1x1x1xf32>
    %351 = vector.broadcast %350 : f32 to vector<1x1xf32>
    %352 = arith.addf %328, %351 : vector<1x1xf32>
    %353 = vector.extract_strided_slice %273 {offsets = [0, 384], sizes = [2, 128], strides = [1, 1]} : vector<2x512xf32> to vector<2x128xf32>
    %c3 = arith.constant 3 : index
    %c0_77 = arith.constant 0 : index
    %c0_78 = arith.constant 0 : index
    %354 = vector.load %arg5[%c3, %c0_77, %c0_78] : memref<4x2x128xbf16, #tpu.memory_space<vmem>>, vector<1x2x128xbf16>
    %355 = vector.shape_cast %354 : vector<1x2x128xbf16> to vector<2x128xbf16>
    %356 = arith.truncf %353 : vector<2x128xf32> to vector<2x128xbf16>
    %cst_79 = arith.constant dense<0.000000e+00> : vector<2x2xf32>
    %357 = tpu.matmul %355, %356, %cst_79 {dimension_numbers = #tpu.dot_dimension_numbers<[1], [1], [0], [0], [0, 0, 1, 0], [], []>} : vector<2x128xbf16>, vector<2x128xbf16>, vector<2x2xf32> -> vector<2x2xf32>
    %cst_80 = arith.constant dense<0xFF800000> : vector<2xf32>
    %358 = vector.multi_reduction <maximumf>, %357, %cst_80 [1] : vector<2x2xf32> to vector<2xf32>
    %359 = vector.shape_cast %358 : vector<2xf32> to vector<2x1xf32>
    %360 = vector.broadcast %359 : vector<2x1xf32> to vector<2x2xf32>
    %361 = arith.subf %357, %360 : vector<2x2xf32>
    %362 = math.exp %361 : vector<2x2xf32>
    %cst_81 = arith.constant dense<0.000000e+00> : vector<2xf32>
    %363 = vector.multi_reduction <add>, %362, %cst_81 [1] : vector<2x2xf32> to vector<2xf32>
    %364 = vector.shape_cast %363 : vector<2xf32> to vector<2x1xf32>
    %365 = vector.broadcast %359 : vector<2x1xf32> to vector<2x2xf32>
    %366 = arith.subf %357, %365 : vector<2x2xf32>
    %367 = math.log %364 : vector<2x1xf32>
    %368 = vector.broadcast %367 : vector<2x1xf32> to vector<2x2xf32>
    %369 = arith.subf %366, %368 : vector<2x2xf32>
    %370 = vector.broadcast %364 : vector<2x1xf32> to vector<2x2xf32>
    %371 = arith.divf %362, %370 : vector<2x2xf32>
    %372 = arith.mulf %369, %278 : vector<2x2xf32>
    %373 = vector.shape_cast %372 : vector<2x2xf32> to vector<1x2x2xf32>
    %cst_82 = arith.constant dense<0.000000e+00> : vector<1xf32>
    %374 = vector.multi_reduction <add>, %373, %cst_82 [1, 2] : vector<1x2x2xf32> to vector<1xf32>
    %375 = vector.shape_cast %374 : vector<1xf32> to vector<1x1x1xf32>
    %376 = vector.extract %375[0, 0, 0] : f32 from vector<1x1x1xf32>
    %377 = vector.broadcast %376 : f32 to vector<1x1xf32>
    %378 = arith.addf %352, %377 : vector<1x1xf32>
    %cst_83 = arith.constant dense<0xFF800000> : vector<2xf32>
    %379 = vector.multi_reduction <maximumf>, %371, %cst_83 [0] : vector<2x2xf32> to vector<2xf32>
    %380 = vector.shape_cast %379 : vector<2xf32> to vector<1x2xf32>
    %381 = vector.broadcast %380 : vector<1x2xf32> to vector<2x2xf32>
    %382 = arith.cmpf oge, %371, %381 : vector<2x2xf32>
    %c2_i32_84 = arith.constant 2 : i32
    %383 = vector.broadcast %c2_i32_84 : i32 to vector<2x2xi32>
    %384 = arith.select %382, %274, %383 : vector<2x2xi1>, vector<2x2xi32>
    %cst_85 = arith.constant dense<2147483647> : vector<2xi32>
    %385 = vector.multi_reduction <minsi>, %384, %cst_85 [0] : vector<2x2xi32> to vector<2xi32>
    %386 = vector.shape_cast %385 : vector<2xi32> to vector<1x2xi32>
    %387 = arith.cmpi eq, %386, %279 : vector<1x2xi32>
    %388 = arith.extui %387 : vector<1x2xi1> to vector<1x2xi32>
    %389 = arith.sitofp %388 : vector<1x2xi32> to vector<1x2xf32>
    %cst_86 = arith.constant dense<0.000000e+00> : vector<1xf32>
    %390 = vector.multi_reduction <add>, %389, %cst_86 [1] : vector<1x2xf32> to vector<1xf32>
    %391 = vector.shape_cast %390 : vector<1xf32> to vector<1x1xf32>
    %cst_87 = arith.constant -1.250000e-01 : f32
    %392 = vector.broadcast %cst_87 : f32 to vector<1x1xf32>
    %393 = arith.mulf %378, %392 : vector<1x1xf32>
    %c0_88 = arith.constant 0 : index
    %c0_89 = arith.constant 0 : index
    %394 = vector.load %arg8[%c0_88, %c0_89] : memref<1x1xf32, #tpu.memory_space<vmem>>, vector<1x1xf32>
    tpu.vector_store %arg8[%c0_88, %c0_89], %393 {strides = array<i32>} : memref<1x1xf32, #tpu.memory_space<vmem>>, vector<1x1xf32>,
    %cst_90 = arith.constant 5.000000e-01 : f32
    %395 = vector.broadcast %cst_90 : f32 to vector<1x1xf32>
    %396 = arith.mulf %391, %395 : vector<1x1xf32>
    %c0_91 = arith.constant 0 : index
    %c0_92 = arith.constant 0 : index
    %397 = vector.load %arg9[%c0_91, %c0_92] : memref<1x1xf32, #tpu.memory_space<vmem>>, vector<1x1xf32>
    tpu.vector_store %arg9[%c0_91, %c0_92], %396 {strides = array<i32>} : memref<1x1xf32, #tpu.memory_space<vmem>>, vector<1x1xf32>,
    return
  }
  func.func @transform_0(%arg0: i32) -> (i32, i32, i32) {
    %c0_i32 = arith.constant 0 : i32
    %c0_i32_0 = arith.constant 0 : i32
    %c0_i32_1 = arith.constant 0 : i32
    %c0_i32_2 = arith.constant 0 : i32
    return %c0_i32, %c0_i32_0, %c0_i32_1 : i32, i32, i32
  }
  func.func @transform_1(%arg0: i32) -> (i32, i32) {
    %c0_i32 = arith.constant 0 : i32
    %c0_i32_0 = arith.constant 0 : i32
    %c0_i32_1 = arith.constant 0 : i32
    return %c0_i32, %c0_i32_0 : i32, i32
  }
  func.func @transform_2(%arg0: i32) -> (i32, i32) {
    %c0_i32 = arith.constant 0 : i32
    %c0_i32_0 = arith.constant 0 : i32
    %c0_i32_1 = arith.constant 0 : i32
    return %c0_i32, %c0_i32_0 : i32, i32
  }
  func.func @transform_3(%arg0: i32) -> (i32, i32) {
    %c0_i32 = arith.constant 0 : i32
    %c0_i32_0 = arith.constant 0 : i32
    %c0_i32_1 = arith.constant 0 : i32
    return %c0_i32, %c0_i32_0 : i32, i32
  }
  func.func @transform_4(%arg0: i32) -> (i32, i32, i32) {
    %c0_i32 = arith.constant 0 : i32
    %c0_i32_0 = arith.constant 0 : i32
    %c0_i32_1 = arith.constant 0 : i32
    %c0_i32_2 = arith.constant 0 : i32
    return %c0_i32, %c0_i32_0, %c0_i32_1 : i32, i32, i32
  }
  func.func @transform_5(%arg0: i32) -> (i32, i32) {
    %c0_i32 = arith.constant 0 : i32
    %c0_i32_0 = arith.constant 0 : i32
    %c0_i32_1 = arith.constant 0 : i32
    return %c0_i32, %c0_i32_0 : i32, i32
  }
  func.func @transform_6(%arg0: i32) -> (i32, i32) {
    %c0_i32 = arith.constant 0 : i32
    %c0_i32_0 = arith.constant 0 : i32
    %c0_i32_1 = arith.constant 0 : i32
    return %c0_i32, %c0_i32_0 : i32, i32
  }
  func.func @transform_7(%arg0: i32) -> (i32, i32) {
    %c0_i32 = arith.constant 0 : i32
    %c0_i32_0 = arith.constant 0 : i32
    %c0_i32_1 = arith.constant 0 : i32
    return %c0_i32, %c0_i32_0 : i32, i32
  }
  func.func @transform_8(%arg0: i32) -> (i32, i32) {
    %c0_i32 = arith.constant 0 : i32
    %c0_i32_0 = arith.constant 0 : i32
    %c0_i32_1 = arith.constant 0 : i32
    return %c0_i32, %c0_i32_0 : i32, i32
  }
}

</mosaic_0001>

<bundles_post_ra>
// kernel: cpcvqvae_forward.15
= control target key start
LH: loop header
LB: loop body
LE: loop exit
PB: predicated region body
PF: predicated region fallthrough
CT: control target
= control target key end

     0   :  { %v62_v5 = vlaneseq  ;;  %s501_s1 = inlined_call_operand.vmem [shape: f32[1,128], index: 1, kind: input, shape index: {}]   ;;  %s502_s2 = inlined_call_operand.vmem [shape: f32[1,128], index: 2, kind: input, shape index: {}]   ;;  %s503_s0 = inlined_call_operand.vmem [shape: bf16[128,128], index: 0, kind: input, shape index: {}]   ;;  %s504_s3 = inlined_call_operand.vmem [shape: f32[1,128], index: 3, kind: input, shape index: {}]   ;;  %s505_s4 = inlined_call_operand.vmem [shape: f32[1,128], index: 4, kind: input, shape index: {}]   ;;  %s506_s5 = inlined_call_operand.vmem [shape: bf16[128,128], index: 5, kind: output, shape index: {}]  }
   0x1   :  { %v20_v0 = vld [vmem:[%s501_s1] sm:$0x1]  ;;  %v359_v12 = vld [vmem:[%s503_s0 + $0x8] sm:$0xff]   ;;  %v360_v13 = vld [vmem:[%s503_s0 + $0x10] sm:$0xff]  }
   0x2   :  { %v22_v1 = vld [vmem:[%s502_s2] sm:$0x1]  ;;  %v24_v2 = vmul.f32 0.0078125, %v20_v0  ;;  %v63_v8 = vshrl.u32 %v62_v5, 7  ;;  %v361_v14 = vld [vmem:[%s503_s0 + $0x18] sm:$0xff]   ;;  %v363_v18 = vld [vmem:[%s503_s0 + $0x28] sm:$0xff]   ;;  %v293_v21 = vunpack.c.l.bf16 %v359_v12  ;;  %v294_v22 = vunpack.c.h.bf16 %v359_v12 }
   0x3   :  { %v25_v3 = vmul.f32 0.0078125, %v22_v1  ;;  %v288_v11 = vld [vmem:[%s503_s0] sm:$0xff]   ;;  %v364_v19 = vld [vmem:[%s503_s0 + $0x30] sm:$0xff]   ;;  %v297_v23 = vunpack.c.l.bf16 %v360_v13  ;;  %v365_v24 = vld [vmem:[%s503_s0 + $0x38] sm:$0xff]   ;;  %v298_v25 = vunpack.c.h.bf16 %v360_v13  ;;  %v301_v26 = vunpack.c.l.bf16 %v361_v14 }
   0x4   :  { %v26_v4 = vmul.f32 %v24_v2, %v24_v2  ;;  %v64_v10 = vsub.s32 0, %v63_v8  ;;  %v362_v15 = vld [vmem:[%s503_s0 + $0x20] sm:$0xff]   ;;  %v289_v16 = vunpack.c.l.bf16 %v288_v11  ;;  %v290_v20 = vunpack.c.h.bf16 %v288_v11 }
   0x5   :  { %v302_v27 = vunpack.c.h.bf16 %v361_v14  ;;  %v305_v28 = vunpack.c.l.bf16 %v362_v15  ;;  %v306_v29 = vunpack.c.h.bf16 %v362_v15  ;;  %v309_v30 = vunpack.c.l.bf16 %v363_v18  ;;  %v438_v50 = vld [vmem:[%s504_s3] ss:$0 sm:$0xff] }
   0x6   :  { %v27_v6 = vsub.f32 %v25_v3, %v26_v4  ;;  %v65_v17 = vrot.slane %v24_v2, %v64_v10  ;;  %v310_v31 = vunpack.c.h.bf16 %v363_v18  ;;  %v313_v32 = vunpack.c.l.bf16 %v364_v19  ;;  %v443_v59 = vld [vmem:[%s505_s4] ss:$0 sm:$0xff] }
   0x7   :  { %v314_v34 = vunpack.c.h.bf16 %v364_v19  ;;  %v317_v35 = vunpack.c.l.bf16 %v365_v24  ;;  %v318_v36 = vunpack.c.h.bf16 %v365_v24 }
   0x8   :  { %v28_v7 = vmax.f32 %v27_v6, 0.0  ;;  %v67_v33 = vsub.f32 %v289_v16, %v65_v17  ;;  %v68_v37 = vsub.f32 %v290_v20, %v65_v17  ;;  %v69_v38 = vsub.f32 %v293_v21, %v65_v17 }
   0x9   :  { %v70_v39 = vsub.f32 %v294_v22, %v65_v17  ;;  %v71_v40 = vsub.f32 %v297_v23, %v65_v17  ;;  %v72_v42 = vsub.f32 %v298_v25, %v65_v17  ;;  %v73_v43 = vsub.f32 %v301_v26, %v65_v17 }
   0xa   :  { %v83_v9 = vadd.f32 1e-05, %v28_v7  ;;  %v74_v44 = vsub.f32 %v302_v27, %v65_v17  ;;  %v75_v45 = vsub.f32 %v305_v28, %v65_v17  ;;  %v76_v47 = vsub.f32 %v306_v29, %v65_v17 }
   0xb   :  { %v77_v48 = vsub.f32 %v309_v30, %v65_v17  ;;  %v78_v49 = vsub.f32 %v310_v31, %v65_v17  ;;  %v79_v51 = vsub.f32 %v313_v32, %v65_v17  ;;  %v80_v52 = vsub.f32 %v314_v34, %v65_v17 }
   0xc   :  { %373 = vrsqrt.f32 %v83_v9  ;;  %v81_v53 = vsub.f32 %v317_v35, %v65_v17  ;;  %v82_v54 = vsub.f32 %v318_v36, %v65_v17 }
  0x16   :  { %v374_v41 = vpop.eup %373 }
  0x17   :  { %v89_v46 = vrot.slane %v374_v41, %v64_v10 }
  0x19   :  { %v91_v55 = vmul.f32 %v89_v46, %v67_v33  ;;  %v92_v56 = vmul.f32 %v89_v46, %v68_v37  ;;  %v93_v57 = vmul.f32 %v89_v46, %v69_v38  ;;  %v94_v58 = vmul.f32 %v89_v46, %v70_v39 }
  0x1a   :  { %v95_v60 = vmul.f32 %v89_v46, %v71_v40  ;;  %v96_v61 = vmul.f32 %v89_v46, %v72_v42  ;;  %v97_v62 = vmul.f32 %v89_v46, %v73_v43  ;;  %v98_v63 = vmul.f32 %v89_v46, %v74_v44 }
  0x1b   :  { %v114_v0 = vmul.f32 %v438_v50, %v91_v55  ;;  %v115_v1 = vmul.f32 %v438_v50, %v92_v56  ;;  %v116_v2 = vmul.f32 %v438_v50, %v93_v57  ;;  %v117_v3 = vmul.f32 %v438_v50, %v94_v58 }
  0x1c   :  { %v118_v4 = vmul.f32 %v438_v50, %v95_v60  ;;  %v119_v5 = vmul.f32 %v438_v50, %v96_v61  ;;  %v120_v6 = vmul.f32 %v438_v50, %v97_v62  ;;  %v121_v7 = vmul.f32 %v438_v50, %v98_v63 }
  0x1d   :  { %v137_v8 = vadd.f32 %v443_v59, %v114_v0  ;;  %v138_v9 = vadd.f32 %v443_v59, %v115_v1  ;;  %v139_v10 = vadd.f32 %v443_v59, %v116_v2  ;;  %v140_v11 = vadd.f32 %v443_v59, %v117_v3 }
  0x1e   :  { %v141_v12 = vadd.f32 %v443_v59, %v118_v4  ;;  %v142_v13 = vadd.f32 %v443_v59, %v119_v5  ;;  %v143_v14 = vadd.f32 %v443_v59, %v120_v6  ;;  %v144_v15 = vadd.f32 %v443_v59, %v121_v7 }
  0x1f   :  { %v153_v16 = vmax.f32 %v137_v8, 0.0  ;;  %v154_v17 = vmax.f32 %v138_v9, 0.0  ;;  %v155_v18 = vmax.f32 %v139_v10, 0.0  ;;  %v156_v19 = vmax.f32 %v140_v11, 0.0 }
  0x20   :  { %v157_v20 = vmax.f32 %v141_v12, 0.0  ;;  %v158_v21 = vmax.f32 %v142_v13, 0.0  ;;  %v159_v22 = vmax.f32 %v143_v14, 0.0  ;;  %v160_v23 = vmax.f32 %v144_v15, 0.0 }
  0x21   :  { %v322_v24 = vpack.c.bf16 %v154_v17, %v153_v16  ;;  %v327_v25 = vpack.c.bf16 %v156_v19, %v155_v18  ;;  %v99_v26 = vmul.f32 %v89_v46, %v75_v45  ;;  %v100_v27 = vmul.f32 %v89_v46, %v76_v47 }
  0x22   :  { %v332_v28 = vpack.c.bf16 %v158_v21, %v157_v20  ;;  %v337_v29 = vpack.c.bf16 %v160_v23, %v159_v22  ;;  %v101_v30 = vmul.f32 %v89_v46, %v77_v48  ;;  %v102_v31 = vmul.f32 %v89_v46, %v78_v49 }
  0x23   :  { %323 = vst [vmem:[%s506_s5] sm:$0xff] %v322_v24   ;;  %366 = vst [vmem:[%s506_s5 + $0x8] sm:$0xff] %v327_v25   ;;  %v122_v32 = vmul.f32 %v438_v50, %v99_v26  ;;  %v123_v33 = vmul.f32 %v438_v50, %v100_v27  ;;  %v103_v34 = vmul.f32 %v89_v46, %v79_v51 }
  0x24   :  { %v104_v35 = vmul.f32 %v89_v46, %v80_v52  ;;  %367 = vst [vmem:[%s506_s5 + $0x10] sm:$0xff] %v332_v28   ;;  %368 = vst [vmem:[%s506_s5 + $0x18] sm:$0xff] %v337_v29   ;;  %v124_v36 = vmul.f32 %v438_v50, %v101_v30  ;;  %v125_v37 = vmul.f32 %v438_v50, %v102_v31 }
  0x25   :  { %v105_v38 = vmul.f32 %v89_v46, %v81_v53  ;;  %v106_v39 = vmul.f32 %v89_v46, %v82_v54  ;;  %v145_v40 = vadd.f32 %v443_v59, %v122_v32  ;;  %v146_v41 = vadd.f32 %v443_v59, %v123_v33 }
  0x26   :  { %v126_v42 = vmul.f32 %v438_v50, %v103_v34  ;;  %v127_v43 = vmul.f32 %v438_v50, %v104_v35  ;;  %v147_v44 = vadd.f32 %v443_v59, %v124_v36  ;;  %v148_v45 = vadd.f32 %v443_v59, %v125_v37 }
  0x27   :  { %v128_v47 = vmul.f32 %v438_v50, %v105_v38  ;;  %v129_v48 = vmul.f32 %v438_v50, %v106_v39  ;;  %v161_v49 = vmax.f32 %v145_v40, 0.0  ;;  %v162_v51 = vmax.f32 %v146_v41, 0.0 }
  0x28   :  { %v149_v46 = vadd.f32 %v443_v59, %v126_v42  ;;  %v150_v52 = vadd.f32 %v443_v59, %v127_v43  ;;  %v163_v53 = vmax.f32 %v147_v44, 0.0  ;;  %v164_v54 = vmax.f32 %v148_v45, 0.0 }
  0x29   :  { %v151_v55 = vadd.f32 %v443_v59, %v128_v47  ;;  %v152_v56 = vadd.f32 %v443_v59, %v129_v48  ;;  %v342_v57 = vpack.c.bf16 %v162_v51, %v161_v49 }
  0x2a   :  { %v165_v58 = vmax.f32 %v149_v46, 0.0  ;;  %v166_v60 = vmax.f32 %v150_v52, 0.0  ;;  %v347_v61 = vpack.c.bf16 %v164_v54, %v163_v53 }
  0x2b   :  { %v167_v62 = vmax.f32 %v151_v55, 0.0  ;;  %v168_v63 = vmax.f32 %v152_v56, 0.0  ;;  %369 = vst [vmem:[%s506_s5 + $0x20] sm:$0xff] %v342_v57  }
  0x2c   :  { %v352_v50 = vpack.c.bf16 %v166_v60, %v165_v58  ;;  %370 = vst [vmem:[%s506_s5 + $0x28] sm:$0xff] %v347_v61  }
  0x2d   :  { %v357_v0 = vpack.c.bf16 %v168_v63, %v167_v62 }
  0x2e   :  { %371 = vst [vmem:[%s506_s5 + $0x30] sm:$0xff] %v352_v50  }
  0x2f   :  { %372 = vst [vmem:[%s506_s5 + $0x38] sm:$0xff] %v357_v0  }

// kernel: cpcvqvae_forward.14
= control target key start
LH: loop header
LB: loop body
LE: loop exit
PB: predicated region body
PF: predicated region fallthrough
CT: control target
= control target key end

     0   :  { %s701_s1 = inlined_call_operand.vmem [shape: bf16[128,128], index: 1, kind: input, shape index: {}]   ;;  %s702_s0 = inlined_call_operand.vmem [shape: bf16[128,128], index: 0, kind: input, shape index: {}]   ;;  %s703_s2 = inlined_call_operand.vmem [shape: f32[1,128], index: 2, kind: input, shape index: {}]   ;;  %s704_s3 = inlined_call_operand.vmem [shape: bf16[128,128], index: 3, kind: output, shape index: {0}]   ;;  %s705_s4 = inlined_call_operand.vmem [shape: f32[1,128], index: 4, kind: output, shape index: {1}]   ;;  %s706_s5 = inlined_call_operand.vmem [shape: f32[1,128], index: 5, kind: output, shape index: {2}]  }
   0x1   :  { %v562_v0 = vld [vmem:[%s701_s1] sm:$0xff]   ;;  %v563_v1 = vld [vmem:[%s701_s1 + $0x8] sm:$0xff]   ;;  %v564_v2 = vld [vmem:[%s701_s1 + $0x10] sm:$0xff]  }
   0x2   :  { %514 = vmatprep.subr.bf16.mxu0 %v562_v0  ;;  %546 = vmatprep.subr.bf16.mxu1 %v562_v0  ;;  %v565_v3 = vld [vmem:[%s701_s1 + $0x18] sm:$0xff]   ;;  %v570_v4 = vld [vmem:[%s702_s0] sm:$0xff]   ;;  %v567_v7 = vld [vmem:[%s701_s1 + $0x28] sm:$0xff]  }
   0x3   :  { %515 = vmatpush3.bf16.msra.mxu0 %v562_v0  ;;  %554 = vmatpush3.bf16.msra.mxu1 %v562_v0  ;;  %v566_v5 = vld [vmem:[%s701_s1 + $0x20] sm:$0xff]   ;;  %v568_v8 = vld [vmem:[%s701_s1 + $0x30] sm:$0xff]   ;;  %v569_v9 = vld [vmem:[%s701_s1 + $0x38] sm:$0xff]  }
   0x4   :  { %516 = vmatprep.subr.bf16.mxu0 %v563_v1  ;;  %547 = vmatprep.subr.bf16.mxu1 %v563_v1  ;;  %v574_v6 = vld [vmem:[%s702_s0 + $0x20] sm:$0xff]   ;;  %v571_v10 = vld [vmem:[%s702_s0 + $0x8] sm:$0xff]   ;;  %v572_v12 = vld [vmem:[%s702_s0 + $0x10] sm:$0xff]  }
   0x5   :  { %530 = vmatprep.mubr.bf16.mxu0 %v570_v4  ;;  %538 = vmatprep.mubr.bf16.mxu1 %v574_v6  ;;  %v575_v11 = vld [vmem:[%s702_s0 + $0x28] sm:$0xff]   ;;  %v576_v13 = vld [vmem:[%s702_s0 + $0x30] sm:$0xff]   ;;  %v573_v14 = vld [vmem:[%s702_s0 + $0x18] sm:$0xff]  }
   0x6   :  { %v577_v15 = vld [vmem:[%s702_s0 + $0x38] sm:$0xff]   ;;  %v402_v16 = vld [vmem:[%s703_s2] ss:$0 sm:$0xff] }
   0x7   :  { %517 = vmatpush3.bf16.msra.mxu0 %v563_v1  ;;  %555 = vmatpush3.bf16.msra.mxu1 %v563_v1 }
   0x8   :  { %518 = vmatprep.subr.bf16.mxu0 %v564_v2  ;;  %548 = vmatprep.subr.bf16.mxu1 %v564_v2 }
   0xb   :  { %519 = vmatpush3.bf16.msra.mxu0 %v564_v2  ;;  %556 = vmatpush3.bf16.msra.mxu1 %v564_v2 }
   0xc   :  { %520 = vmatprep.subr.bf16.mxu0 %v565_v3  ;;  %549 = vmatprep.subr.bf16.mxu1 %v565_v3 }
   0xf   :  { %521 = vmatpush3.bf16.msra.mxu0 %v565_v3  ;;  %557 = vmatpush3.bf16.msra.mxu1 %v565_v3 }
  0x10   :  { %522 = vmatprep.subr.bf16.mxu0 %v566_v5  ;;  %550 = vmatprep.subr.bf16.mxu1 %v566_v5 }
  0x13   :  { %523 = vmatpush3.bf16.msra.mxu0 %v566_v5  ;;  %558 = vmatpush3.bf16.msra.mxu1 %v566_v5 }
  0x14   :  { %524 = vmatprep.subr.bf16.mxu0 %v567_v7  ;;  %551 = vmatprep.subr.bf16.mxu1 %v567_v7 }
  0x17   :  { %525 = vmatpush3.bf16.msra.mxu0 %v567_v7  ;;  %559 = vmatpush3.bf16.msra.mxu1 %v567_v7 }
  0x18   :  { %526 = vmatprep.subr.bf16.mxu0 %v568_v8  ;;  %552 = vmatprep.subr.bf16.mxu1 %v568_v8 }
  0x1b   :  { %527 = vmatpush3.bf16.msra.mxu0 %v568_v8  ;;  %560 = vmatpush3.bf16.msra.mxu1 %v568_v8 }
  0x1c   :  { %528 = vmatprep.subr.bf16.mxu0 %v569_v9  ;;  %553 = vmatprep.subr.bf16.mxu1 %v569_v9 }
  0x1f   :  { %529 = vmatpush3.bf16.msra.mxu0 %v569_v9  ;;  %561 = vmatpush3.bf16.msra.mxu1 %v569_v9 }
  0x22   :  { %531 = vmatmul.mubr.bf16.vlgmr.msra.gmra.mrb[0].mxu0 %v571_v10  ;;  %539 = vmatmul.mubr.bf16.vlgmr.msra.gmra.mrb[0].mxu1 %v575_v11 }
  0x23   :  { %534 = vmatprep.mubr.bf16.mxu0 %v572_v12  ;;  %542 = vmatprep.mubr.bf16.mxu1 %v576_v13 }
  0x2a   :  { %535 = vmatmul.mubr.bf16.gmra.mrb[4].mxu0 %v573_v14  ;;  %543 = vmatmul.mubr.bf16.gmra.mrb[4].mxu1 %v577_v15 }
  0xf5   :  { %v532_v17 = vpop.f32.mrb[0].mxu0  ;;  %v540_v18 = vpop.f32.mrb[0].mxu1 }
  0xf6   :  { %v187_v19 = vpop.f32.mrb[1].mxu0  ;;  %v659_v20 = vadd.f32 %v540_v18, %v402_v16  ;;  %v219_v21 = vpop.f32.mrb[1].mxu1  ;;  %v196_v25 = vadd.f32 %v532_v17, %v402_v16 }
  0xf7   :  { %v188_v22 = vadd.f32 %v402_v16, %v187_v19  ;;  %v533_v23 = vpop.f32.mrb[2].mxu0  ;;  %v541_v24 = vpop.f32.mrb[2].mxu1  ;;  %v220_v28 = vadd.f32 %v402_v16, %v219_v21 }
  0xf8   :  { %v199_v26 = vadd.f32 %v533_v23, %v402_v16  ;;  %v190_v27 = vpop.f32.mrb[3].mxu0  ;;  %v661_v29 = vadd.f32 %v541_v24, %v402_v16  ;;  %v222_v30 = vpop.f32.mrb[3].mxu1  ;;  %v274_v40 = vmul.f32 %v196_v25, %v196_v25  ;;  %v282_v21 = vmul.f32 %v659_v20, %v659_v20 }
  0xf9   :  { %v191_v31 = vadd.f32 %v402_v16, %v190_v27  ;;  %v223_v32 = vadd.f32 %v402_v16, %v222_v30  ;;  %v272_v35 = vmul.f32 %v188_v22, %v188_v22  ;;  %v280_v14 = vmul.f32 %v220_v28, %v220_v28 }
  0xfa   :  { %v459_v33 = vpack.c.bf16 %v199_v26, %v196_v25  ;;  %v479_v34 = vpack.c.bf16 %v661_v29, %v659_v20  ;;  %v275_v47 = vmul.f32 %v199_v26, %v199_v26  ;;  %v283_v24 = vmul.f32 %v661_v29, %v661_v29 }
  0xfb   :  { %v250_v36 = vadd.f32 %v191_v31, %v188_v22  ;;  %v273_v37 = vmul.f32 %v191_v31, %v191_v31  ;;  %v454_v38 = vpack.c.bf16 %v191_v31, %v188_v22  ;;  %v474_v39 = vpack.c.bf16 %v223_v32, %v220_v28 }
  0xfc   :  { %491 = vst [vmem:[%s704_s3 + $0x8] sm:$0xff] %v459_v33   ;;  %495 = vst [vmem:[%s704_s3 + $0x28] sm:$0xff] %v479_v34   ;;  %v281_v19 = vmul.f32 %v223_v32, %v223_v32 }
  0xfd   :  { %v251_v41 = vadd.f32 %v250_v36, %v196_v25  ;;  %v288_v42 = vadd.f32 %v273_v37, %v272_v35  ;;  %455 = vst [vmem:[%s704_s3] sm:$0xff] %v454_v38   ;;  %v536_v43 = vpop.f32.mrb[4].mxu0  ;;  %v544_v44 = vpop.f32.mrb[4].mxu1  ;;  %494 = vst [vmem:[%s704_s3 + $0x20] sm:$0xff] %v474_v39  }
  0xfe   :  { %v203_v45 = vpop.f32.mrb[5].mxu0  ;;  %v235_v46 = vpop.f32.mrb[5].mxu1  ;;  %v212_v53 = vadd.f32 %v536_v43, %v402_v16  ;;  %v244_v56 = vadd.f32 %v544_v44, %v402_v16 }
  0xff   :  { %v289_v48 = vadd.f32 %v288_v42, %v274_v40  ;;  %v204_v49 = vadd.f32 %v402_v16, %v203_v45  ;;  %v252_v50 = vadd.f32 %v251_v41, %v199_v26  ;;  %v537_v51 = vpop.f32.mrb[6].mxu0  ;;  %v545_v52 = vpop.f32.mrb[6].mxu1  ;;  %v236_v0 = vadd.f32 %v402_v16, %v235_v46 }
 0x100   :  { %v215_v54 = vadd.f32 %v537_v51, %v402_v16  ;;  %v206_v55 = vpop.f32.mrb[7].mxu0  ;;  %v247_v57 = vadd.f32 %v545_v52, %v402_v16  ;;  %v238_v58 = vpop.f32.mrb[7].mxu1  ;;  %v278_v7 = vmul.f32 %v212_v53, %v212_v53  ;;  %v286_v35 = vmul.f32 %v244_v56, %v244_v56 }
 0x101   :  { %v253_v59 = vadd.f32 %v252_v50, %v204_v49  ;;  %v276_v60 = vmul.f32 %v204_v49, %v204_v49  ;;  %v290_v61 = vadd.f32 %v289_v48, %v275_v47  ;;  %v207_v62 = vadd.f32 %v402_v16, %v206_v55 }
 0x102   :  { %v469_v63 = vpack.c.bf16 %v215_v54, %v212_v53  ;;  %v489_v5 = vpack.c.bf16 %v247_v57, %v244_v56  ;;  %v239_v6 = vadd.f32 %v402_v16, %v238_v58  ;;  %v279_v11 = vmul.f32 %v215_v54, %v215_v54 }
 0x103   :  { %v291_v1 = vadd.f32 %v290_v61, %v276_v60  ;;  %v254_v2 = vadd.f32 %v253_v59, %v207_v62  ;;  %v277_v3 = vmul.f32 %v207_v62, %v207_v62  ;;  %v464_v4 = vpack.c.bf16 %v207_v62, %v204_v49 }
 0x104   :  { %493 = vst [vmem:[%s704_s3 + $0x18] sm:$0xff] %v469_v63   ;;  %497 = vst [vmem:[%s704_s3 + $0x38] sm:$0xff] %v489_v5   ;;  %v484_v10 = vpack.c.bf16 %v239_v6, %v236_v0  ;;  %v284_v27 = vmul.f32 %v236_v0, %v236_v0  ;;  %v285_v34 = vmul.f32 %v239_v6, %v239_v6 }
 0x105   :  { %v255_v8 = vadd.f32 %v254_v2, %v212_v53  ;;  %v292_v9 = vadd.f32 %v291_v1, %v277_v3  ;;  %492 = vst [vmem:[%s704_s3 + $0x10] sm:$0xff] %v464_v4   ;;  %v287_v37 = vmul.f32 %v247_v57, %v247_v57 }
 0x106   :  { %496 = vst [vmem:[%s704_s3 + $0x30] sm:$0xff] %v484_v10  }
 0x107   :  { %v293_v12 = vadd.f32 %v292_v9, %v278_v7  ;;  %v256_v13 = vadd.f32 %v255_v8, %v215_v54 }
 0x109   :  { %v257_v15 = vadd.f32 %v256_v13, %v220_v28  ;;  %v294_v16 = vadd.f32 %v293_v12, %v279_v11 }
 0x10b   :  { %v295_v17 = vadd.f32 %v294_v16, %v280_v14  ;;  %v258_v18 = vadd.f32 %v257_v15, %v223_v32 }
 0x10d   :  { %v259_v22 = vadd.f32 %v258_v18, %v659_v20  ;;  %v296_v23 = vadd.f32 %v295_v17, %v281_v19 }
 0x10f   :  { %v297_v25 = vadd.f32 %v296_v23, %v282_v21  ;;  %v260_v26 = vadd.f32 %v259_v22, %v661_v29 }
 0x111   :  { %v261_v30 = vadd.f32 %v260_v26, %v236_v0  ;;  %v298_v31 = vadd.f32 %v297_v25, %v283_v24 }
 0x113   :  { %v299_v28 = vadd.f32 %v298_v31, %v284_v27  ;;  %v262_v33 = vadd.f32 %v261_v30, %v239_v6 }
 0x115   :  { %v263_v32 = vadd.f32 %v262_v33, %v244_v56  ;;  %v300_v36 = vadd.f32 %v299_v28, %v285_v34 }
 0x117   :  { %v264_v38 = vadd.f32 %v263_v32, %v247_v57  ;;  %v301_v39 = vadd.f32 %v300_v36, %v286_v35 }
 0x119   :  { %v265_v20 = vrot.slane %v264_v38, 4  ;;  %v302_v40 = vadd.f32 %v301_v39, %v287_v37 }
 0x11b   :  { %v266_v41 = vadd.f32 %v265_v20, %v264_v38  ;;  %v303_v42 = vrot.slane %v302_v40, 4 }
 0x11d   :  { %v267_v43 = vrot.slane %v266_v41, 2  ;;  %v304_v44 = vadd.f32 %v303_v42, %v302_v40 }
 0x11f   :  { %v268_v45 = vadd.f32 %v267_v43, %v266_v41  ;;  %v305_v29 = vrot.slane %v304_v44, 2 }
 0x121   :  { %v269_v46 = vrot.slane %v268_v45, 1  ;;  %v306_v47 = vadd.f32 %v305_v29, %v304_v44 }
 0x123   :  { %v270_v48 = vadd.f32 %v269_v46, %v268_v45  ;;  %v307_v49 = vrot.slane %v306_v47, 1 }
 0x125   :  { %271 = vst [vmem:[%s705_s4] sm:$0x1] %v270_v48  ;;  %v308_v50 = vadd.f32 %v307_v49, %v306_v47 }
 0x127   :  { %309 = vst [vmem:[%s706_s5] sm:$0x1] %v308_v50 }

// kernel: cpcvqvae_forward.16
= control target key start
LH: loop header
LB: loop body
LE: loop exit
PB: predicated region body
PF: predicated region fallthrough
CT: control target
= control target key end

     0   :  { %s442_s1 = inlined_call_operand.vmem [shape: bf16[256,128], index: 1, kind: input, shape index: {}]   ;;  %s443_s0 = inlined_call_operand.vmem [shape: bf16[32,256], index: 0, kind: input, shape index: {}]   ;;  %s444_s2 = inlined_call_operand.vmem [shape: f32[1,128], index: 2, kind: input, shape index: {}]   ;;  %s445_s3 = inlined_call_operand.vmem [shape: bf16[32,128], index: 3, kind: output, shape index: {}]  }
   0x1   :  { %v331_v0 = vld [vmem:[%s442_s1 + $0x40] sm:$0xff]   ;;  %v333_v2 = vld [vmem:[%s442_s1 + $0x48] sm:$0xff]   ;;  %v335_v4 = vld [vmem:[%s442_s1 + $0x50] sm:$0xff]  }
   0x2   :  { %v332_v1 = vld [vmem:[%s442_s1] sm:$0xff]   ;;  %287 = vmatprep.subr.bf16.mxu0 %v331_v0  ;;  %315 = vmatprep.subr.bf16.mxu1 %v331_v0  ;;  %v334_v3 = vld [vmem:[%s442_s1 + $0x8] sm:$0xff]   ;;  %v336_v5 = vld [vmem:[%s442_s1 + $0x10] sm:$0xff]  }
   0x3   :  { %288 = vmatpush3.bf16.msra.mxu0 %v332_v1  ;;  %323 = vmatpush3.bf16.msra.mxu1 %v332_v1  ;;  %v337_v6 = vld [vmem:[%s442_s1 + $0x58] sm:$0xff]   ;;  %v339_v8 = vld [vmem:[%s442_s1 + $0x60] sm:$0xff]   ;;  %v341_v10 = vld [vmem:[%s442_s1 + $0x68] sm:$0xff]  }
   0x4   :  { %289 = vmatprep.subr.bf16.mxu0 %v333_v2  ;;  %316 = vmatprep.subr.bf16.mxu1 %v333_v2  ;;  %v338_v7 = vld [vmem:[%s442_s1 + $0x18] sm:$0xff]   ;;  %v340_v9 = vld [vmem:[%s442_s1 + $0x20] sm:$0xff]   ;;  %v342_v13 = vld [vmem:[%s442_s1 + $0x28] sm:$0xff]  }
   0x5   :  { %v349_v11 = vld [vmem:[%s443_s0 + $0x4] ss:$8 sps:$4 sm:$0xff]   ;;  %v352_v12 = vld [vmem:[%s443_s0 + $0x14] ss:$8 sps:$4 sm:$0xff]   ;;  %v347_v18 = vld [vmem:[%s443_s0] ss:$8 sps:$4 sm:$0xff]  }
   0x6   :  { %v343_v14 = vld [vmem:[%s442_s1 + $0x70] sm:$0xff]   ;;  %206 = vmatprep.mubr.bf16.mxu0 %v349_v11  ;;  %214 = vmatprep.mubr.bf16.mxu1 %v352_v12  ;;  %v345_v16 = vld [vmem:[%s442_s1 + $0x78] sm:$0xff]   ;;  %v247_v28 = vld [vmem:[%s444_s2] ss:$0 sm:$0xff] }
   0x7   :  { %290 = vmatpush3.bf16.msra.mxu0 %v334_v3  ;;  %324 = vmatpush3.bf16.msra.mxu1 %v334_v3  ;;  %v344_v15 = vld [vmem:[%s442_s1 + $0x30] sm:$0xff]   ;;  %v346_v17 = vld [vmem:[%s442_s1 + $0x38] sm:$0xff]  }
   0x8   :  { %291 = vmatprep.subr.bf16.mxu0 %v335_v4  ;;  %317 = vmatprep.subr.bf16.mxu1 %v335_v4  ;;  %v350_v19 = vld [vmem:[%s443_s0 + $0x10] ss:$8 sps:$4 sm:$0xff]  }
   0xb   :  { %292 = vmatpush3.bf16.msra.mxu0 %v336_v5  ;;  %325 = vmatpush3.bf16.msra.mxu1 %v336_v5 }
   0xc   :  { %293 = vmatprep.subr.bf16.mxu0 %v337_v6  ;;  %318 = vmatprep.subr.bf16.mxu1 %v337_v6 }
   0xf   :  { %294 = vmatpush3.bf16.msra.mxu0 %v338_v7  ;;  %326 = vmatpush3.bf16.msra.mxu1 %v338_v7 }
  0x10   :  { %295 = vmatprep.subr.bf16.mxu0 %v339_v8  ;;  %319 = vmatprep.subr.bf16.mxu1 %v339_v8 }
  0x13   :  { %296 = vmatpush3.bf16.msra.mxu0 %v340_v9  ;;  %327 = vmatpush3.bf16.msra.mxu1 %v340_v9 }
  0x14   :  { %297 = vmatprep.subr.bf16.mxu0 %v341_v10  ;;  %320 = vmatprep.subr.bf16.mxu1 %v341_v10 }
  0x17   :  { %298 = vmatpush3.bf16.msra.mxu0 %v342_v13  ;;  %328 = vmatpush3.bf16.msra.mxu1 %v342_v13 }
  0x18   :  { %299 = vmatprep.subr.bf16.mxu0 %v343_v14  ;;  %321 = vmatprep.subr.bf16.mxu1 %v343_v14 }
  0x1b   :  { %300 = vmatpush3.bf16.msra.mxu0 %v344_v15  ;;  %329 = vmatpush3.bf16.msra.mxu1 %v344_v15 }
  0x1c   :  { %301 = vmatprep.subr.bf16.mxu0 %v345_v16  ;;  %322 = vmatprep.subr.bf16.mxu1 %v345_v16 }
  0x1f   :  { %302 = vmatpush3.bf16.msra.mxu0 %v346_v17  ;;  %330 = vmatpush3.bf16.msra.mxu1 %v346_v17 }
  0x22   :  { %207 = vmatmul.mubr.bf16.vlgmr.msra.gmra.mrb[0].mxu0 %v347_v18  ;;  %215 = vmatmul.mubr.bf16.vlgmr.msra.gmra.mrb[0].mxu1 %v350_v19 }
  0xf5   :  { %v303_v20 = vpop.f32.mrb[0].mxu0  ;;  %v309_v21 = vpop.f32.mrb[0].mxu1 }
  0xf6   :  { %v304_v22 = vpop.f32.mrb[1].mxu0  ;;  %v310_v23 = vpop.f32.mrb[1].mxu1 }
  0xf7   :  { %v305_v24 = vadd.f32 %v304_v22, %v303_v20  ;;  %v311_v25 = vadd.f32 %v310_v23, %v309_v21  ;;  %v306_v26 = vpop.f32.mrb[2].mxu0  ;;  %v312_v27 = vpop.f32.mrb[2].mxu1 }
  0xf8   :  { %v307_v29 = vpop.f32.mrb[3].mxu0  ;;  %v313_v30 = vpop.f32.mrb[3].mxu1 }
  0xf9   :  { %v308_v31 = vadd.f32 %v307_v29, %v306_v26  ;;  %v314_v32 = vadd.f32 %v313_v30, %v312_v27  ;;  %v209_v33 = vadd.f32 %v305_v24, %v247_v28  ;;  %v217_v34 = vadd.f32 %v311_v25, %v247_v28 }
  0xfb   :  { %v212_v35 = vadd.f32 %v308_v31, %v247_v28  ;;  %v220_v36 = vadd.f32 %v314_v32, %v247_v28 }
  0xfd   :  { %v279_v37 = vpack.c.bf16 %v212_v35, %v209_v33  ;;  %v284_v38 = vpack.c.bf16 %v220_v36, %v217_v34 }
  0xff   :  { %280 = vst [vmem:[%s445_s3] sm:$0xff] %v279_v37   ;;  %286 = vst [vmem:[%s445_s3 + $0x8] sm:$0xff] %v284_v38  }

// kernel: cpcvqvae_forward.18
= control target key start
LH: loop header
LB: loop body
LE: loop exit
PB: predicated region body
PF: predicated region fallthrough
CT: control target
= control target key end

     0   :  { %v38_v5 = vlaneseq  ;;  %s195_s1 = inlined_call_operand.vmem [shape: f32[1,128], index: 1, kind: input, shape index: {}]   ;;  %s196_s2 = inlined_call_operand.vmem [shape: f32[1,128], index: 2, kind: input, shape index: {}]   ;;  %s197_s0 = inlined_call_operand.vmem [shape: bf16[32,128], index: 0, kind: input, shape index: {}]   ;;  %s198_s3 = inlined_call_operand.vmem [shape: f32[1,128], index: 3, kind: input, shape index: {}]   ;;  %s199_s4 = inlined_call_operand.vmem [shape: f32[1,128], index: 4, kind: input, shape index: {}]   ;;  %s200_s5 = inlined_call_operand.vmem [shape: bf16[32,128], index: 5, kind: output, shape index: {}]  }
   0x1   :  { %v20_v0 = vld [vmem:[%s195_s1] sm:$0x1]  ;;  %v137_v12 = vld [vmem:[%s197_s0 + $0x8] sm:$0xff]  }
   0x2   :  { %v22_v1 = vld [vmem:[%s196_s2] sm:$0x1]  ;;  %v24_v2 = vmul.f32 0.03125, %v20_v0  ;;  %v39_v8 = vshrl.u32 %v38_v5, 7  ;;  %v125_v16 = vunpack.c.l.bf16 %v137_v12  ;;  %v126_v17 = vunpack.c.h.bf16 %v137_v12 }
   0x3   :  { %v25_v3 = vmul.f32 0.03125, %v22_v1  ;;  %v120_v10 = vld [vmem:[%s197_s0] sm:$0xff]  }
   0x4   :  { %v26_v4 = vmul.f32 %v24_v2, %v24_v2  ;;  %v40_v11 = vsub.s32 0, %v39_v8  ;;  %v121_v13 = vunpack.c.l.bf16 %v120_v10  ;;  %v122_v14 = vunpack.c.h.bf16 %v120_v10  ;;  %v109_v24 = vld [vmem:[%s198_s3] ss:$0 sm:$0xff] }
   0x5   :  { %v110_v29 = vld [vmem:[%s199_s4] ss:$0 sm:$0xff] }
   0x6   :  { %v27_v6 = vsub.f32 %v25_v3, %v26_v4  ;;  %v41_v15 = vrot.slane %v24_v2, %v40_v11 }
   0x8   :  { %v28_v7 = vmax.f32 %v27_v6, 0.0  ;;  %v43_v18 = vsub.f32 %v121_v13, %v41_v15  ;;  %v44_v19 = vsub.f32 %v122_v14, %v41_v15  ;;  %v45_v20 = vsub.f32 %v125_v16, %v41_v15 }
   0x9   :  { %v46_v21 = vsub.f32 %v126_v17, %v41_v15 }
   0xa   :  { %v47_v9 = vadd.f32 1e-05, %v28_v7 }
   0xc   :  { %139 = vrsqrt.f32 %v47_v9 }
  0x16   :  { %v140_v22 = vpop.eup %139 }
  0x17   :  { %v53_v23 = vrot.slane %v140_v22, %v40_v11 }
  0x19   :  { %v55_v25 = vmul.f32 %v53_v23, %v43_v18  ;;  %v56_v26 = vmul.f32 %v53_v23, %v44_v19  ;;  %v57_v27 = vmul.f32 %v53_v23, %v45_v20  ;;  %v58_v28 = vmul.f32 %v53_v23, %v46_v21 }
  0x1b   :  { %v66_v30 = vmul.f32 %v109_v24, %v55_v25  ;;  %v67_v31 = vmul.f32 %v109_v24, %v56_v26  ;;  %v68_v32 = vmul.f32 %v109_v24, %v57_v27  ;;  %v69_v33 = vmul.f32 %v109_v24, %v58_v28 }
  0x1d   :  { %v77_v34 = vadd.f32 %v110_v29, %v66_v30  ;;  %v78_v35 = vadd.f32 %v110_v29, %v67_v31  ;;  %v79_v36 = vadd.f32 %v110_v29, %v68_v32  ;;  %v80_v37 = vadd.f32 %v110_v29, %v69_v33 }
  0x1f   :  { %v81_v38 = vmax.f32 %v77_v34, 0.0  ;;  %v82_v39 = vmax.f32 %v78_v35, 0.0  ;;  %v83_v40 = vmax.f32 %v79_v36, 0.0  ;;  %v84_v41 = vmax.f32 %v80_v37, 0.0 }
  0x21   :  { %v130_v42 = vpack.c.bf16 %v82_v39, %v81_v38  ;;  %v135_v43 = vpack.c.bf16 %v84_v41, %v83_v40 }
  0x23   :  { %131 = vst [vmem:[%s200_s5] sm:$0xff] %v130_v42   ;;  %138 = vst [vmem:[%s200_s5 + $0x8] sm:$0xff] %v135_v43  }

// kernel: cpcvqvae_forward.17
= control target key start
LH: loop header
LB: loop body
LE: loop exit
PB: predicated region body
PF: predicated region fallthrough
CT: control target
= control target key end

     0   :  { %v387_v14 = vmov 0   ;;  %s493_s1 = inlined_call_operand.vmem [shape: bf16[256,128], index: 1, kind: input, shape index: {}]   ;;  %s494_s0 = inlined_call_operand.vmem [shape: bf16[32,256], index: 0, kind: input, shape index: {}]   ;;  %s495_s2 = inlined_call_operand.vmem [shape: f32[1,128], index: 2, kind: input, shape index: {}]   ;;  %s496_s3 = inlined_call_operand.vmem [shape: bf16[32,128], index: 3, kind: output, shape index: {0}]   ;;  %s497_s4 = inlined_call_operand.vmem [shape: f32[1,128], index: 4, kind: output, shape index: {1}]   ;;  %s498_s5 = inlined_call_operand.vmem [shape: f32[1,128], index: 5, kind: output, shape index: {2}]  }
   0x1   :  { %v371_v0 = vld [vmem:[%s493_s1 + $0x40] sm:$0xff]   ;;  %v373_v2 = vld [vmem:[%s493_s1 + $0x48] sm:$0xff]   ;;  %v375_v4 = vld [vmem:[%s493_s1 + $0x50] sm:$0xff]  }
   0x2   :  { %v372_v1 = vld [vmem:[%s493_s1] sm:$0xff]   ;;  %326 = vmatprep.subr.bf16.mxu0 %v371_v0  ;;  %354 = vmatprep.subr.bf16.mxu1 %v371_v0  ;;  %v374_v3 = vld [vmem:[%s493_s1 + $0x8] sm:$0xff]   ;;  %v376_v5 = vld [vmem:[%s493_s1 + $0x10] sm:$0xff]  }
   0x3   :  { %327 = vmatpush3.bf16.msra.mxu0 %v372_v1  ;;  %362 = vmatpush3.bf16.msra.mxu1 %v372_v1  ;;  %v377_v6 = vld [vmem:[%s493_s1 + $0x58] sm:$0xff]   ;;  %v379_v8 = vld [vmem:[%s493_s1 + $0x60] sm:$0xff]   ;;  %v381_v10 = vld [vmem:[%s493_s1 + $0x68] sm:$0xff]  }
   0x4   :  { %328 = vmatprep.subr.bf16.mxu0 %v373_v2  ;;  %355 = vmatprep.subr.bf16.mxu1 %v373_v2  ;;  %v378_v7 = vld [vmem:[%s493_s1 + $0x18] sm:$0xff]   ;;  %v380_v9 = vld [vmem:[%s493_s1 + $0x20] sm:$0xff]   ;;  %v19_v12 = vld [vmem:[%s494_s0 + $0x8] sm:$0xff] }
   0x5   :  { %v18_v11 = vld [vmem:[%s494_s0] sm:$0xff]  ;;  %v20_v13 = vld [vmem:[%s494_s0 + $0x10] sm:$0xff]  ;;  %v23_v16 = vmax.bf16 %v387_v14, %v19_v12  ;;  %v21_v17 = vld [vmem:[%s494_s0 + $0x18] sm:$0xff] }
   0x6   :  { %v22_v15 = vmax.bf16 %v387_v14, %v18_v11  ;;  %v24_v18 = vmax.bf16 %v387_v14, %v20_v13  ;;  %v25_v19 = vmax.bf16 %v387_v14, %v21_v17  ;;  %v382_v20 = vld [vmem:[%s493_s1 + $0x28] sm:$0xff]   ;;  %v383_v22 = vld [vmem:[%s493_s1 + $0x70] sm:$0xff]   ;;  %v385_v25 = vld [vmem:[%s493_s1 + $0x78] sm:$0xff]  }
   0x7   :  { %329 = vmatpush3.bf16.msra.mxu0 %v374_v3  ;;  %363 = vmatpush3.bf16.msra.mxu1 %v374_v3  ;;  %v384_v24 = vld [vmem:[%s493_s1 + $0x30] sm:$0xff]   ;;  %v386_v26 = vld [vmem:[%s493_s1 + $0x38] sm:$0xff]   ;;  %v286_v31 = vld [vmem:[%s495_s2] ss:$0 sm:$0xff] }
   0x8   :  { %330 = vmatprep.subr.bf16.mxu0 %v375_v4  ;;  %356 = vmatprep.subr.bf16.mxu1 %v375_v4  ;;  %v288_v21 = vcombine.high %v22_v15, %v23_v16  ;;  %v290_v23 = vcombine.high %v24_v18, %v25_v19  ;;  %v287_v27 = vcombine.low %v22_v15, %v23_v16 }
   0x9   :  { %v289_v28 = vcombine.low %v24_v18, %v25_v19 }
   0xa   :  { %213 = vmatprep.mubr.bf16.mxu0 %v288_v21  ;;  %221 = vmatprep.mubr.bf16.mxu1 %v290_v23 }
   0xb   :  { %331 = vmatpush3.bf16.msra.mxu0 %v376_v5  ;;  %364 = vmatpush3.bf16.msra.mxu1 %v376_v5 }
   0xc   :  { %332 = vmatprep.subr.bf16.mxu0 %v377_v6  ;;  %357 = vmatprep.subr.bf16.mxu1 %v377_v6 }
   0xf   :  { %333 = vmatpush3.bf16.msra.mxu0 %v378_v7  ;;  %365 = vmatpush3.bf16.msra.mxu1 %v378_v7 }
  0x10   :  { %334 = vmatprep.subr.bf16.mxu0 %v379_v8  ;;  %358 = vmatprep.subr.bf16.mxu1 %v379_v8 }
  0x13   :  { %335 = vmatpush3.bf16.msra.mxu0 %v380_v9  ;;  %366 = vmatpush3.bf16.msra.mxu1 %v380_v9 }
  0x14   :  { %336 = vmatprep.subr.bf16.mxu0 %v381_v10  ;;  %359 = vmatprep.subr.bf16.mxu1 %v381_v10 }
  0x17   :  { %337 = vmatpush3.bf16.msra.mxu0 %v382_v20  ;;  %367 = vmatpush3.bf16.msra.mxu1 %v382_v20 }
  0x18   :  { %338 = vmatprep.subr.bf16.mxu0 %v383_v22  ;;  %360 = vmatprep.subr.bf16.mxu1 %v383_v22 }
  0x1b   :  { %339 = vmatpush3.bf16.msra.mxu0 %v384_v24  ;;  %368 = vmatpush3.bf16.msra.mxu1 %v384_v24 }
  0x1c   :  { %340 = vmatprep.subr.bf16.mxu0 %v385_v25  ;;  %361 = vmatprep.subr.bf16.mxu1 %v385_v25 }
  0x1f   :  { %341 = vmatpush3.bf16.msra.mxu0 %v386_v26  ;;  %369 = vmatpush3.bf16.msra.mxu1 %v386_v26 }
  0x22   :  { %214 = vmatmul.mubr.bf16.vlgmr.msra.gmra.mrb[0].mxu0 %v287_v27  ;;  %222 = vmatmul.mubr.bf16.vlgmr.msra.gmra.mrb[0].mxu1 %v289_v28 }
  0xf5   :  { %v342_v29 = vpop.f32.mrb[0].mxu0  ;;  %v348_v30 = vpop.f32.mrb[0].mxu1 }
  0xf6   :  { %v343_v32 = vpop.f32.mrb[1].mxu0  ;;  %v349_v33 = vpop.f32.mrb[1].mxu1 }
  0xf7   :  { %v344_v34 = vadd.f32 %v343_v32, %v342_v29  ;;  %v345_v35 = vpop.f32.mrb[2].mxu0  ;;  %v350_v36 = vadd.f32 %v349_v33, %v348_v30  ;;  %v351_v37 = vpop.f32.mrb[2].mxu1 }
  0xf8   :  { %v346_v38 = vpop.f32.mrb[3].mxu0  ;;  %v352_v39 = vpop.f32.mrb[3].mxu1 }
  0xf9   :  { %v216_v40 = vadd.f32 %v344_v34, %v286_v31  ;;  %v224_v41 = vadd.f32 %v350_v36, %v286_v31  ;;  %v347_v42 = vadd.f32 %v346_v38, %v345_v35  ;;  %v353_v43 = vadd.f32 %v352_v39, %v351_v37 }
  0xfb   :  { %v219_v44 = vadd.f32 %v347_v42, %v286_v31  ;;  %v227_v45 = vadd.f32 %v353_v43, %v286_v31  ;;  %v240_v46 = vmul.f32 %v216_v40, %v216_v40  ;;  %v242_v47 = vmul.f32 %v224_v41, %v224_v41 }
  0xfd   :  { %v230_v48 = vadd.f32 %v219_v44, %v216_v40  ;;  %v241_v49 = vmul.f32 %v219_v44, %v219_v44  ;;  %v318_v50 = vpack.c.bf16 %v219_v44, %v216_v40  ;;  %v323_v51 = vpack.c.bf16 %v227_v45, %v224_v41 }
  0xfe   :  { %v243_v55 = vmul.f32 %v227_v45, %v227_v45 }
  0xff   :  { %v244_v52 = vadd.f32 %v241_v49, %v240_v46  ;;  %319 = vst [vmem:[%s496_s3] sm:$0xff] %v318_v50   ;;  %v231_v53 = vadd.f32 %v230_v48, %v224_v41  ;;  %325 = vst [vmem:[%s496_s3 + $0x8] sm:$0xff] %v323_v51  }
 0x101   :  { %v232_v54 = vadd.f32 %v231_v53, %v227_v45  ;;  %v245_v56 = vadd.f32 %v244_v52, %v242_v47 }
 0x103   :  { %v233_v57 = vrot.slane %v232_v54, 4  ;;  %v246_v58 = vadd.f32 %v245_v56, %v243_v55 }
 0x105   :  { %v234_v59 = vadd.f32 %v233_v57, %v232_v54  ;;  %v247_v60 = vrot.slane %v246_v58, 4 }
 0x107   :  { %v235_v61 = vrot.slane %v234_v59, 2  ;;  %v248_v62 = vadd.f32 %v247_v60, %v246_v58 }
 0x109   :  { %v236_v63 = vadd.f32 %v235_v61, %v234_v59  ;;  %v249_v0 = vrot.slane %v248_v62, 2 }
 0x10b   :  { %v237_v1 = vrot.slane %v236_v63, 1  ;;  %v250_v2 = vadd.f32 %v249_v0, %v248_v62 }
 0x10d   :  { %v238_v3 = vadd.f32 %v237_v1, %v236_v63  ;;  %v251_v4 = vrot.slane %v250_v2, 1 }
 0x10f   :  { %239 = vst [vmem:[%s497_s4] sm:$0x1] %v238_v3  ;;  %v252_v5 = vadd.f32 %v251_v4, %v250_v2 }
 0x111   :  { %253 = vst [vmem:[%s498_s5] sm:$0x1] %v252_v5 }

// kernel: cpcvqvae_forward.24
= control target key start
LH: loop header
LB: loop body
LE: loop exit
PB: predicated region body
PF: predicated region fallthrough
CT: control target
= control target key end

     0   :  { %v41_v5 = vlaneseq  ;;  %s197_s1 = inlined_call_operand.vmem [shape: f32[1,128], index: 1, kind: input, shape index: {}]   ;;  %s198_s2 = inlined_call_operand.vmem [shape: f32[1,128], index: 2, kind: input, shape index: {}]   ;;  %s199_s0 = inlined_call_operand.vmem [shape: bf16[32,128], index: 0, kind: input, shape index: {}]   ;;  %s200_s5 = inlined_call_operand.vmem [shape: bf16[32,128], index: 5, kind: input, shape index: {}]   ;;  %s201_s3 = inlined_call_operand.vmem [shape: f32[1,128], index: 3, kind: input, shape index: {}]   ;;  %s202_s4 = inlined_call_operand.vmem [shape: f32[1,128], index: 4, kind: input, shape index: {}]   ;;  %s203_s6 = inlined_call_operand.vmem [shape: f32[32,128], index: 6, kind: output, shape index: {}]  }
   0x1   :  { %v23_v0 = vld [vmem:[%s197_s1] sm:$0x1]  ;;  %v122_v12 = vld [vmem:[%s199_s0 + $0x8] sm:$0xff]  }
   0x2   :  { %v25_v1 = vld [vmem:[%s198_s2] sm:$0x1]  ;;  %v27_v2 = vmul.f32 0.03125, %v23_v0  ;;  %v42_v8 = vshrl.u32 %v41_v5, 7  ;;  %v112_v16 = vunpack.c.l.bf16 %v122_v12  ;;  %v113_v17 = vunpack.c.h.bf16 %v122_v12  ;;  %v123_v25 = vld [vmem:[%s200_s5 + $0x8] sm:$0xff]  }
   0x3   :  { %v28_v3 = vmul.f32 0.03125, %v25_v1  ;;  %v107_v10 = vld [vmem:[%s199_s0] sm:$0xff]   ;;  %v120_v34 = vunpack.c.l.bf16 %v123_v25  ;;  %v121_v35 = vunpack.c.h.bf16 %v123_v25 }
   0x4   :  { %v29_v4 = vmul.f32 %v27_v2, %v27_v2  ;;  %v43_v11 = vsub.s32 0, %v42_v8  ;;  %v108_v13 = vunpack.c.l.bf16 %v107_v10  ;;  %v109_v15 = vunpack.c.h.bf16 %v107_v10  ;;  %v115_v24 = vld [vmem:[%s200_s5] sm:$0xff]  }
   0x5   :  { %v104_v26 = vld [vmem:[%s201_s3] ss:$0 sm:$0xff]  ;;  %v116_v32 = vunpack.c.l.bf16 %v115_v24  ;;  %v117_v33 = vunpack.c.h.bf16 %v115_v24 }
   0x6   :  { %v30_v6 = vsub.f32 %v28_v3, %v29_v4  ;;  %v44_v14 = vrot.slane %v27_v2, %v43_v11  ;;  %v105_v31 = vld [vmem:[%s202_s4] ss:$0 sm:$0xff] }
   0x8   :  { %v31_v7 = vmax.f32 %v30_v6, 0.0  ;;  %v46_v18 = vsub.f32 %v108_v13, %v44_v14  ;;  %v47_v19 = vsub.f32 %v109_v15, %v44_v14  ;;  %v48_v20 = vsub.f32 %v112_v16, %v44_v14 }
   0x9   :  { %v49_v21 = vsub.f32 %v113_v17, %v44_v14 }
   0xa   :  { %v50_v9 = vadd.f32 1e-05, %v31_v7 }
   0xc   :  { %124 = vrsqrt.f32 %v50_v9 }
  0x16   :  { %v125_v22 = vpop.eup %124 }
  0x17   :  { %v56_v23 = vrot.slane %v125_v22, %v43_v11 }
  0x19   :  { %v58_v27 = vmul.f32 %v56_v23, %v46_v18  ;;  %v59_v28 = vmul.f32 %v56_v23, %v47_v19  ;;  %v60_v29 = vmul.f32 %v56_v23, %v48_v20  ;;  %v61_v30 = vmul.f32 %v56_v23, %v49_v21 }
  0x1b   :  { %v69_v36 = vmul.f32 %v104_v26, %v58_v27  ;;  %v70_v37 = vmul.f32 %v104_v26, %v59_v28  ;;  %v71_v38 = vmul.f32 %v104_v26, %v60_v29  ;;  %v72_v39 = vmul.f32 %v104_v26, %v61_v30 }
  0x1d   :  { %v80_v40 = vadd.f32 %v105_v31, %v69_v36  ;;  %v81_v41 = vadd.f32 %v105_v31, %v70_v37  ;;  %v82_v42 = vadd.f32 %v105_v31, %v71_v38  ;;  %v83_v43 = vadd.f32 %v105_v31, %v72_v39 }
  0x1f   :  { %v92_v44 = vadd.f32 %v116_v32, %v80_v40  ;;  %v93_v45 = vadd.f32 %v117_v33, %v81_v41  ;;  %v94_v46 = vadd.f32 %v120_v34, %v82_v42  ;;  %v95_v47 = vadd.f32 %v121_v35, %v83_v43 }
  0x21   :  { %96 = vst [vmem:[%s203_s6] sm:$0xff] %v92_v44  ;;  %97 = vst [vmem:[%s203_s6 + $0x8] sm:$0xff] %v93_v45 }
  0x22   :  { %98 = vst [vmem:[%s203_s6 + $0x10] sm:$0xff] %v94_v46  ;;  %99 = vst [vmem:[%s203_s6 + $0x18] sm:$0xff] %v95_v47 }

// kernel: cpcvqvae_forward.20
= control target key start
LH: loop header
LB: loop body
LE: loop exit
PB: predicated region body
PF: predicated region fallthrough
CT: control target
= control target key end

     0   :  { %v41_v5 = vlaneseq  ;;  %s226_s1 = inlined_call_operand.vmem [shape: f32[1,128], index: 1, kind: input, shape index: {}]   ;;  %s227_s2 = inlined_call_operand.vmem [shape: f32[1,128], index: 2, kind: input, shape index: {}]   ;;  %s228_s0 = inlined_call_operand.vmem [shape: bf16[32,128], index: 0, kind: input, shape index: {}]   ;;  %s229_s5 = inlined_call_operand.vmem [shape: bf16[32,128], index: 5, kind: input, shape index: {}]   ;;  %s230_s3 = inlined_call_operand.vmem [shape: f32[1,128], index: 3, kind: input, shape index: {}]   ;;  %s231_s4 = inlined_call_operand.vmem [shape: f32[1,128], index: 4, kind: input, shape index: {}]   ;;  %s232_s6 = inlined_call_operand.vmem [shape: bf16[32,128], index: 6, kind: output, shape index: {}]  }
   0x1   :  { %v23_v0 = vld [vmem:[%s226_s1] sm:$0x1]  ;;  %v156_v12 = vld [vmem:[%s228_s0 + $0x8] sm:$0xff]  }
   0x2   :  { %v25_v1 = vld [vmem:[%s227_s2] sm:$0x1]  ;;  %v27_v2 = vmul.f32 0.03125, %v23_v0  ;;  %v42_v8 = vshrl.u32 %v41_v5, 7  ;;  %v136_v16 = vunpack.c.l.bf16 %v156_v12  ;;  %v137_v17 = vunpack.c.h.bf16 %v156_v12  ;;  %v157_v25 = vld [vmem:[%s229_s5 + $0x8] sm:$0xff]  }
   0x3   :  { %v28_v3 = vmul.f32 0.03125, %v25_v1  ;;  %v131_v10 = vld [vmem:[%s228_s0] sm:$0xff]   ;;  %v144_v34 = vunpack.c.l.bf16 %v157_v25  ;;  %v145_v35 = vunpack.c.h.bf16 %v157_v25 }
   0x4   :  { %v29_v4 = vmul.f32 %v27_v2, %v27_v2  ;;  %v43_v11 = vsub.s32 0, %v42_v8  ;;  %v132_v13 = vunpack.c.l.bf16 %v131_v10  ;;  %v133_v14 = vunpack.c.h.bf16 %v131_v10  ;;  %v139_v24 = vld [vmem:[%s229_s5] sm:$0xff]  }
   0x5   :  { %v120_v26 = vld [vmem:[%s230_s3] ss:$0 sm:$0xff]  ;;  %v140_v32 = vunpack.c.l.bf16 %v139_v24  ;;  %v141_v33 = vunpack.c.h.bf16 %v139_v24 }
   0x6   :  { %v30_v6 = vsub.f32 %v28_v3, %v29_v4  ;;  %v44_v15 = vrot.slane %v27_v2, %v43_v11  ;;  %v121_v31 = vld [vmem:[%s231_s4] ss:$0 sm:$0xff] }
   0x8   :  { %v31_v7 = vmax.f32 %v30_v6, 0.0  ;;  %v46_v18 = vsub.f32 %v132_v13, %v44_v15  ;;  %v47_v19 = vsub.f32 %v133_v14, %v44_v15  ;;  %v48_v20 = vsub.f32 %v136_v16, %v44_v15 }
   0x9   :  { %v49_v21 = vsub.f32 %v137_v17, %v44_v15 }
   0xa   :  { %v50_v9 = vadd.f32 1e-05, %v31_v7 }
   0xc   :  { %159 = vrsqrt.f32 %v50_v9 }
  0x16   :  { %v160_v22 = vpop.eup %159 }
  0x17   :  { %v56_v23 = vrot.slane %v160_v22, %v43_v11 }
  0x19   :  { %v58_v27 = vmul.f32 %v56_v23, %v46_v18  ;;  %v59_v28 = vmul.f32 %v56_v23, %v47_v19  ;;  %v60_v29 = vmul.f32 %v56_v23, %v48_v20  ;;  %v61_v30 = vmul.f32 %v56_v23, %v49_v21 }
  0x1b   :  { %v69_v36 = vmul.f32 %v120_v26, %v58_v27  ;;  %v70_v37 = vmul.f32 %v120_v26, %v59_v28  ;;  %v71_v38 = vmul.f32 %v120_v26, %v60_v29  ;;  %v72_v39 = vmul.f32 %v120_v26, %v61_v30 }
  0x1d   :  { %v80_v40 = vadd.f32 %v121_v31, %v69_v36  ;;  %v81_v41 = vadd.f32 %v121_v31, %v70_v37  ;;  %v82_v42 = vadd.f32 %v121_v31, %v71_v38  ;;  %v83_v43 = vadd.f32 %v121_v31, %v72_v39 }
  0x1f   :  { %v92_v44 = vadd.f32 %v140_v32, %v80_v40  ;;  %v93_v45 = vadd.f32 %v141_v33, %v81_v41  ;;  %v94_v46 = vadd.f32 %v144_v34, %v82_v42  ;;  %v95_v47 = vadd.f32 %v145_v35, %v83_v43 }
  0x21   :  { %v149_v48 = vpack.c.bf16 %v93_v45, %v92_v44  ;;  %v154_v49 = vpack.c.bf16 %v95_v47, %v94_v46 }
  0x23   :  { %150 = vst [vmem:[%s232_s6] sm:$0xff] %v149_v48   ;;  %158 = vst [vmem:[%s232_s6 + $0x8] sm:$0xff] %v154_v49  }

// kernel: cpcvqvae_forward.19
= control target key start
LH: loop header
LB: loop body
LE: loop exit
PB: predicated region body
PF: predicated region fallthrough
CT: control target
= control target key end

     0   :  { %s355_s1 = inlined_call_operand.vmem [shape: bf16[128,128], index: 1, kind: input, shape index: {}]   ;;  %s356_s0 = inlined_call_operand.vmem [shape: bf16[32,128], index: 0, kind: input, shape index: {}]   ;;  %s357_s2 = inlined_call_operand.vmem [shape: f32[1,128], index: 2, kind: input, shape index: {}]   ;;  %s358_s3 = inlined_call_operand.vmem [shape: bf16[32,128], index: 3, kind: output, shape index: {0}]   ;;  %s359_s4 = inlined_call_operand.vmem [shape: f32[1,128], index: 4, kind: output, shape index: {1}]   ;;  %s360_s5 = inlined_call_operand.vmem [shape: f32[1,128], index: 5, kind: output, shape index: {2}]  }
   0x1   :  { %v270_v0 = vld [vmem:[%s355_s1] sm:$0xff]   ;;  %v271_v1 = vld [vmem:[%s355_s1 + $0x8] sm:$0xff]   ;;  %v272_v2 = vld [vmem:[%s355_s1 + $0x10] sm:$0xff]  }
   0x2   :  { %250 = vmatprep.subr.bf16.mxu0 %v270_v0  ;;  %v273_v3 = vld [vmem:[%s355_s1 + $0x18] sm:$0xff]   ;;  %v278_v4 = vld [vmem:[%s356_s0] sm:$0xff]   ;;  %v275_v6 = vld [vmem:[%s355_s1 + $0x28] sm:$0xff]  }
   0x3   :  { %251 = vmatpush3.bf16.msra.mxu0 %v270_v0  ;;  %266 = vmatprep.mubr.bf16.mxu0 %v278_v4  ;;  %v274_v5 = vld [vmem:[%s355_s1 + $0x20] sm:$0xff]   ;;  %v276_v7 = vld [vmem:[%s355_s1 + $0x30] sm:$0xff]   ;;  %v277_v8 = vld [vmem:[%s355_s1 + $0x38] sm:$0xff]  }
   0x4   :  { %252 = vmatprep.subr.bf16.mxu0 %v271_v1  ;;  %v279_v9 = vld [vmem:[%s356_s0 + $0x8] sm:$0xff]   ;;  %v210_v10 = vld [vmem:[%s357_s2] ss:$0 sm:$0xff] }
   0x7   :  { %253 = vmatpush3.bf16.msra.mxu0 %v271_v1 }
   0x8   :  { %254 = vmatprep.subr.bf16.mxu0 %v272_v2 }
   0xb   :  { %255 = vmatpush3.bf16.msra.mxu0 %v272_v2 }
   0xc   :  { %256 = vmatprep.subr.bf16.mxu0 %v273_v3 }
   0xf   :  { %257 = vmatpush3.bf16.msra.mxu0 %v273_v3 }
  0x10   :  { %258 = vmatprep.subr.bf16.mxu0 %v274_v5 }
  0x13   :  { %259 = vmatpush3.bf16.msra.mxu0 %v274_v5 }
  0x14   :  { %260 = vmatprep.subr.bf16.mxu0 %v275_v6 }
  0x17   :  { %261 = vmatpush3.bf16.msra.mxu0 %v275_v6 }
  0x18   :  { %262 = vmatprep.subr.bf16.mxu0 %v276_v7 }
  0x1b   :  { %263 = vmatpush3.bf16.msra.mxu0 %v276_v7 }
  0x1c   :  { %264 = vmatprep.subr.bf16.mxu0 %v277_v8 }
  0x1f   :  { %265 = vmatpush3.bf16.msra.mxu0 %v277_v8 }
  0x22   :  { %267 = vmatmul.mubr.bf16.vlgmr.msra.gmra.mrb[0].mxu0 %v279_v9 }
  0xf5   :  { %v268_v11 = vpop.f32.mrb[0].mxu0 }
  0xf6   :  { %v139_v12 = vpop.f32.mrb[1].mxu0  ;;  %v148_v15 = vadd.f32 %v268_v11, %v210_v10 }
  0xf7   :  { %v140_v13 = vadd.f32 %v210_v10, %v139_v12  ;;  %v269_v14 = vpop.f32.mrb[2].mxu0 }
  0xf8   :  { %v151_v16 = vadd.f32 %v269_v14, %v210_v10  ;;  %v142_v17 = vpop.f32.mrb[3].mxu0  ;;  %v166_v24 = vmul.f32 %v148_v15, %v148_v15 }
  0xf9   :  { %v143_v18 = vadd.f32 %v210_v10, %v142_v17  ;;  %v164_v20 = vmul.f32 %v140_v13, %v140_v13 }
  0xfa   :  { %v237_v19 = vpack.c.bf16 %v151_v16, %v148_v15  ;;  %v167_v27 = vmul.f32 %v151_v16, %v151_v16 }
  0xfb   :  { %v154_v21 = vadd.f32 %v143_v18, %v140_v13  ;;  %v165_v22 = vmul.f32 %v143_v18, %v143_v18  ;;  %v232_v23 = vpack.c.bf16 %v143_v18, %v140_v13 }
  0xfc   :  { %239 = vst [vmem:[%s358_s3 + $0x8] sm:$0xff] %v237_v19  }
  0xfd   :  { %v155_v25 = vadd.f32 %v154_v21, %v148_v15  ;;  %v168_v26 = vadd.f32 %v165_v22, %v164_v20  ;;  %233 = vst [vmem:[%s358_s3] sm:$0xff] %v232_v23  }
  0xff   :  { %v156_v28 = vadd.f32 %v155_v25, %v151_v16  ;;  %v169_v29 = vadd.f32 %v168_v26, %v166_v24 }
 0x101   :  { %v157_v30 = vrot.slane %v156_v28, 4  ;;  %v170_v31 = vadd.f32 %v169_v29, %v167_v27 }
 0x103   :  { %v158_v32 = vadd.f32 %v157_v30, %v156_v28  ;;  %v171_v33 = vrot.slane %v170_v31, 4 }
 0x105   :  { %v159_v34 = vrot.slane %v158_v32, 2  ;;  %v172_v35 = vadd.f32 %v171_v33, %v170_v31 }
 0x107   :  { %v160_v36 = vadd.f32 %v159_v34, %v158_v32  ;;  %v173_v37 = vrot.slane %v172_v35, 2 }
 0x109   :  { %v161_v38 = vrot.slane %v160_v36, 1  ;;  %v174_v39 = vadd.f32 %v173_v37, %v172_v35 }
 0x10b   :  { %v162_v40 = vadd.f32 %v161_v38, %v160_v36  ;;  %v175_v41 = vrot.slane %v174_v39, 1 }
 0x10d   :  { %163 = vst [vmem:[%s359_s4] sm:$0x1] %v162_v40  ;;  %v176_v42 = vadd.f32 %v175_v41, %v174_v39 }
 0x10f   :  { %177 = vst [vmem:[%s360_s5] sm:$0x1] %v176_v42 }

// kernel: cpcvqvae_forward.25
= control target key start
LH: loop header
LB: loop body
LE: loop exit
PB: predicated region body
PF: predicated region fallthrough
CT: control target
= control target key end

     0   :  { %v149_v27 = vlaneseq  ;;  %vm223_vm8 = vcmask 7168   ;;  %s354_s1 = inlined_call_operand.vmem [shape: bf16[128,128], index: 1, kind: input, shape index: {}]   ;;  %s355_s0 = inlined_call_operand.vmem [shape: f32[32,128], index: 0, kind: input, shape index: {}]   ;;  %s356_s2 = inlined_call_operand.vmem [shape: f32[1,128], index: 2, kind: input, shape index: {}]   ;;  %s357_s3 = inlined_call_operand.vmem [shape: s32[32,1], index: 3, kind: output, shape index: {}]  }
   0x1   :  { %v271_v0 = vld [vmem:[%s354_s1] sm:$0xff]   ;;  %v272_v1 = vld [vmem:[%s354_s1 + $0x8] sm:$0xff]   ;;  %v273_v2 = vld [vmem:[%s354_s1 + $0x10] sm:$0xff]  }
   0x2   :  { %251 = vmatprep.subr.bf16.mxu0 %v271_v0  ;;  %v274_v3 = vld [vmem:[%s354_s1 + $0x18] sm:$0xff]   ;;  %v15_v4 = vld [vmem:[%s355_s0] sm:$0xff]  ;;  %v16_v5 = vld [vmem:[%s355_s0 + $0x8] sm:$0xff]  ;;  %v150_v28 = vand.u32 127, %v149_v27 }
   0x3   :  { %252 = vmatpush3.bf16.msra.mxu0 %v271_v0  ;;  %v19_v6 = vpack.c.bf16 %v16_v5, %v15_v4  ;;  %v275_v7 = vld [vmem:[%s354_s1 + $0x20] sm:$0xff]   ;;  %v276_v8 = vld [vmem:[%s354_s1 + $0x28] sm:$0xff]   ;;  %v277_v9 = vld [vmem:[%s354_s1 + $0x30] sm:$0xff]  }
   0x4   :  { %253 = vmatprep.subr.bf16.mxu0 %v272_v1  ;;  %v278_v10 = vld [vmem:[%s354_s1 + $0x38] sm:$0xff]   ;;  %v17_v11 = vld [vmem:[%s355_s0 + $0x10] sm:$0xff]  ;;  %v240_v15 = vld [vmem:[%s356_s2] ss:$0 sm:$0xff] }
   0x5   :  { %267 = vmatprep.mubr.bf16.mxu0 %v19_v6  ;;  %v18_v12 = vld [vmem:[%s355_s0 + $0x18] sm:$0xff] }
   0x6   :  { %v20_v13 = vpack.c.bf16 %v18_v12, %v17_v11 }
   0x7   :  { %254 = vmatpush3.bf16.msra.mxu0 %v272_v1 }
   0x8   :  { %255 = vmatprep.subr.bf16.mxu0 %v273_v2 }
   0xb   :  { %256 = vmatpush3.bf16.msra.mxu0 %v273_v2 }
   0xc   :  { %257 = vmatprep.subr.bf16.mxu0 %v274_v3 }
   0xf   :  { %258 = vmatpush3.bf16.msra.mxu0 %v274_v3 }
  0x10   :  { %259 = vmatprep.subr.bf16.mxu0 %v275_v7 }
  0x13   :  { %260 = vmatpush3.bf16.msra.mxu0 %v275_v7 }
  0x14   :  { %261 = vmatprep.subr.bf16.mxu0 %v276_v8 }
  0x17   :  { %262 = vmatpush3.bf16.msra.mxu0 %v276_v8 }
  0x18   :  { %263 = vmatprep.subr.bf16.mxu0 %v277_v9 }
  0x1b   :  { %264 = vmatpush3.bf16.msra.mxu0 %v277_v9 }
  0x1c   :  { %265 = vmatprep.subr.bf16.mxu0 %v278_v10 }
  0x1f   :  { %266 = vmatpush3.bf16.msra.mxu0 %v278_v10 }
  0x22   :  { %268 = vmatmul.mubr.bf16.vlgmr.msra.gmra.mrb[0].mxu0 %v20_v13 }
  0xf5   :  { %v269_v14 = vpop.f32.mrb[0].mxu0 }
  0xf6   :  { %v137_v16 = vmul.f32 2.0, %v269_v14  ;;  %v120_v17 = vpop.f32.mrb[1].mxu0 }
  0xf7   :  { %v135_v18 = vmul.f32 2.0, %v120_v17  ;;  %v270_v19 = vpop.f32.mrb[2].mxu0 }
  0xf8   :  { %v138_v20 = vmul.f32 2.0, %v270_v19  ;;  %v123_v21 = vpop.f32.mrb[3].mxu0  ;;  %v147_v22 = vsub.f32 %v240_v15, %v137_v16 }
  0xf9   :  { %v136_v23 = vmul.f32 2.0, %v123_v21  ;;  %v145_v24 = vsub.f32 %v240_v15, %v135_v18 }
  0xfa   :  { %155 = vmin.xlane.f32.xlu1 %v147_v22  ;;  %v148_v25 = vsub.f32 %v240_v15, %v138_v20 }
  0xfb   :  { %151 = vmin.xlane.f32.xlu0 %v145_v24  ;;  %v146_v26 = vsub.f32 %v240_v15, %v136_v23 }
  0xfe   :  { %157 = vmin.xlane.f32.xlu1 %v148_v25 }
  0xff   :  { %153 = vmin.xlane.f32.xlu0 %v146_v26 }
 0x187   :  { %v156_v29 = vpop.xlane.xlu1 %155 }
 0x188   :  { %vm161_vm0 = vcmp.le.f32.partialorder %v147_v22, %v156_v29  ;;  %v152_v30 = vpop.xlane.xlu0 %151 }
 0x189   :  { %vm159_vm1 = vcmp.le.f32.partialorder %v145_v24, %v152_v30  ;;  %v165_v31 = vsel %vm161_vm0, %v150_v28, 128 }
 0x18a   :  { %v163_v32 = vsel %vm159_vm1, %v150_v28, 128  ;;  %v196_v37 = vshra.s32 %v165_v31, 16  ;;  %v195_v46 = vand.u32 65535, %v165_v31 }
 0x18b   :  { %v158_v33 = vpop.xlane.xlu1 %157  ;;  %v168_v34 = vshra.s32 %v163_v32, 16  ;;  %v167_v45 = vand.u32 65535, %v163_v32 }
 0x18c   :  { %vm162_vm2 = vcmp.le.f32.partialorder %v148_v25, %v158_v33  ;;  %v154_v35 = vpop.xlane.xlu0 %153  ;;  %v198_v41 = vcvt.s32.f32 %v196_v37  ;;  %v197_v55 = vcvt.s32.f32 %v195_v46 }
 0x18d   :  { %vm160_vm3 = vcmp.le.f32.partialorder %v146_v26, %v154_v35  ;;  %v170_v36 = vcvt.s32.f32 %v168_v34  ;;  %v166_v38 = vsel %vm162_vm2, %v150_v28, 128  ;;  %v169_v49 = vcvt.s32.f32 %v167_v45 }
 0x18e   :  { %v164_v39 = vsel %vm160_vm3, %v150_v28, 128  ;;  %v210_v43 = vshra.s32 %v166_v38, 16  ;;  %v209_v51 = vand.u32 65535, %v166_v38 }
 0x18f   :  { %171 = vmin.xlane.f32.xlu0 %v170_v36  ;;  %v182_v40 = vshra.s32 %v164_v39, 16  ;;  %v181_v47 = vand.u32 65535, %v164_v39 }
 0x190   :  { %v212_v44 = vcvt.s32.f32 %v210_v43  ;;  %v211_v59 = vcvt.s32.f32 %v209_v51 }
 0x191   :  { %v184_v42 = vcvt.s32.f32 %v182_v40  ;;  %v183_v54 = vcvt.s32.f32 %v181_v47 }
 0x193   :  { %199 = vmin.xlane.f32.xlu0 %v198_v41  ;;  %185 = vmin.xlane.f32.xlu1 %v184_v42 }
 0x197   :  { %213 = vmin.xlane.f32.xlu1 %v212_v44 }
 0x21c   :  { %v172_v48 = vpop.xlane.xlu0 %171 }
 0x21d   :  { %vm173_vm4 = vcmp.eq.f32.partialorder %v170_v36, %v172_v48  ;;  %v178_v61 = vcvt.f32.s32 %v172_v48 }
 0x21e   :  { %v174_v50 = vsel %vm173_vm4, %v169_v49, inf }
 0x21f   :  { %175 = vmin.xlane.f32.xlu0 %v174_v50  ;;  %v179_v0 = vshll.u32 %v178_v61, 16 }
 0x220   :  { %v186_v52 = vpop.xlane.xlu1 %185  ;;  %v200_v53 = vpop.xlane.xlu0 %199 }
 0x221   :  { %vm187_vm5 = vcmp.eq.f32.partialorder %v184_v42, %v186_v52  ;;  %vm201_vm6 = vcmp.eq.f32.partialorder %v198_v41, %v200_v53  ;;  %v192_v62 = vcvt.f32.s32 %v186_v52  ;;  %v206_v1 = vcvt.f32.s32 %v200_v53 }
 0x222   :  { %v188_v56 = vsel %vm187_vm5, %v183_v54, inf  ;;  %v202_v57 = vsel %vm201_vm6, %v197_v55, inf }
 0x223   :  { %189 = vmin.xlane.f32.xlu1 %v188_v56  ;;  %203 = vmin.xlane.f32.xlu0 %v202_v57  ;;  %v193_v4 = vshll.u32 %v192_v62, 16  ;;  %v207_v7 = vshll.u32 %v206_v1, 16 }
 0x224   :  { %v214_v58 = vpop.xlane.xlu1 %213 }
 0x225   :  { %vm215_vm7 = vcmp.eq.f32.partialorder %v212_v44, %v214_v58  ;;  %v220_v8 = vcvt.f32.s32 %v214_v58 }
 0x226   :  { %v216_v60 = vsel %vm215_vm7, %v211_v59, inf }
 0x227   :  { %217 = vmin.xlane.f32.xlu1 %v216_v60  ;;  %v221_v14 = vshll.u32 %v220_v8, 16 }
 0x2ac   :  { %v176_v63 = vpop.xlane.xlu0 %175 }
 0x2ad   :  { %v177_v2 = vcvt.f32.s32 %v176_v63 }
 0x2af   :  { %v180_v3 = vadd.s32 %v179_v0, %v177_v2 }
 0x2b0   :  { %v190_v5 = vpop.xlane.xlu1 %189  ;;  %v204_v6 = vpop.xlane.xlu0 %203 }
 0x2b1   :  { %224 = vst.msk [vmem:[%s357_s3] sm:$0xff] %vm223_vm8, %v180_v3  ;;  %v191_v9 = vcvt.f32.s32 %v190_v5  ;;  %v205_v10 = vcvt.f32.s32 %v204_v6 }
 0x2b3   :  { %v194_v11 = vadd.s32 %v193_v4, %v191_v9  ;;  %v208_v12 = vadd.s32 %v207_v7, %v205_v10 }
 0x2b4   :  { %v218_v13 = vpop.xlane.xlu1 %217 }
 0x2b5   :  { %225 = vst.msk [vmem:[%s357_s3 + $0x8] sm:$0xff] %vm223_vm8, %v194_v11  ;;  %226 = vst.msk [vmem:[%s357_s3 + $0x10] sm:$0xff] %vm223_vm8, %v208_v12  ;;  %v219_v15 = vcvt.f32.s32 %v218_v13 }
 0x2b7   :  { %v222_v16 = vadd.s32 %v221_v14, %v219_v15 }
 0x2b9   :  { %227 = vst.msk [vmem:[%s357_s3 + $0x18] sm:$0xff] %vm223_vm8, %v222_v16 }

// kernel: cpcvqvae_forward.26
= control target key start
LH: loop header
LB: loop body
LE: loop exit
PB: predicated region body
PF: predicated region fallthrough
CT: control target
= control target key end

     0   :  { %v384_v0 = vmov 0.0   ;;  %vm385_vm0 = vmmov 0   ;;  %v386_v3 = vmov 0   ;;  %v51_v27 = vlaneseq  ;;  %s503_s1 = inlined_call_operand.vmem [shape: bf16[128,384], index: 1, kind: input, shape index: {}]   ;;  %s504_s0 = inlined_call_operand.vmem [shape: bf16[16,128], index: 0, kind: input, shape index: {}]   ;;  %s505_s2 = inlined_call_operand.vmem [shape: f32[1,384], index: 2, kind: input, shape index: {}]   ;;  %s506_s3 = inlined_call_operand.vmem [shape: f32[16,384], index: 3, kind: output, shape index: {}]  }
   0x1   :  { %328 = vmatprep.subr.bf16.mxu1 %v384_v0  ;;  %v351_v1 = vld [vmem:[%s503_s1 + $0x4] ss:$12 sps:$4 sm:$0xff]   ;;  %344 = vmatprep.mubr.msk.bf16.mxu1 %vm385_vm0, %v384_v0  ;;  %v353_v2 = vld [vmem:[%s503_s1 + $0x8] ss:$12 sps:$4 sm:$0xff]   ;;  %v354_v4 = vld [vmem:[%s503_s1] ss:$12 sps:$4 sm:$0xff]  }
   0x2   :  { %232 = vmatprep.mubr.bf16.mxu0 %v386_v3  ;;  %200 = vmatprep.subr.bf16.mxu0 %v351_v1  ;;  %v355_v5 = vld [vmem:[%s503_s1 + $0x1c] ss:$12 sps:$4 sm:$0xff]   ;;  %v357_v6 = vld [vmem:[%s503_s1 + $0x20] ss:$12 sps:$4 sm:$0xff]   ;;  %v358_v7 = vld [vmem:[%s503_s1 + $0x18] ss:$12 sps:$4 sm:$0xff]  }
   0x3   :  { %329 = vmatpush3.bf16.msra.mxu1 %v353_v2  ;;  %201 = vmatpush1.bf16.msra.mxu0 %v354_v4  ;;  %v359_v8 = vld [vmem:[%s503_s1 + $0x34] ss:$12 sps:$4 sm:$0xff]   ;;  %v361_v9 = vld [vmem:[%s503_s1 + $0x38] ss:$12 sps:$4 sm:$0xff]   ;;  %v362_v10 = vld [vmem:[%s503_s1 + $0x30] ss:$12 sps:$4 sm:$0xff]  }
   0x4   :  { %330 = vmatprep.subr.bf16.mxu1 %v384_v0  ;;  %202 = vmatprep.subr.bf16.mxu0 %v355_v5  ;;  %v363_v11 = vld [vmem:[%s503_s1 + $0x4c] ss:$12 sps:$4 sm:$0xff]   ;;  %v365_v12 = vld [vmem:[%s503_s1 + $0x50] ss:$12 sps:$4 sm:$0xff]   ;;  %v366_v13 = vld [vmem:[%s503_s1 + $0x48] ss:$12 sps:$4 sm:$0xff]  }
   0x5   :  { %v367_v14 = vld [vmem:[%s503_s1 + $0x64] ss:$12 sps:$4 sm:$0xff]   ;;  %v369_v15 = vld [vmem:[%s503_s1 + $0x68] ss:$12 sps:$4 sm:$0xff]   ;;  %v370_v16 = vld [vmem:[%s503_s1 + $0x60] ss:$12 sps:$4 sm:$0xff]  }
   0x6   :  { %v371_v17 = vld [vmem:[%s503_s1 + $0x7c] ss:$12 sps:$4 sm:$0xff]   ;;  %v373_v18 = vld [vmem:[%s503_s1 + $0x80] ss:$12 sps:$4 sm:$0xff]   ;;  %v374_v19 = vld [vmem:[%s503_s1 + $0x78] ss:$12 sps:$4 sm:$0xff]  }
   0x7   :  { %331 = vmatpush3.bf16.msra.mxu1 %v357_v6  ;;  %203 = vmatpush1.bf16.msra.mxu0 %v358_v7  ;;  %v375_v20 = vld [vmem:[%s503_s1 + $0x94] ss:$12 sps:$4 sm:$0xff]   ;;  %v377_v21 = vld [vmem:[%s503_s1 + $0x98] ss:$12 sps:$4 sm:$0xff]   ;;  %v378_v22 = vld [vmem:[%s503_s1 + $0x90] ss:$12 sps:$4 sm:$0xff]  }
   0x8   :  { %332 = vmatprep.subr.bf16.mxu1 %v384_v0  ;;  %204 = vmatprep.subr.bf16.mxu0 %v359_v8  ;;  %v379_v23 = vld [vmem:[%s503_s1 + $0xac] ss:$12 sps:$4 sm:$0xff]   ;;  %v381_v24 = vld [vmem:[%s503_s1 + $0xb0] ss:$12 sps:$4 sm:$0xff]   ;;  %v382_v25 = vld [vmem:[%s503_s1 + $0xa8] ss:$12 sps:$4 sm:$0xff]  }
   0x9   :  { %v383_v26 = vld [vmem:[%s504_s0] sm:$0xff]   ;;  %v52_v28 = vshrl.u32 %v51_v27, 7 }
   0xa   :  { %v49_v30 = vld [vmem:[%s505_s2] sm:$0x7] }
   0xb   :  { %333 = vmatpush3.bf16.msra.mxu1 %v361_v9  ;;  %205 = vmatpush1.bf16.msra.mxu0 %v362_v10  ;;  %v61_v29 = vsub.s32 2, %v52_v28  ;;  %v53_v31 = vsub.s32 0, %v52_v28  ;;  %v57_v32 = vsub.s32 1, %v52_v28 }
   0xc   :  { %334 = vmatprep.subr.bf16.mxu1 %v384_v0  ;;  %206 = vmatprep.subr.bf16.mxu0 %v363_v11 }
   0xd   :  { %v62_v33 = vrot.slane %v49_v30, %v61_v29  ;;  %v54_v34 = vrot.slane %v49_v30, %v53_v31  ;;  %v58_v35 = vrot.slane %v49_v30, %v57_v32 }
   0xf   :  { %335 = vmatpush3.bf16.msra.mxu1 %v365_v12  ;;  %207 = vmatpush1.bf16.msra.mxu0 %v366_v13 }
  0x10   :  { %336 = vmatprep.subr.bf16.mxu1 %v384_v0  ;;  %208 = vmatprep.subr.bf16.mxu0 %v367_v14 }
  0x13   :  { %337 = vmatpush3.bf16.msra.mxu1 %v369_v15  ;;  %209 = vmatpush1.bf16.msra.mxu0 %v370_v16 }
  0x14   :  { %338 = vmatprep.subr.bf16.mxu1 %v384_v0  ;;  %210 = vmatprep.subr.bf16.mxu0 %v371_v17 }
  0x17   :  { %339 = vmatpush3.bf16.msra.mxu1 %v373_v18  ;;  %211 = vmatpush1.bf16.msra.mxu0 %v374_v19 }
  0x18   :  { %340 = vmatprep.subr.bf16.mxu1 %v384_v0  ;;  %212 = vmatprep.subr.bf16.mxu0 %v375_v20 }
  0x1b   :  { %341 = vmatpush3.bf16.msra.mxu1 %v377_v21  ;;  %213 = vmatpush1.bf16.msra.mxu0 %v378_v22 }
  0x1c   :  { %342 = vmatprep.subr.bf16.mxu1 %v384_v0  ;;  %214 = vmatprep.subr.bf16.mxu0 %v379_v23 }
  0x1f   :  { %343 = vmatpush3.bf16.msra.mxu1 %v381_v24  ;;  %215 = vmatpush1.bf16.msra.mxu0 %v382_v25 }
  0x22   :  { %345 = vmatmul.mubr.bf16.vlgmr.msra.gmra.mrb[0].mxu1 %v383_v26  ;;  %233 = vmatmul.mubr.bf16.vlgmr.msra.gmra.mrb[0].mxu0 %v383_v26 }
  0xf5   :  { %v277_v36 = vpop.f32.mrb[0].mxu1  ;;  %v234_v38 = vpop.f32.mrb[0].mxu0 }
  0xf6   :  { %v278_v37 = vadd.f32 %v277_v36, %v62_v33  ;;  %v346_v39 = vpop.f32.mrb[1].mxu1  ;;  %v235_v40 = vadd.f32 %v234_v38, %v54_v34  ;;  %v236_v41 = vpop.f32.mrb[1].mxu0 }
  0xf7   :  { %v280_v42 = vpop.f32.mrb[2].mxu1  ;;  %v237_v43 = vadd.f32 %v236_v41, %v58_v35  ;;  %v238_v45 = vpop.f32.mrb[2].mxu0 }
  0xf8   :  { %286 = vst [vmem:[%s506_s3 + $0x10] sm:$0xff] %v278_v37  ;;  %v281_v44 = vadd.f32 %v280_v42, %v62_v33  ;;  %v347_v46 = vpop.f32.mrb[3].mxu1  ;;  %284 = vst [vmem:[%s506_s3] sm:$0xff] %v235_v40  ;;  %v239_v47 = vadd.f32 %v238_v45, %v54_v34  ;;  %v240_v48 = vpop.f32.mrb[3].mxu0 }
  0xf9   :  { %285 = vst [vmem:[%s506_s3 + $0x8] sm:$0xff] %v237_v43  ;;  %v241_v49 = vadd.f32 %v240_v48, %v58_v35 }
  0xfa   :  { %289 = vst [vmem:[%s506_s3 + $0x28] sm:$0xff] %v281_v44  ;;  %287 = vst [vmem:[%s506_s3 + $0x18] sm:$0xff] %v239_v47 }
  0xfb   :  { %288 = vst [vmem:[%s506_s3 + $0x20] sm:$0xff] %v241_v49 }

// kernel: cpcvqvae_forward.27
= control target key start
LH: loop header
LB: loop body
LE: loop exit
PB: predicated region body
PF: predicated region fallthrough
CT: control target
= control target key end

     0   :  { %14 = vsyncpa [#allocation3], 0  ;;  %v2323_v2 = vmov 0.0   ;;  %v2324_v3 = vmov 0   ;;  %vm2325_vm0 = vmmov 0   ;;  %s3152_s0 = inlined_call_operand.vmem [shape: f32[8,8,384], index: 0, kind: input, shape index: {}]   ;;  %s3153_s1 = inlined_call_operand.vmem [shape: f32[8,128], index: 1, kind: input, shape index: {}]   ;;  %s3154_s2 = inlined_call_operand.vmem [shape: bf16[128,384], index: 2, kind: input, shape index: {}]   ;;  %s3155_s3 = inlined_call_operand.vmem [shape: f32[1,384], index: 3, kind: input, shape index: {}]   ;;  %s3156_s4 = inlined_call_operand.vmem [shape: bf16[4,2,128], index: 4, kind: input, shape index: {}]   ;;  %s3157_s5 = inlined_call_operand.vmem [shape: bf16[128,512], index: 5, kind: input, shape index: {}]   ;;  %s3158_s6 = inlined_call_operand.vmem [shape: f32[1,512], index: 6, kind: input, shape index: {}]   ;;  %s3159_s7 = inlined_call_operand.hbm [shape: f32[1,1], index: 7, kind: output, shape index: {0}]   ;;  %s3160_s8 = inlined_call_operand.hbm [shape: f32[1,1], index: 8, kind: output, shape index: {1}]  }
   0x1   :  { %v2376_v0 = vld [vmem:[%s3154_s2 + $0x4] ss:$12 sps:$4 sm:$0xff]   ;;  %v2381_v1 = vld [vmem:[%s3154_s2] ss:$12 sps:$4 sm:$0xff]   ;;  %1879 = vmatprep.subr.bf16.mxu1 %v2323_v2  ;;  %245 = vmatprep.mubr.bf16.mxu0 %v2324_v3  ;;  %v2389_v4 = vld [vmem:[%s3154_s2 + $0x1c] ss:$12 sps:$4 sm:$0xff]  }
   0x2   :  { %213 = vmatprep.subr.bf16.mxu0 %v2376_v0  ;;  %1895 = vmatprep.mubr.msk.bf16.mxu1 %vm2325_vm0, %v2323_v2  ;;  %v2397_v5 = vld [vmem:[%s3154_s2 + $0x18] ss:$12 sps:$4 sm:$0xff]   ;;  %v2403_v6 = vld [vmem:[%s3154_s2 + $0x34] ss:$12 sps:$4 sm:$0xff]   ;;  %v2409_v7 = vld [vmem:[%s3154_s2 + $0x30] ss:$12 sps:$4 sm:$0xff]  }
   0x3   :  { %214 = vmatpush1.bf16.msra.mxu0 %v2381_v1  ;;  %v2415_v8 = vld [vmem:[%s3154_s2 + $0x4c] ss:$12 sps:$4 sm:$0xff]   ;;  %v2420_v9 = vld [vmem:[%s3154_s2 + $0x8] ss:$12 sps:$4 sm:$0xff]   ;;  %v2432_v11 = vld [vmem:[%s3154_s2 + $0x64] ss:$12 sps:$4 sm:$0xff]  }
   0x4   :  { %215 = vmatprep.subr.bf16.mxu0 %v2389_v4  ;;  %v2426_v10 = vld [vmem:[%s3154_s2 + $0x48] ss:$12 sps:$4 sm:$0xff]   ;;  %1880 = vmatpush3.bf16.msra.mxu1 %v2420_v9  ;;  %v2438_v12 = vld [vmem:[%s3154_s2 + $0x20] ss:$12 sps:$4 sm:$0xff]   ;;  %v2457_v15 = vld [vmem:[%s3154_s2 + $0x38] ss:$12 sps:$4 sm:$0xff]  }
   0x5   :  { %1881 = vmatprep.subr.bf16.mxu1 %v2323_v2  ;;  %v2444_v13 = vld [vmem:[%s3154_s2 + $0x60] ss:$12 sps:$4 sm:$0xff]   ;;  %v2450_v14 = vld [vmem:[%s3154_s2 + $0x7c] ss:$12 sps:$4 sm:$0xff]   ;;  %v2463_v16 = vld [vmem:[%s3154_s2 + $0x78] ss:$12 sps:$4 sm:$0xff]  }
   0x6   :  { %v2469_v17 = vld [vmem:[%s3154_s2 + $0x94] ss:$12 sps:$4 sm:$0xff]   ;;  %v2474_v18 = vld [vmem:[%s3154_s2 + $0x50] ss:$12 sps:$4 sm:$0xff]   ;;  %v2487_v20 = vld [vmem:[%s3154_s2 + $0xac] ss:$12 sps:$4 sm:$0xff]  }
   0x7   :  { %216 = vmatpush1.bf16.msra.mxu0 %v2397_v5  ;;  %v2481_v19 = vld [vmem:[%s3154_s2 + $0x90] ss:$12 sps:$4 sm:$0xff]   ;;  %v2492_v21 = vld [vmem:[%s3154_s2 + $0x68] ss:$12 sps:$4 sm:$0xff]   ;;  %v2505_v23 = vld [vmem:[%s3153_s1] sm:$0xff] }
   0x8   :  { %217 = vmatprep.subr.bf16.mxu0 %v2403_v6  ;;  %1882 = vmatpush3.bf16.msra.mxu1 %v2438_v12  ;;  %v2500_v22 = vld [vmem:[%s3154_s2 + $0xa8] ss:$12 sps:$4 sm:$0xff]   ;;  %v2511_v24 = vld [vmem:[%s3154_s2 + $0x80] ss:$12 sps:$4 sm:$0xff]   ;;  %v68_v25 = vpack.c.bf16 %v2505_v23, %v2505_v23 }
   0x9   :  { %1883 = vmatprep.subr.bf16.mxu1 %v2323_v2 }
   0xb   :  { %218 = vmatpush1.bf16.msra.mxu0 %v2409_v7 }
   0xc   :  { %219 = vmatprep.subr.bf16.mxu0 %v2415_v8  ;;  %1884 = vmatpush3.bf16.msra.mxu1 %v2457_v15 }
   0xd   :  { %1885 = vmatprep.subr.bf16.mxu1 %v2323_v2 }
   0xf   :  { %220 = vmatpush1.bf16.msra.mxu0 %v2426_v10 }
  0x10   :  { %221 = vmatprep.subr.bf16.mxu0 %v2432_v11  ;;  %1886 = vmatpush3.bf16.msra.mxu1 %v2474_v18 }
  0x11   :  { %1887 = vmatprep.subr.bf16.mxu1 %v2323_v2 }
  0x13   :  { %222 = vmatpush1.bf16.msra.mxu0 %v2444_v13 }
  0x14   :  { %223 = vmatprep.subr.bf16.mxu0 %v2450_v14  ;;  %1888 = vmatpush3.bf16.msra.mxu1 %v2492_v21 }
  0x15   :  { %1889 = vmatprep.subr.bf16.mxu1 %v2323_v2 }
  0x17   :  { %224 = vmatpush1.bf16.msra.mxu0 %v2463_v16 }
  0x18   :  { %225 = vmatprep.subr.bf16.mxu0 %v2469_v17 }
  0x1b   :  { %226 = vmatpush1.bf16.msra.mxu0 %v2481_v19 }
  0x1c   :  { %227 = vmatprep.subr.bf16.mxu0 %v2487_v20 }
  0x1d   :  { %15 = vsyncpa [#allocation5], 0  ;;  %1890 = vmatpush3.bf16.msra.mxu1 %v2511_v24  ;;  %v2524_v26 = vld [vmem:[%s3154_s2 + $0x98] ss:$12 sps:$4 sm:$0xff]   ;;  %v2534_v27 = vld [vmem:[%s3154_s2 + $0xb0] ss:$12 sps:$4 sm:$0xff]   ;;  %v70_v28 = vlaneseq }
  0x1e   :  { %1891 = vmatprep.subr.bf16.mxu1 %v2323_v2  ;;  %v63_v31 = vld [vmem:[%s3155_s3] sm:$0x7]  ;;  %v66_v42 = vld [vmem:[%s3152_s0 + $0x8] sm:$0xff]  ;;  %v67_v59 = vld [vmem:[%s3152_s0 + $0x10] sm:$0xff]  ;;  %vm1410_vm1 = vcmask 9216   ;;  %vm1664_vm7 = vcmask 15360  }
  0x1f   :  { %228 = vmatpush1.bf16.msra.mxu0 %v2500_v22  ;;  %v2573_v29 = vshrl.u32 %v70_v28, 7  ;;  %v65_v35 = vld [vmem:[%s3152_s0] sm:$0xff]  ;;  %vm1669_vm9 = vcmask 0  }
  0x20   :  { %320 = vmatprep.subr.bf16.mxu0 %v2376_v0 }
  0x21   :  { %1892 = vmatpush3.bf16.msra.mxu1 %v2524_v26  ;;  %v72_v30 = vsub.s32 0, %v2573_v29  ;;  %v76_v32 = vsub.s32 1, %v2573_v29  ;;  %v80_v53 = vsub.s32 2, %v2573_v29 }
  0x22   :  { %246 = vmatmul.mubr.bf16.vlgmr.msra.gmra.mrb[0].mxu0 %v68_v25  ;;  %1893 = vmatprep.subr.bf16.mxu1 %v2323_v2 }
  0x23   :  { %321 = vmatpush1.bf16.msra.mxu0 %v2381_v1  ;;  %352 = vmatprep.mubr.bf16.mxu0 %v2324_v3  ;;  %v2582_v33 = vrot.slane %v63_v31, %v72_v30  ;;  %v2586_v34 = vrot.slane %v63_v31, %v76_v32  ;;  %v2599_v54 = vrot.slane %v63_v31, %v80_v53 }
  0x24   :  { %322 = vmatprep.subr.bf16.mxu0 %v2389_v4 }
  0x25   :  { %1894 = vmatpush3.bf16.msra.mxu1 %v2534_v27 }
  0x26   :  { %1899 = vmatprep.subr.bf16.mxu1 %v2323_v2 }
  0x27   :  { %323 = vmatpush1.bf16.msra.mxu0 %v2397_v5 }
  0x28   :  { %324 = vmatprep.subr.bf16.mxu0 %v2403_v6  ;;  %1896 = vmatmul.mubr.bf16.vlgmr.msra.gmra.mrb[0].mxu1 %v68_v25 }
  0x29   :  { %1900 = vmatpush3.bf16.msra.mxu1 %v2420_v9  ;;  %1915 = vmatprep.mubr.msk.bf16.mxu1 %vm2325_vm0, %v2323_v2 }
  0x2a   :  { %1901 = vmatprep.subr.bf16.mxu1 %v2323_v2 }
  0x2b   :  { %325 = vmatpush1.bf16.msra.mxu0 %v2409_v7 }
  0x2c   :  { %326 = vmatprep.subr.bf16.mxu0 %v2415_v8 }
  0x2d   :  { %1902 = vmatpush3.bf16.msra.mxu1 %v2438_v12 }
  0x2e   :  { %1903 = vmatprep.subr.bf16.mxu1 %v2323_v2 }
  0x2f   :  { %327 = vmatpush1.bf16.msra.mxu0 %v2426_v10 }
  0x30   :  { %328 = vmatprep.subr.bf16.mxu0 %v2432_v11 }
  0x31   :  { %1904 = vmatpush3.bf16.msra.mxu1 %v2457_v15 }
  0x32   :  { %1905 = vmatprep.subr.bf16.mxu1 %v2323_v2 }
  0x33   :  { %329 = vmatpush1.bf16.msra.mxu0 %v2444_v13 }
  0x34   :  { %330 = vmatprep.subr.bf16.mxu0 %v2450_v14 }
  0x35   :  { %1906 = vmatpush3.bf16.msra.mxu1 %v2474_v18 }
  0x36   :  { %1907 = vmatprep.subr.bf16.mxu1 %v2323_v2 }
  0x37   :  { %331 = vmatpush1.bf16.msra.mxu0 %v2463_v16 }
  0x38   :  { %332 = vmatprep.subr.bf16.mxu0 %v2469_v17 }
  0x39   :  { %1908 = vmatpush3.bf16.msra.mxu1 %v2492_v21 }
  0x3a   :  { %1909 = vmatprep.subr.bf16.mxu1 %v2323_v2 }
  0x3b   :  { %333 = vmatpush1.bf16.msra.mxu0 %v2481_v19 }
  0x3c   :  { %334 = vmatprep.subr.bf16.mxu0 %v2487_v20 }
  0x3d   :  { %1910 = vmatpush3.bf16.msra.mxu1 %v2511_v24 }
  0x3e   :  { %1911 = vmatprep.subr.bf16.mxu1 %v2323_v2 }
  0x3f   :  { %335 = vmatpush1.bf16.msra.mxu0 %v2500_v22 }
  0x40   :  { %427 = vmatprep.subr.bf16.mxu0 %v2376_v0 }
  0x41   :  { %1912 = vmatpush3.bf16.msra.mxu1 %v2524_v26 }
  0x42   :  { %1913 = vmatprep.subr.bf16.mxu1 %v2323_v2 }
  0x45   :  { %1914 = vmatpush3.bf16.msra.mxu1 %v2534_v27 }
  0x46   :  { %1919 = vmatprep.subr.bf16.mxu1 %v2323_v2 }
  0xf5   :  { %v247_v36 = vpop.f32.mrb[0].mxu0 }
  0xf6   :  { %v248_v37 = vadd.f32 %v247_v36, %v2582_v33  ;;  %v249_v38 = vpop.f32.mrb[1].mxu0 }
  0xf7   :  { %v250_v39 = vadd.f32 %v249_v38, %v2586_v34  ;;  %v251_v40 = vpop.f32.mrb[2].mxu0 }
  0xf8   :  { %v294_v41 = vadd.f32 %v248_v37, %v65_v35  ;;  %v252_v43 = vpop.f32.mrb[3].mxu0 }
  0xf9   :  { %v301_v45 = vadd.f32 %v250_v39, %v66_v42 }
  0xfa   :  { %v1725_v44 = vmul.f32 -1.442695, %v294_v41 }
  0xfb   :  { %v288_v46 = vpop.f32.mrb[0].mxu1  ;;  %v1726_v47 = vmul.f32 -1.442695, %v301_v45 }
  0xfc   :  { %2156 = vpow2.f32 %v1725_v44  ;;  %v1897_v48 = vpop.f32.mrb[1].mxu1  ;;  %v289_v57 = vadd.f32 %v288_v46, %v2599_v54 }
  0xfd   :  { %v291_v49 = vpop.f32.mrb[2].mxu1  ;;  %2158 = vpow2.f32 %v1726_v47  ;;  %v1728_v47 = vld [vmem:[%s3152_s0 + $0x20] sm:$0xff] }
  0xfe   :  { %v1898_v50 = vpop.f32.mrb[3].mxu1 }
 0x106   :  { %v2157_v51 = vpop.eup %2156 }
 0x107   :  { %v298_v52 = vadd.f32 1.0, %v2157_v51  ;;  %v2159_v55 = vpop.eup %2158 }
 0x108   :  { %v305_v56 = vadd.f32 1.0, %v2159_v55 }
 0x109   :  { %2160 = vrcp.f32 %v298_v52 }
 0x10a   :  { %2162 = vrcp.f32 %v305_v56 }
 0x113   :  { %v2161_v58 = vpop.eup %2160 }
 0x114   :  { %v308_v60 = vmul.f32 %v2161_v58, %v289_v57  ;;  %v2163_v62 = vpop.eup %2162 }
 0x115   :  { %v311_v63 = vsub.f32 1.0, %v2163_v62  ;;  %v313_v31 = vmul.f32 %v2163_v62, %v2505_v23  ;;  %v1727_v23 = vld [vmem:[%s3152_s0 + $0x18] sm:$0xff] }
 0x116   :  { %v309_v61 = vadd.f32 %v308_v60, %v67_v59 }
 0x118   :  { %2164 = vtanh.f32 %v309_v61  ;;  %v1729_v61 = vld [vmem:[%s3152_s0 + $0x28] sm:$0xff] }
 0x122   :  { %v2165_v25 = vpop.eup %2164 }
 0x123   :  { %v312_v35 = vmul.f32 %v2165_v25, %v311_v63 }
 0x125   :  { %v2606_v36 = vadd.f32 %v313_v31, %v312_v35 }
 0x127   :  { %v319_v37 = vpack.c.bf16 %v2606_v36, %v2606_v36 }
 0x129   :  { %353 = vmatmul.mubr.bf16.vlgmr.msra.gmra.mrb[4].mxu0 %v319_v37  ;;  %1916 = vmatmul.mubr.bf16.vlgmr.msra.gmra.mrb[4].mxu1 %v319_v37 }
 0x12a   :  { %428 = vmatpush1.bf16.msra.mxu0 %v2381_v1  ;;  %1920 = vmatpush3.bf16.msra.mxu1 %v2420_v9 }
 0x12b   :  { %429 = vmatprep.subr.bf16.mxu0 %v2389_v4  ;;  %1921 = vmatprep.subr.bf16.mxu1 %v2323_v2 }
 0x12c   :  { %459 = vmatprep.mubr.bf16.mxu0 %v2324_v3  ;;  %1935 = vmatprep.mubr.msk.bf16.mxu1 %vm2325_vm0, %v2323_v2 }
 0x12e   :  { %430 = vmatpush1.bf16.msra.mxu0 %v2397_v5  ;;  %1922 = vmatpush3.bf16.msra.mxu1 %v2438_v12 }
 0x12f   :  { %431 = vmatprep.subr.bf16.mxu0 %v2403_v6  ;;  %1923 = vmatprep.subr.bf16.mxu1 %v2323_v2 }
 0x132   :  { %432 = vmatpush1.bf16.msra.mxu0 %v2409_v7  ;;  %1924 = vmatpush3.bf16.msra.mxu1 %v2457_v15 }
 0x133   :  { %433 = vmatprep.subr.bf16.mxu0 %v2415_v8  ;;  %1925 = vmatprep.subr.bf16.mxu1 %v2323_v2 }
 0x136   :  { %434 = vmatpush1.bf16.msra.mxu0 %v2426_v10  ;;  %1926 = vmatpush3.bf16.msra.mxu1 %v2474_v18 }
 0x137   :  { %435 = vmatprep.subr.bf16.mxu0 %v2432_v11  ;;  %1927 = vmatprep.subr.bf16.mxu1 %v2323_v2 }
 0x13a   :  { %436 = vmatpush1.bf16.msra.mxu0 %v2444_v13  ;;  %1928 = vmatpush3.bf16.msra.mxu1 %v2492_v21 }
 0x13b   :  { %437 = vmatprep.subr.bf16.mxu0 %v2450_v14  ;;  %1929 = vmatprep.subr.bf16.mxu1 %v2323_v2 }
 0x13e   :  { %438 = vmatpush1.bf16.msra.mxu0 %v2463_v16  ;;  %1930 = vmatpush3.bf16.msra.mxu1 %v2511_v24 }
 0x13f   :  { %439 = vmatprep.subr.bf16.mxu0 %v2469_v17  ;;  %1931 = vmatprep.subr.bf16.mxu1 %v2323_v2 }
 0x142   :  { %440 = vmatpush1.bf16.msra.mxu0 %v2481_v19  ;;  %1932 = vmatpush3.bf16.msra.mxu1 %v2524_v26 }
 0x143   :  { %441 = vmatprep.subr.bf16.mxu0 %v2487_v20  ;;  %1933 = vmatprep.subr.bf16.mxu1 %v2323_v2 }
 0x146   :  { %442 = vmatpush1.bf16.msra.mxu0 %v2500_v22  ;;  %1934 = vmatpush3.bf16.msra.mxu1 %v2534_v27 }
 0x147   :  { %534 = vmatprep.subr.bf16.mxu0 %v2376_v0  ;;  %1939 = vmatprep.subr.bf16.mxu1 %v2323_v2 }
 0x1fc   :  { %v354_v38 = vpop.f32.mrb[4].mxu0  ;;  %v395_v39 = vpop.f32.mrb[4].mxu1 }
 0x1fd   :  { %v355_v40 = vadd.f32 %v354_v38, %v2582_v33  ;;  %v356_v41 = vpop.f32.mrb[5].mxu0  ;;  %v1917_v42 = vpop.f32.mrb[5].mxu1  ;;  %v396_v59 = vadd.f32 %v395_v39, %v2599_v54 }
 0x1fe   :  { %v357_v43 = vadd.f32 %v356_v41, %v2586_v34  ;;  %v358_v44 = vpop.f32.mrb[6].mxu0  ;;  %v398_v45 = vpop.f32.mrb[6].mxu1 }
 0x1ff   :  { %v401_v46 = vadd.f32 %v1727_v23, %v355_v40  ;;  %v359_v48 = vpop.f32.mrb[7].mxu0  ;;  %v1918_v49 = vpop.f32.mrb[7].mxu1 }
 0x200   :  { %v408_v51 = vadd.f32 %v1728_v47, %v357_v43  ;;  %v1733_v49 = vld [vmem:[%s3152_s0 + $0x38] sm:$0xff] }
 0x201   :  { %v1730_v50 = vmul.f32 -1.442695, %v401_v46 }
 0x202   :  { %v1731_v52 = vmul.f32 -1.442695, %v408_v51 }
 0x203   :  { %2166 = vpow2.f32 %v1730_v50 }
 0x204   :  { %2168 = vpow2.f32 %v1731_v52 }
 0x20d   :  { %v2167_v55 = vpop.eup %2166 }
 0x20e   :  { %v405_v56 = vadd.f32 1.0, %v2167_v55  ;;  %v2169_v57 = vpop.eup %2168 }
 0x20f   :  { %v412_v58 = vadd.f32 1.0, %v2169_v57 }
 0x210   :  { %2170 = vrcp.f32 %v405_v56 }
 0x211   :  { %2172 = vrcp.f32 %v412_v58 }
 0x21a   :  { %v2171_v60 = vpop.eup %2170 }
 0x21b   :  { %v415_v62 = vmul.f32 %v2171_v60, %v396_v59  ;;  %v2173_v25 = vpop.eup %2172 }
 0x21c   :  { %v418_v35 = vsub.f32 1.0, %v2173_v25  ;;  %v420_v23 = vmul.f32 %v2173_v25, %v2606_v36  ;;  %v1732_v36 = vld [vmem:[%s3152_s0 + $0x30] sm:$0xff] }
 0x21d   :  { %v416_v63 = vadd.f32 %v1729_v61, %v415_v62 }
 0x21f   :  { %2174 = vtanh.f32 %v416_v63  ;;  %v1734_v63 = vld [vmem:[%s3152_s0 + $0x40] sm:$0xff] }
 0x229   :  { %v2175_v31 = vpop.eup %2174 }
 0x22a   :  { %v419_v37 = vmul.f32 %v2175_v31, %v418_v35 }
 0x22c   :  { %v2658_v38 = vadd.f32 %v420_v23, %v419_v37 }
 0x22e   :  { %v426_v39 = vpack.c.bf16 %v2658_v38, %v2658_v38 }
 0x230   :  { %460 = vmatmul.mubr.bf16.vlgmr.msra.gmra.mrb[8].mxu0 %v426_v39  ;;  %1936 = vmatmul.mubr.bf16.vlgmr.msra.gmra.mrb[8].mxu1 %v426_v39 }
 0x231   :  { %535 = vmatpush1.bf16.msra.mxu0 %v2381_v1  ;;  %1940 = vmatpush3.bf16.msra.mxu1 %v2420_v9 }
 0x232   :  { %536 = vmatprep.subr.bf16.mxu0 %v2389_v4  ;;  %1941 = vmatprep.subr.bf16.mxu1 %v2323_v2 }
 0x233   :  { %566 = vmatprep.mubr.bf16.mxu0 %v2324_v3  ;;  %1955 = vmatprep.mubr.msk.bf16.mxu1 %vm2325_vm0, %v2323_v2 }
 0x235   :  { %537 = vmatpush1.bf16.msra.mxu0 %v2397_v5  ;;  %1942 = vmatpush3.bf16.msra.mxu1 %v2438_v12 }
 0x236   :  { %538 = vmatprep.subr.bf16.mxu0 %v2403_v6  ;;  %1943 = vmatprep.subr.bf16.mxu1 %v2323_v2 }
 0x239   :  { %539 = vmatpush1.bf16.msra.mxu0 %v2409_v7  ;;  %1944 = vmatpush3.bf16.msra.mxu1 %v2457_v15 }
 0x23a   :  { %540 = vmatprep.subr.bf16.mxu0 %v2415_v8  ;;  %1945 = vmatprep.subr.bf16.mxu1 %v2323_v2 }
 0x23d   :  { %541 = vmatpush1.bf16.msra.mxu0 %v2426_v10  ;;  %1946 = vmatpush3.bf16.msra.mxu1 %v2474_v18 }
 0x23e   :  { %542 = vmatprep.subr.bf16.mxu0 %v2432_v11  ;;  %1947 = vmatprep.subr.bf16.mxu1 %v2323_v2 }
 0x241   :  { %543 = vmatpush1.bf16.msra.mxu0 %v2444_v13  ;;  %1948 = vmatpush3.bf16.msra.mxu1 %v2492_v21 }
 0x242   :  { %544 = vmatprep.subr.bf16.mxu0 %v2450_v14  ;;  %1949 = vmatprep.subr.bf16.mxu1 %v2323_v2 }
 0x245   :  { %545 = vmatpush1.bf16.msra.mxu0 %v2463_v16  ;;  %1950 = vmatpush3.bf16.msra.mxu1 %v2511_v24 }
 0x246   :  { %546 = vmatprep.subr.bf16.mxu0 %v2469_v17  ;;  %1951 = vmatprep.subr.bf16.mxu1 %v2323_v2 }
 0x249   :  { %547 = vmatpush1.bf16.msra.mxu0 %v2481_v19  ;;  %1952 = vmatpush3.bf16.msra.mxu1 %v2524_v26 }
 0x24a   :  { %548 = vmatprep.subr.bf16.mxu0 %v2487_v20  ;;  %1953 = vmatprep.subr.bf16.mxu1 %v2323_v2 }
 0x24d   :  { %549 = vmatpush1.bf16.msra.mxu0 %v2500_v22  ;;  %1954 = vmatpush3.bf16.msra.mxu1 %v2534_v27 }
 0x24e   :  { %641 = vmatprep.subr.bf16.mxu0 %v2376_v0  ;;  %1959 = vmatprep.subr.bf16.mxu1 %v2323_v2 }
 0x303   :  { %v461_v40 = vpop.f32.mrb[8].mxu0  ;;  %v502_v41 = vpop.f32.mrb[8].mxu1 }
 0x304   :  { %v462_v42 = vadd.f32 %v461_v40, %v2582_v33  ;;  %v463_v43 = vpop.f32.mrb[9].mxu0  ;;  %v1937_v44 = vpop.f32.mrb[9].mxu1  ;;  %v503_v61 = vadd.f32 %v502_v41, %v2599_v54 }
 0x305   :  { %v464_v45 = vadd.f32 %v463_v43, %v2586_v34  ;;  %v465_v46 = vpop.f32.mrb[10].mxu0  ;;  %v505_v47 = vpop.f32.mrb[10].mxu1 }
 0x306   :  { %v508_v48 = vadd.f32 %v1732_v36, %v462_v42  ;;  %v466_v50 = vpop.f32.mrb[11].mxu0  ;;  %v1938_v51 = vpop.f32.mrb[11].mxu1 }
 0x307   :  { %v515_v55 = vadd.f32 %v1733_v49, %v464_v45  ;;  %v1738_v51 = vld [vmem:[%s3152_s0 + $0x50] sm:$0xff] }
 0x308   :  { %v1735_v52 = vmul.f32 -1.442695, %v508_v48 }
 0x309   :  { %v1736_v56 = vmul.f32 -1.442695, %v515_v55 }
 0x30a   :  { %2176 = vpow2.f32 %v1735_v52 }
 0x30b   :  { %2178 = vpow2.f32 %v1736_v56 }
 0x314   :  { %v2177_v57 = vpop.eup %2176 }
 0x315   :  { %v512_v58 = vadd.f32 1.0, %v2177_v57  ;;  %v2179_v59 = vpop.eup %2178 }
 0x316   :  { %v519_v60 = vadd.f32 1.0, %v2179_v59 }
 0x317   :  { %2180 = vrcp.f32 %v512_v58 }
 0x318   :  { %2182 = vrcp.f32 %v519_v60 }
 0x321   :  { %v2181_v62 = vpop.eup %2180 }
 0x322   :  { %v522_v25 = vmul.f32 %v2181_v62, %v503_v61  ;;  %v2183_v31 = vpop.eup %2182 }
 0x323   :  { %v525_v37 = vsub.f32 1.0, %v2183_v31  ;;  %v527_v36 = vmul.f32 %v2183_v31, %v2658_v38  ;;  %v1737_v38 = vld [vmem:[%s3152_s0 + $0x48] sm:$0xff] }
 0x324   :  { %v523_v35 = vadd.f32 %v1734_v63, %v522_v25 }
 0x326   :  { %2184 = vtanh.f32 %v523_v35  ;;  %v1739_v35 = vld [vmem:[%s3152_s0 + $0x58] sm:$0xff] }
 0x330   :  { %v2185_v23 = vpop.eup %2184 }
 0x331   :  { %v526_v39 = vmul.f32 %v2185_v23, %v525_v37 }
 0x333   :  { %v2710_v40 = vadd.f32 %v527_v36, %v526_v39 }
 0x335   :  { %v533_v41 = vpack.c.bf16 %v2710_v40, %v2710_v40 }
 0x337   :  { %567 = vmatmul.mubr.bf16.vlgmr.msra.gmra.mrb[12].mxu0 %v533_v41  ;;  %1956 = vmatmul.mubr.bf16.vlgmr.msra.gmra.mrb[12].mxu1 %v533_v41 }
 0x338   :  { %642 = vmatpush1.bf16.msra.mxu0 %v2381_v1  ;;  %1960 = vmatpush3.bf16.msra.mxu1 %v2420_v9 }
 0x339   :  { %643 = vmatprep.subr.bf16.mxu0 %v2389_v4  ;;  %1961 = vmatprep.subr.bf16.mxu1 %v2323_v2 }
 0x33a   :  { %673 = vmatprep.mubr.bf16.mxu0 %v2324_v3  ;;  %1975 = vmatprep.mubr.msk.bf16.mxu1 %vm2325_vm0, %v2323_v2 }
 0x33c   :  { %644 = vmatpush1.bf16.msra.mxu0 %v2397_v5  ;;  %1962 = vmatpush3.bf16.msra.mxu1 %v2438_v12 }
 0x33d   :  { %645 = vmatprep.subr.bf16.mxu0 %v2403_v6  ;;  %1963 = vmatprep.subr.bf16.mxu1 %v2323_v2 }
 0x340   :  { %646 = vmatpush1.bf16.msra.mxu0 %v2409_v7  ;;  %1964 = vmatpush3.bf16.msra.mxu1 %v2457_v15 }
 0x341   :  { %647 = vmatprep.subr.bf16.mxu0 %v2415_v8  ;;  %1965 = vmatprep.subr.bf16.mxu1 %v2323_v2 }
 0x344   :  { %648 = vmatpush1.bf16.msra.mxu0 %v2426_v10  ;;  %1966 = vmatpush3.bf16.msra.mxu1 %v2474_v18 }
 0x345   :  { %649 = vmatprep.subr.bf16.mxu0 %v2432_v11  ;;  %1967 = vmatprep.subr.bf16.mxu1 %v2323_v2 }
 0x348   :  { %650 = vmatpush1.bf16.msra.mxu0 %v2444_v13  ;;  %1968 = vmatpush3.bf16.msra.mxu1 %v2492_v21 }
 0x349   :  { %651 = vmatprep.subr.bf16.mxu0 %v2450_v14  ;;  %1969 = vmatprep.subr.bf16.mxu1 %v2323_v2 }
 0x34c   :  { %652 = vmatpush1.bf16.msra.mxu0 %v2463_v16  ;;  %1970 = vmatpush3.bf16.msra.mxu1 %v2511_v24 }
 0x34d   :  { %653 = vmatprep.subr.bf16.mxu0 %v2469_v17  ;;  %1971 = vmatprep.subr.bf16.mxu1 %v2323_v2 }
 0x350   :  { %654 = vmatpush1.bf16.msra.mxu0 %v2481_v19  ;;  %1972 = vmatpush3.bf16.msra.mxu1 %v2524_v26 }
 0x351   :  { %655 = vmatprep.subr.bf16.mxu0 %v2487_v20  ;;  %1973 = vmatprep.subr.bf16.mxu1 %v2323_v2 }
 0x354   :  { %656 = vmatpush1.bf16.msra.mxu0 %v2500_v22  ;;  %1974 = vmatpush3.bf16.msra.mxu1 %v2534_v27 }
 0x355   :  { %748 = vmatprep.subr.bf16.mxu0 %v2376_v0  ;;  %1979 = vmatprep.subr.bf16.mxu1 %v2323_v2 }
 0x40a   :  { %v568_v42 = vpop.f32.mrb[12].mxu0  ;;  %v609_v43 = vpop.f32.mrb[12].mxu1 }
 0x40b   :  { %v569_v44 = vadd.f32 %v568_v42, %v2582_v33  ;;  %v570_v45 = vpop.f32.mrb[13].mxu0  ;;  %v1957_v46 = vpop.f32.mrb[13].mxu1  ;;  %v610_v63 = vadd.f32 %v609_v43, %v2599_v54 }
 0x40c   :  { %v571_v47 = vadd.f32 %v570_v45, %v2586_v34  ;;  %v572_v48 = vpop.f32.mrb[14].mxu0  ;;  %v612_v49 = vpop.f32.mrb[14].mxu1 }
 0x40d   :  { %v615_v50 = vadd.f32 %v1737_v38, %v569_v44  ;;  %v573_v52 = vpop.f32.mrb[15].mxu0  ;;  %v1958_v55 = vpop.f32.mrb[15].mxu1 }
 0x40e   :  { %v622_v57 = vadd.f32 %v1738_v51, %v571_v47 }
 0x40f   :  { %v1740_v56 = vmul.f32 -1.442695, %v615_v50 }
 0x410   :  { %v1741_v58 = vmul.f32 -1.442695, %v622_v57 }
 0x411   :  { %2186 = vpow2.f32 %v1740_v56 }
 0x412   :  { %2188 = vpow2.f32 %v1741_v58 }
 0x41b   :  { %v2187_v59 = vpop.eup %2186 }
 0x41c   :  { %v619_v60 = vadd.f32 1.0, %v2187_v59  ;;  %v2189_v61 = vpop.eup %2188 }
 0x41d   :  { %v626_v62 = vadd.f32 1.0, %v2189_v61 }
 0x41e   :  { %2190 = vrcp.f32 %v619_v60 }
 0x41f   :  { %2192 = vrcp.f32 %v626_v62 }
 0x428   :  { %v2191_v25 = vpop.eup %2190 }
 0x429   :  { %v629_v31 = vmul.f32 %v2191_v25, %v610_v63  ;;  %v2193_v23 = vpop.eup %2192 }
 0x42a   :  { %v632_v39 = vsub.f32 1.0, %v2193_v23  ;;  %v634_v38 = vmul.f32 %v2193_v23, %v2710_v40  ;;  %v1742_v40 = vld [vmem:[%s3152_s0 + $0x60] sm:$0xff] }
 0x42b   :  { %v630_v37 = vadd.f32 %v1739_v35, %v629_v31  ;;  %v1744_v31 = vld [vmem:[%s3152_s0 + $0x70] sm:$0xff] }
 0x42d   :  { %2194 = vtanh.f32 %v630_v37 }
 0x437   :  { %v2195_v36 = vpop.eup %2194 }
 0x438   :  { %v633_v41 = vmul.f32 %v2195_v36, %v632_v39 }
 0x43a   :  { %v2762_v42 = vadd.f32 %v634_v38, %v633_v41 }
 0x43c   :  { %v640_v43 = vpack.c.bf16 %v2762_v42, %v2762_v42 }
 0x43e   :  { %674 = vmatmul.mubr.bf16.vlgmr.msra.gmra.mrb[16].mxu0 %v640_v43  ;;  %1976 = vmatmul.mubr.bf16.vlgmr.msra.gmra.mrb[16].mxu1 %v640_v43 }
 0x43f   :  { %749 = vmatpush1.bf16.msra.mxu0 %v2381_v1  ;;  %1980 = vmatpush3.bf16.msra.mxu1 %v2420_v9 }
 0x440   :  { %750 = vmatprep.subr.bf16.mxu0 %v2389_v4  ;;  %1981 = vmatprep.subr.bf16.mxu1 %v2323_v2 }
 0x441   :  { %780 = vmatprep.mubr.bf16.mxu0 %v2324_v3  ;;  %1995 = vmatprep.mubr.msk.bf16.mxu1 %vm2325_vm0, %v2323_v2 }
 0x443   :  { %751 = vmatpush1.bf16.msra.mxu0 %v2397_v5  ;;  %1982 = vmatpush3.bf16.msra.mxu1 %v2438_v12 }
 0x444   :  { %752 = vmatprep.subr.bf16.mxu0 %v2403_v6  ;;  %1983 = vmatprep.subr.bf16.mxu1 %v2323_v2 }
 0x447   :  { %753 = vmatpush1.bf16.msra.mxu0 %v2409_v7  ;;  %1984 = vmatpush3.bf16.msra.mxu1 %v2457_v15 }
 0x448   :  { %754 = vmatprep.subr.bf16.mxu0 %v2415_v8  ;;  %1985 = vmatprep.subr.bf16.mxu1 %v2323_v2 }
 0x44b   :  { %755 = vmatpush1.bf16.msra.mxu0 %v2426_v10  ;;  %1986 = vmatpush3.bf16.msra.mxu1 %v2474_v18 }
 0x44c   :  { %756 = vmatprep.subr.bf16.mxu0 %v2432_v11  ;;  %1987 = vmatprep.subr.bf16.mxu1 %v2323_v2 }
 0x44f   :  { %757 = vmatpush1.bf16.msra.mxu0 %v2444_v13  ;;  %1988 = vmatpush3.bf16.msra.mxu1 %v2492_v21 }
 0x450   :  { %758 = vmatprep.subr.bf16.mxu0 %v2450_v14  ;;  %1989 = vmatprep.subr.bf16.mxu1 %v2323_v2 }
 0x453   :  { %759 = vmatpush1.bf16.msra.mxu0 %v2463_v16  ;;  %1990 = vmatpush3.bf16.msra.mxu1 %v2511_v24 }
 0x454   :  { %760 = vmatprep.subr.bf16.mxu0 %v2469_v17  ;;  %1991 = vmatprep.subr.bf16.mxu1 %v2323_v2 }
 0x457   :  { %761 = vmatpush1.bf16.msra.mxu0 %v2481_v19  ;;  %1992 = vmatpush3.bf16.msra.mxu1 %v2524_v26 }
 0x458   :  { %762 = vmatprep.subr.bf16.mxu0 %v2487_v20  ;;  %1993 = vmatprep.subr.bf16.mxu1 %v2323_v2 }
 0x45b   :  { %763 = vmatpush1.bf16.msra.mxu0 %v2500_v22  ;;  %1994 = vmatpush3.bf16.msra.mxu1 %v2534_v27 }
 0x45c   :  { %855 = vmatprep.subr.bf16.mxu0 %v2376_v0  ;;  %1999 = vmatprep.subr.bf16.mxu1 %v2323_v2  ;;  %v1743_v0 = vld [vmem:[%s3152_s0 + $0x68] sm:$0xff] }
 0x511   :  { %v675_v44 = vpop.f32.mrb[16].mxu0  ;;  %v716_v45 = vpop.f32.mrb[16].mxu1 }
 0x512   :  { %v676_v46 = vadd.f32 %v675_v44, %v2582_v33  ;;  %v677_v47 = vpop.f32.mrb[17].mxu0  ;;  %v1977_v48 = vpop.f32.mrb[17].mxu1  ;;  %v717_v25 = vadd.f32 %v716_v45, %v2599_v54 }
 0x513   :  { %v678_v49 = vadd.f32 %v677_v47, %v2586_v34  ;;  %v679_v50 = vpop.f32.mrb[18].mxu0  ;;  %v719_v51 = vpop.f32.mrb[18].mxu1  ;;  %v1749_v47 = vld [vmem:[%s3152_s0 + $0x88] sm:$0xff] }
 0x514   :  { %v722_v52 = vadd.f32 %v1742_v40, %v676_v46  ;;  %v680_v55 = vpop.f32.mrb[19].mxu0  ;;  %v1978_v56 = vpop.f32.mrb[19].mxu1 }
 0x515   :  { %v729_v58 = vadd.f32 %v1743_v0, %v678_v49 }
 0x516   :  { %v1745_v57 = vmul.f32 -1.442695, %v722_v52 }
 0x517   :  { %v1746_v59 = vmul.f32 -1.442695, %v729_v58  ;;  %v2255_v58 = vld [vmem:[%s3154_s2] ss:$12 sps:$4 sm:$0xff]  }
 0x518   :  { %2196 = vpow2.f32 %v1745_v57 }
 0x519   :  { %2198 = vpow2.f32 %v1746_v59  ;;  %v2256_v59 = vld [vmem:[%s3154_s2 + $0x8] ss:$12 sps:$4 sm:$0xff]  }
 0x522   :  { %v2197_v60 = vpop.eup %2196 }
 0x523   :  { %v726_v61 = vadd.f32 1.0, %v2197_v60  ;;  %v2199_v62 = vpop.eup %2198  ;;  %v2257_v60 = vld [vmem:[%s3154_s2 + $0x1c] ss:$12 sps:$4 sm:$0xff]  }
 0x524   :  { %v733_v63 = vadd.f32 1.0, %v2199_v62  ;;  %v2259_v62 = vld [vmem:[%s3154_s2 + $0x20] ss:$12 sps:$4 sm:$0xff]  }
 0x525   :  { %2200 = vrcp.f32 %v726_v61  ;;  %v2258_v61 = vld [vmem:[%s3154_s2 + $0x18] ss:$12 sps:$4 sm:$0xff]  }
 0x526   :  { %2202 = vrcp.f32 %v733_v63  ;;  %v2260_v63 = vld [vmem:[%s3154_s2 + $0x34] ss:$12 sps:$4 sm:$0xff]  }
 0x52f   :  { %v2201_v35 = vpop.eup %2200 }
 0x530   :  { %v736_v37 = vmul.f32 %v2201_v35, %v717_v25  ;;  %v2203_v39 = vpop.eup %2202  ;;  %v2261_v25 = vld [vmem:[%s3154_s2 + $0x30] ss:$12 sps:$4 sm:$0xff]   ;;  %v2262_v35 = vld [vmem:[%s3154_s2 + $0x38] ss:$12 sps:$4 sm:$0xff]  }
 0x531   :  { %v739_v36 = vsub.f32 1.0, %v2203_v39  ;;  %v741_v43 = vmul.f32 %v2203_v39, %v2762_v42  ;;  %v2266_v39 = vld [vmem:[%s3154_s2 + $0x64] ss:$12 sps:$4 sm:$0xff]  }
 0x532   :  { %v737_v23 = vadd.f32 %v1744_v31, %v736_v37  ;;  %v2263_v31 = vld [vmem:[%s3154_s2 + $0x4c] ss:$12 sps:$4 sm:$0xff]   ;;  %v2264_v37 = vld [vmem:[%s3154_s2 + $0x48] ss:$12 sps:$4 sm:$0xff]  }
 0x534   :  { %2204 = vtanh.f32 %v737_v23  ;;  %v2265_v23 = vld [vmem:[%s3154_s2 + $0x50] ss:$12 sps:$4 sm:$0xff]  }
 0x53e   :  { %v2205_v41 = vpop.eup %2204 }
 0x53f   :  { %v740_v38 = vmul.f32 %v2205_v41, %v739_v36  ;;  %v2267_v36 = vld [vmem:[%s3154_s2 + $0x60] ss:$12 sps:$4 sm:$0xff]   ;;  %v2268_v41 = vld [vmem:[%s3154_s2 + $0x68] ss:$12 sps:$4 sm:$0xff]  }
 0x541   :  { %v2814_v40 = vadd.f32 %v741_v43, %v740_v38  ;;  %v2269_v38 = vld [vmem:[%s3154_s2 + $0x7c] ss:$12 sps:$4 sm:$0xff]   ;;  %v2270_v43 = vld [vmem:[%s3154_s2 + $0x78] ss:$12 sps:$4 sm:$0xff]  }
 0x543   :  { %v747_v44 = vpack.c.bf16 %v2814_v40, %v2814_v40 }
 0x545   :  { %781 = vmatmul.mubr.bf16.vlgmr.msra.gmra.mrb[20].mxu0 %v747_v44  ;;  %1996 = vmatmul.mubr.bf16.vlgmr.msra.gmra.mrb[20].mxu1 %v747_v44  ;;  %v2272_v44 = vld [vmem:[%s3154_s2 + $0x90] ss:$12 sps:$4 sm:$0xff]  }
 0x546   :  { %856 = vmatpush1.bf16.msra.mxu0 %v2381_v1  ;;  %2000 = vmatpush3.bf16.msra.mxu1 %v2420_v9  ;;  %v2254_v1 = vld [vmem:[%s3154_s2 + $0x4] ss:$12 sps:$4 sm:$0xff]  }
 0x547   :  { %857 = vmatprep.subr.bf16.mxu0 %v2389_v4  ;;  %2001 = vmatprep.subr.bf16.mxu1 %v2323_v2  ;;  %v1747_v4 = vld [vmem:[%s3152_s0 + $0x78] sm:$0xff] }
 0x548   :  { %887 = vmatprep.mubr.bf16.mxu0 %v2324_v3  ;;  %2015 = vmatprep.mubr.msk.bf16.mxu1 %vm2325_vm0, %v2323_v2 }
 0x54a   :  { %858 = vmatpush1.bf16.msra.mxu0 %v2397_v5  ;;  %2002 = vmatpush3.bf16.msra.mxu1 %v2438_v12 }
 0x54b   :  { %859 = vmatprep.subr.bf16.mxu0 %v2403_v6  ;;  %2003 = vmatprep.subr.bf16.mxu1 %v2323_v2 }
 0x54e   :  { %860 = vmatpush1.bf16.msra.mxu0 %v2409_v7  ;;  %2004 = vmatpush3.bf16.msra.mxu1 %v2457_v15 }
 0x54f   :  { %861 = vmatprep.subr.bf16.mxu0 %v2415_v8  ;;  %2005 = vmatprep.subr.bf16.mxu1 %v2323_v2 }
 0x552   :  { %862 = vmatpush1.bf16.msra.mxu0 %v2426_v10  ;;  %2006 = vmatpush3.bf16.msra.mxu1 %v2474_v18 }
 0x553   :  { %863 = vmatprep.subr.bf16.mxu0 %v2432_v11  ;;  %2007 = vmatprep.subr.bf16.mxu1 %v2323_v2 }
 0x556   :  { %864 = vmatpush1.bf16.msra.mxu0 %v2444_v13  ;;  %2008 = vmatpush3.bf16.msra.mxu1 %v2492_v21 }
 0x557   :  { %865 = vmatprep.subr.bf16.mxu0 %v2450_v14  ;;  %2009 = vmatprep.subr.bf16.mxu1 %v2323_v2  ;;  %v1748_v14 = vld [vmem:[%s3152_s0 + $0x80] sm:$0xff] }
 0x55a   :  { %866 = vmatpush1.bf16.msra.mxu0 %v2463_v16  ;;  %2010 = vmatpush3.bf16.msra.mxu1 %v2511_v24 }
 0x55b   :  { %867 = vmatprep.subr.bf16.mxu0 %v2469_v17  ;;  %2011 = vmatprep.subr.bf16.mxu1 %v2323_v2 }
 0x55e   :  { %868 = vmatpush1.bf16.msra.mxu0 %v2481_v19  ;;  %2012 = vmatpush3.bf16.msra.mxu1 %v2524_v26 }
 0x55f   :  { %869 = vmatprep.subr.bf16.mxu0 %v2487_v20  ;;  %2013 = vmatprep.subr.bf16.mxu1 %v2323_v2 }
 0x562   :  { %870 = vmatpush1.bf16.msra.mxu0 %v2500_v22  ;;  %2014 = vmatpush3.bf16.msra.mxu1 %v2534_v27 }
 0x563   :  { %962 = vmatprep.subr.bf16.mxu0 %v2254_v1  ;;  %2019 = vmatprep.subr.bf16.mxu1 %v2323_v2  ;;  %v2273_v1 = vld [vmem:[%s3154_s2 + $0xac] ss:$12 sps:$4 sm:$0xff]  }
 0x618   :  { %v782_v5 = vpop.f32.mrb[20].mxu0  ;;  %v823_v6 = vpop.f32.mrb[20].mxu1 }
 0x619   :  { %v783_v7 = vadd.f32 %v782_v5, %v2582_v33  ;;  %v784_v8 = vpop.f32.mrb[21].mxu0  ;;  %v1997_v9 = vpop.f32.mrb[21].mxu1  ;;  %v824_v45 = vadd.f32 %v823_v6, %v2599_v54 }
 0x61a   :  { %v785_v10 = vadd.f32 %v784_v8, %v2586_v34  ;;  %v786_v11 = vpop.f32.mrb[22].mxu0  ;;  %v826_v12 = vpop.f32.mrb[22].mxu1 }
 0x61b   :  { %v829_v13 = vadd.f32 %v1747_v4, %v783_v7  ;;  %v787_v15 = vpop.f32.mrb[23].mxu0  ;;  %v1998_v16 = vpop.f32.mrb[23].mxu1  ;;  %v1752_v4 = vld [vmem:[%s3152_s0 + $0x90] sm:$0xff] }
 0x61c   :  { %v836_v18 = vadd.f32 %v1748_v14, %v785_v10 }
 0x61d   :  { %v1750_v17 = vmul.f32 -1.442695, %v829_v13  ;;  %v1753_v13 = vld [vmem:[%s3152_s0 + $0x98] sm:$0xff] }
 0x61e   :  { %v1751_v19 = vmul.f32 -1.442695, %v836_v18 }
 0x61f   :  { %2206 = vpow2.f32 %v1750_v17 }
 0x620   :  { %2208 = vpow2.f32 %v1751_v19 }
 0x629   :  { %v2207_v20 = vpop.eup %2206 }
 0x62a   :  { %v833_v21 = vadd.f32 1.0, %v2207_v20  ;;  %v2209_v22 = vpop.eup %2208 }
 0x62b   :  { %v840_v42 = vadd.f32 1.0, %v2209_v22 }
 0x62c   :  { %2210 = vrcp.f32 %v833_v21 }
 0x62d   :  { %2212 = vrcp.f32 %v840_v42 }
 0x636   :  { %v2211_v46 = vpop.eup %2210 }
 0x637   :  { %v843_v48 = vmul.f32 %v2211_v46, %v824_v45  ;;  %v2213_v50 = vpop.eup %2212  ;;  %v1754_v45 = vld [vmem:[%s3152_s0 + $0xa0] sm:$0xff] }
 0x638   :  { %v846_v51 = vsub.f32 1.0, %v2213_v50  ;;  %v848_v55 = vmul.f32 %v2213_v50, %v2814_v40  ;;  %v2271_v40 = vld [vmem:[%s3154_s2 + $0x94] ss:$12 sps:$4 sm:$0xff]  }
 0x639   :  { %v844_v49 = vadd.f32 %v1749_v47, %v843_v48 }
 0x63b   :  { %2214 = vtanh.f32 %v844_v49 }
 0x645   :  { %v2215_v52 = vpop.eup %2214 }
 0x646   :  { %v847_v0 = vmul.f32 %v2215_v52, %v846_v51 }
 0x648   :  { %v2868_v56 = vadd.f32 %v848_v55, %v847_v0 }
 0x64a   :  { %v854_v57 = vpack.c.bf16 %v2868_v56, %v2868_v56 }
 0x64c   :  { %888 = vmatmul.mubr.bf16.vlgmr.msra.gmra.mrb[24].mxu0 %v854_v57  ;;  %2016 = vmatmul.mubr.bf16.vlgmr.msra.gmra.mrb[24].mxu1 %v854_v57  ;;  %v2110_v57 = vld [vmem:[%s3157_s5 + $0x4] ss:$16 sps:$4 sm:$0xff]  }
 0x64d   :  { %963 = vmatpush1.bf16.msra.mxu0 %v2255_v58  ;;  %2020 = vmatpush3.bf16.msra.mxu1 %v2256_v59  ;;  %v2113_v58 = vld [vmem:[%s3157_s5 + $0xc] ss:$16 sps:$4 sm:$0xff]   ;;  %v2111_v59 = vld [vmem:[%s3157_s5 + $0x8] ss:$16 sps:$4 sm:$0xff]  }
 0x64e   :  { %964 = vmatprep.subr.bf16.mxu0 %v2257_v60  ;;  %2021 = vmatprep.subr.bf16.mxu1 %v2323_v2  ;;  %v2119_v60 = vld [vmem:[%s3157_s5 + $0x2c] ss:$16 sps:$4 sm:$0xff]  }
 0x64f   :  { %994 = vmatprep.mubr.bf16.mxu0 %v2324_v3  ;;  %2035 = vmatprep.mubr.msk.bf16.mxu1 %vm2325_vm0, %v2323_v2 }
 0x651   :  { %965 = vmatpush1.bf16.msra.mxu0 %v2258_v61  ;;  %2022 = vmatpush3.bf16.msra.mxu1 %v2259_v62  ;;  %v2114_v61 = vld [vmem:[%s3157_s5 + $0x20] ss:$16 sps:$4 sm:$0xff]   ;;  %v2117_v62 = vld [vmem:[%s3157_s5 + $0x28] ss:$16 sps:$4 sm:$0xff]  }
 0x652   :  { %966 = vmatprep.subr.bf16.mxu0 %v2260_v63  ;;  %2023 = vmatprep.subr.bf16.mxu1 %v2323_v2  ;;  %v2122_v63 = vld [vmem:[%s3157_s5 + $0x44] ss:$16 sps:$4 sm:$0xff]  }
 0x655   :  { %967 = vmatpush1.bf16.msra.mxu0 %v2261_v25  ;;  %2024 = vmatpush3.bf16.msra.mxu1 %v2262_v35  ;;  %v2125_v25 = vld [vmem:[%s3157_s5 + $0x4c] ss:$16 sps:$4 sm:$0xff]   ;;  %v2120_v35 = vld [vmem:[%s3157_s5 + $0x40] ss:$16 sps:$4 sm:$0xff]  }
 0x656   :  { %968 = vmatprep.subr.bf16.mxu0 %v2263_v31  ;;  %2025 = vmatprep.subr.bf16.mxu1 %v2323_v2  ;;  %v2123_v31 = vld [vmem:[%s3157_s5 + $0x48] ss:$16 sps:$4 sm:$0xff]  }
 0x659   :  { %969 = vmatpush1.bf16.msra.mxu0 %v2264_v37  ;;  %2026 = vmatpush3.bf16.msra.mxu1 %v2265_v23  ;;  %v2128_v37 = vld [vmem:[%s3157_s5 + $0x64] ss:$16 sps:$4 sm:$0xff]   ;;  %v2131_v23 = vld [vmem:[%s3157_s5 + $0x6c] ss:$16 sps:$4 sm:$0xff]  }
 0x65a   :  { %970 = vmatprep.subr.bf16.mxu0 %v2266_v39  ;;  %2027 = vmatprep.subr.bf16.mxu1 %v2323_v2  ;;  %v2126_v39 = vld [vmem:[%s3157_s5 + $0x60] ss:$16 sps:$4 sm:$0xff]  }
 0x65d   :  { %971 = vmatpush1.bf16.msra.mxu0 %v2267_v36  ;;  %2028 = vmatpush3.bf16.msra.mxu1 %v2268_v41  ;;  %v2129_v36 = vld [vmem:[%s3157_s5 + $0x68] ss:$16 sps:$4 sm:$0xff]   ;;  %v2134_v41 = vld [vmem:[%s3157_s5 + $0x84] ss:$16 sps:$4 sm:$0xff]  }
 0x65e   :  { %972 = vmatprep.subr.bf16.mxu0 %v2269_v38  ;;  %2029 = vmatprep.subr.bf16.mxu1 %v2323_v2  ;;  %v2137_v38 = vld [vmem:[%s3157_s5 + $0x8c] ss:$16 sps:$4 sm:$0xff]  }
 0x661   :  { %973 = vmatpush1.bf16.msra.mxu0 %v2270_v43  ;;  %2030 = vmatpush3.bf16.msra.mxu1 %v2511_v24  ;;  %v2274_v24 = vld [vmem:[%s3154_s2 + $0xa8] ss:$12 sps:$4 sm:$0xff]   ;;  %v2132_v43 = vld [vmem:[%s3157_s5 + $0x80] ss:$16 sps:$4 sm:$0xff]  }
 0x662   :  { %974 = vmatprep.subr.bf16.mxu0 %v2271_v40  ;;  %2031 = vmatprep.subr.bf16.mxu1 %v2323_v2  ;;  %v2135_v40 = vld [vmem:[%s3157_s5 + $0x88] ss:$16 sps:$4 sm:$0xff]  }
 0x665   :  { %975 = vmatpush1.bf16.msra.mxu0 %v2272_v44  ;;  %2032 = vmatpush3.bf16.msra.mxu1 %v2524_v26  ;;  %v2140_v44 = vld [vmem:[%s3157_s5 + $0xa4] ss:$16 sps:$4 sm:$0xff]  }
 0x666   :  { %976 = vmatprep.subr.bf16.mxu0 %v2273_v1  ;;  %2033 = vmatprep.subr.bf16.mxu1 %v2323_v2  ;;  %v2143_v1 = vld [vmem:[%s3157_s5 + $0xac] ss:$16 sps:$4 sm:$0xff]  }
 0x669   :  { %977 = vmatpush1.bf16.msra.mxu0 %v2274_v24  ;;  %2034 = vmatpush3.bf16.msra.mxu1 %v2534_v27  ;;  %v2138_v24 = vld [vmem:[%s3157_s5 + $0xa0] ss:$16 sps:$4 sm:$0xff]  }
 0x66a   :  { %1279 = vmatprep.subr.bf16.mxu0 %v2110_v57  ;;  %1320 = vmatprep.subr.bf16.mxu1 %v2113_v58 }
 0x71f   :  { %v889_v5 = vpop.f32.mrb[24].mxu0  ;;  %v930_v26 = vpop.f32.mrb[24].mxu1 }
 0x720   :  { %v890_v6 = vadd.f32 %v889_v5, %v2582_v33  ;;  %v891_v7 = vpop.f32.mrb[25].mxu0  ;;  %v2017_v8 = vpop.f32.mrb[25].mxu1  ;;  %v931_v22 = vadd.f32 %v930_v26, %v2599_v54  ;;  %v2146_v5 = vld [vmem:[%s3157_s5 + $0xc4] ss:$16 sps:$4 sm:$0xff]   ;;  %v2149_v26 = vld [vmem:[%s3157_s5 + $0xcc] ss:$16 sps:$4 sm:$0xff]  }
 0x721   :  { %v892_v9 = vadd.f32 %v891_v7, %v2586_v34  ;;  %v893_v10 = vpop.f32.mrb[26].mxu0  ;;  %v933_v11 = vpop.f32.mrb[26].mxu1  ;;  %v2147_v7 = vld [vmem:[%s3157_s5 + $0xc8] ss:$16 sps:$4 sm:$0xff]   ;;  %v2152_v8 = vld [vmem:[%s3157_s5 + $0xe4] ss:$16 sps:$4 sm:$0xff]  }
 0x722   :  { %v936_v12 = vadd.f32 %v1752_v4, %v890_v6  ;;  %v894_v27 = vpop.f32.mrb[27].mxu0  ;;  %v2018_v14 = vpop.f32.mrb[27].mxu1  ;;  %v2141_v4 = vld [vmem:[%s3157_s5 + $0xa8] ss:$16 sps:$4 sm:$0xff]   ;;  %v2144_v6 = vld [vmem:[%s3157_s5 + $0xc0] ss:$16 sps:$4 sm:$0xff]  }
 0x723   :  { %v943_v16 = vadd.f32 %v1753_v13, %v892_v9  ;;  %v2155_v9 = vld [vmem:[%s3157_s5 + $0xec] ss:$16 sps:$4 sm:$0xff]   ;;  %v2150_v10 = vld [vmem:[%s3157_s5 + $0xe0] ss:$16 sps:$4 sm:$0xff]   ;;  %v2153_v11 = vld [vmem:[%s3157_s5 + $0xe8] ss:$16 sps:$4 sm:$0xff]  }
 0x724   :  { %v1755_v15 = vmul.f32 -1.442695, %v936_v12  ;;  %v1757_v12 = vld [vmem:[%s3152_s0 + $0xa8] sm:$0xff] }
 0x725   :  { %v1756_v17 = vmul.f32 -1.442695, %v943_v16 }
 0x726   :  { %2216 = vpow2.f32 %v1755_v15 }
 0x727   :  { %2218 = vpow2.f32 %v1756_v17 }
 0x730   :  { %v2217_v18 = vpop.eup %2216 }
 0x731   :  { %v940_v19 = vadd.f32 1.0, %v2217_v18  ;;  %v2219_v20 = vpop.eup %2218 }
 0x732   :  { %v947_v21 = vadd.f32 1.0, %v2219_v20 }
 0x733   :  { %2220 = vrcp.f32 %v940_v19 }
 0x734   :  { %2222 = vrcp.f32 %v947_v21  ;;  %v1758_v21 = vld [vmem:[%s3152_s0 + $0xb0] sm:$0xff] }
 0x73d   :  { %v2221_v42 = vpop.eup %2220 }
 0x73e   :  { %v950_v46 = vmul.f32 %v2221_v42, %v931_v22  ;;  %v2223_v48 = vpop.eup %2222 }
 0x73f   :  { %v953_v49 = vsub.f32 1.0, %v2223_v48  ;;  %v955_v52 = vmul.f32 %v2223_v48, %v2868_v56  ;;  %v2108_v56 = vld [vmem:[%s3157_s5] ss:$16 sps:$4 sm:$0xff]  }
 0x740   :  { %v951_v47 = vadd.f32 %v1754_v45, %v950_v46 }
 0x742   :  { %2224 = vtanh.f32 %v951_v47 }
 0x74c   :  { %v2225_v50 = vpop.eup %2224 }
 0x74d   :  { %v954_v51 = vmul.f32 %v2225_v50, %v953_v49 }
 0x74f   :  { %v2958_v0 = vadd.f32 %v955_v52, %v954_v51  ;;  %v1759_v52 = vld [vmem:[%s3152_s0 + $0xb8] sm:$0xff] }
 0x751   :  { %v961_v55 = vpack.c.bf16 %v2958_v0, %v2958_v0 }
 0x753   :  { %995 = vmatmul.mubr.bf16.vlgmr.msra.gmra.mrb[28].mxu0 %v961_v55  ;;  %2036 = vmatmul.mubr.bf16.vlgmr.msra.gmra.mrb[28].mxu1 %v961_v55 }
 0x754   :  { %1311 = vmatprep.mubr.bf16.mxu0 %v2324_v3  ;;  %1352 = vmatprep.mubr.bf16.mxu1 %v2324_v3  ;;  %v2116_v3 = vld [vmem:[%s3157_s5 + $0x24] ss:$16 sps:$4 sm:$0xff]  }
 0x755   :  { %1280 = vmatpush1.bf16.msra.mxu0 %v2108_v56  ;;  %1321 = vmatpush1.bf16.msra.mxu1 %v2111_v59 }
 0x756   :  { %1281 = vmatprep.subr.bf16.mxu0 %v2116_v3  ;;  %1322 = vmatprep.subr.bf16.mxu1 %v2119_v60 }
 0x759   :  { %1282 = vmatpush1.bf16.msra.mxu0 %v2114_v61  ;;  %1323 = vmatpush1.bf16.msra.mxu1 %v2117_v62 }
 0x75a   :  { %1283 = vmatprep.subr.bf16.mxu0 %v2122_v63  ;;  %1324 = vmatprep.subr.bf16.mxu1 %v2125_v25 }
 0x75d   :  { %1284 = vmatpush1.bf16.msra.mxu0 %v2120_v35  ;;  %1325 = vmatpush1.bf16.msra.mxu1 %v2123_v31  ;;  %v1113_v31 = vsub.s32 3, %v2573_v29 }
 0x75e   :  { %1285 = vmatprep.subr.bf16.mxu0 %v2128_v37  ;;  %1326 = vmatprep.subr.bf16.mxu1 %v2131_v23 }
 0x761   :  { %1286 = vmatpush1.bf16.msra.mxu0 %v2126_v39  ;;  %1327 = vmatpush1.bf16.msra.mxu1 %v2129_v36 }
 0x762   :  { %1287 = vmatprep.subr.bf16.mxu0 %v2134_v41  ;;  %1328 = vmatprep.subr.bf16.mxu1 %v2137_v38 }
 0x765   :  { %1288 = vmatpush1.bf16.msra.mxu0 %v2132_v43  ;;  %1329 = vmatpush1.bf16.msra.mxu1 %v2135_v40 }
 0x766   :  { %1289 = vmatprep.subr.bf16.mxu0 %v2140_v44  ;;  %1330 = vmatprep.subr.bf16.mxu1 %v2143_v1 }
 0x769   :  { %1290 = vmatpush1.bf16.msra.mxu0 %v2138_v24  ;;  %1331 = vmatpush1.bf16.msra.mxu1 %v2141_v4 }
 0x76a   :  { %1291 = vmatprep.subr.bf16.mxu0 %v2146_v5  ;;  %1332 = vmatprep.subr.bf16.mxu1 %v2149_v26  ;;  %v1368_v5 = vld [vmem:[%s3156_s4] sm:$0x1] }
 0x76d   :  { %1292 = vmatpush1.bf16.msra.mxu0 %v2144_v6  ;;  %1333 = vmatpush1.bf16.msra.mxu1 %v2147_v7  ;;  %v1796_v7 = vld [vmem:[%s3156_s4 + $0x2] sm:$0x1] }
 0x76e   :  { %1293 = vmatprep.subr.bf16.mxu0 %v2152_v8  ;;  %1334 = vmatprep.subr.bf16.mxu1 %v2155_v9  ;;  %v1797_v8 = vld [vmem:[%s3156_s4 + $0x3] sm:$0x1] }
 0x771   :  { %1294 = vmatpush1.bf16.msra.mxu0 %v2150_v10  ;;  %1335 = vmatpush1.bf16.msra.mxu1 %v2153_v11 }
 0x772   :  { %2039 = vmatprep.subr.bf16.mxu0 %v2323_v2  ;;  %2045 = vmatprep.subr.bf16.mxu1 %v2323_v2 }
 0x826   :  { %v996_v13 = vpop.f32.mrb[28].mxu0  ;;  %v1037_v27 = vpop.f32.mrb[28].mxu1 }
 0x827   :  { %v997_v14 = vadd.f32 %v996_v13, %v2582_v33  ;;  %v998_v15 = vpop.f32.mrb[29].mxu0  ;;  %v2037_v16 = vpop.f32.mrb[29].mxu1 }
 0x828   :  { %v999_v17 = vadd.f32 %v998_v15, %v2586_v34  ;;  %v1000_v18 = vpop.f32.mrb[30].mxu0  ;;  %v1040_v19 = vpop.f32.mrb[30].mxu1  ;;  %v1038_v34 = vadd.f32 %v1037_v27, %v2599_v54  ;;  %v1097_v54 = vld [vmem:[%s3158_s6] sm:$0xf] }
 0x829   :  { %v1043_v20 = vadd.f32 %v1757_v12, %v997_v14  ;;  %v1001_v22 = vpop.f32.mrb[31].mxu0  ;;  %v2038_v42 = vpop.f32.mrb[31].mxu1  ;;  %v1102_v63 = vrot.slane %v1097_v54, %v72_v30  ;;  %v1110_v40 = vrot.slane %v1097_v54, %v80_v53  ;;  %v1114_v24 = vrot.slane %v1097_v54, %v1113_v31  ;;  %v1795_v53 = vld [vmem:[%s3156_s4 + $0x1] sm:$0x1]  ;;  %s2326_s4 = smov [#allocation4]  }
 0x82a   :  { %v1050_v46 = vadd.f32 %v1758_v21, %v999_v17  ;;  %s1689_s24 = sshll.u32 %s2326_s4, 4  ;;  %s1690_s24 = int_to_ptr.vmem [resolvable:$true] %s1689_s24 }
 0x82b   :  { %v1760_v45 = vmul.f32 -1.442695, %v1043_v20  ;;  %s2275_s25 = scalar_lea.vmem %s1690_s24, 16  ;;  %s2279_s26 = scalar_lea.vmem %s1690_s24, 32 }
 0x82c   :  { %v1761_v47 = vmul.f32 -1.442695, %v1050_v46  ;;  %p2276_p0 = scmp.ne.s32.totalorder %s1690_s24, %s2275_s25  ;;  %p2280_p1 = scmp.lt.s32.totalorder %s1690_s24, %s1690_s24 }
 0x82d   :  { %2226 = vpow2.f32 %v1760_v45  ;;  %p2281_p2 = scmp.lt.s32.totalorder %s2279_s26, %s2275_s25 }
 0x82e   :  { %2228 = vpow2.f32 %v1761_v47 }
 0x82f   :  { %p2282_p3 = por %p2281_p2, %p2280_p1 }
 0x831   :  { %p2283_p4 = pnand %p2282_p3, %p2276_p0 }
 0x837   :  { %v2227_v48 = vpop.eup %2226 }
 0x838   :  { %v1047_v33 = vadd.f32 1.0, %v2227_v48  ;;  %v2229_v49 = vpop.eup %2228 }
 0x839   :  { %v1054_v50 = vadd.f32 1.0, %v2229_v49 }
 0x83a   :  { %2230 = vrcp.f32 %v1047_v33 }
 0x83b   :  { %2232 = vrcp.f32 %v1054_v50 }
 0x844   :  { %v2231_v51 = vpop.eup %2230 }
 0x845   :  { %v1057_v55 = vmul.f32 %v2231_v51, %v1038_v34  ;;  %v2233_v58 = vpop.eup %2232 }
 0x846   :  { %v1060_v56 = vsub.f32 1.0, %v2233_v58  ;;  %v1062_v60 = vmul.f32 %v2233_v58, %v2958_v0  ;;  %v1106_v0 = vrot.slane %v1097_v54, %v76_v32 }
 0x847   :  { %v1058_v57 = vadd.f32 %v1759_v52, %v1057_v55 }
 0x849   :  { %2234 = vtanh.f32 %v1058_v57 }
 0x853   :  { %v2235_v59 = vpop.eup %2234 }
 0x854   :  { %v1061_v3 = vmul.f32 %v2235_v59, %v1060_v56 }
 0x856   :  { %v1063_v61 = vadd.f32 %v1062_v60, %v1061_v3 }
 0x858   :  { %v1064_v62 = vpack.c.bf16 %v1063_v61, %v1063_v61 }
 0x85a   :  { %1312 = vmatmul.mubr.bf16.vlgmr.msra.gmra.mrb[32].mxu0 %v1064_v62  ;;  %1353 = vmatmul.mubr.bf16.vlgmr.msra.gmra.mrb[32].mxu1 %v1064_v62 }
 0x85b   :  { %2041 = vmatprep.mubr.msk.bf16.mxu0 %vm2325_vm0, %v2323_v2  ;;  %2047 = vmatprep.mubr.msk.bf16.mxu1 %vm2325_vm0, %v2323_v2 }
 0x92d   :  { %v1313_v25 = vpop.f32.mrb[32].mxu0  ;;  %v1354_v35 = vpop.f32.mrb[32].mxu1 }
 0x92e   :  { %v1314_v37 = vadd.f32 %v1313_v25, %v1102_v63  ;;  %v1315_v23 = vpop.f32.mrb[33].mxu0  ;;  %v1356_v39 = vpop.f32.mrb[33].mxu1  ;;  %v1355_v32 = vadd.f32 %v1354_v35, %v1110_v40 }
 0x92f   :  { %v1316_v36 = vadd.f32 %v1315_v23, %v1106_v0  ;;  %v1317_v41 = vpop.f32.mrb[34].mxu0  ;;  %v1358_v38 = vpop.f32.mrb[34].mxu1  ;;  %v1357_v4 = vadd.f32 %v1356_v39, %v1114_v24  ;;  %v1364_v23 = vand.u32 127, %v70_v28 }
 0x930   :  { %v1369_v43 = vpack.c.bf16 %v1314_v37, %v1314_v37  ;;  %v1318_v44 = vpop.f32.mrb[35].mxu0  ;;  %v1359_v1 = vpop.f32.mrb[35].mxu1  ;;  %v1506_v26 = vpack.c.bf16 %v1355_v32, %v1355_v32 }
 0x931   :  { %v1438_v30 = vpack.c.bf16 %v1316_v36, %v1316_v36  ;;  %v1574_v6 = vpack.c.bf16 %v1357_v4, %v1357_v4  ;;  %vm1365_vm2 = vcmp.eq.s32.totalorder %v2573_v29, %v1364_v23 }
 0x932   :  { %2040 = vmatpush3.bf16.xpose.msra.mxu0 %v1369_v43  ;;  %v1794_v43 = vsel %vm1365_vm2, 1.0, %v2323_v2 }
 0x933   :  { %2046 = vmatpush3.bf16.xpose.msra.mxu1 %v1438_v30  ;;  %2051 = vmatprep.subr.bf16.mxu0 %v2323_v2 }
 0x934   :  { %2057 = vmatprep.subr.bf16.mxu1 %v2323_v2 }
 0x939   :  { %2042 = vmatmul.mubr.bf16.vlgmr.msra.gmra.mrb[36].mxu0 %v1368_v5 }
 0x93a   :  { %2052 = vmatpush3.bf16.xpose.msra.mxu0 %v1506_v26  ;;  %2048 = vmatmul.mubr.bf16.vlgmr.msra.gmra.mrb[36].mxu1 %v1795_v53 }
 0x93b   :  { %2058 = vmatpush3.bf16.xpose.msra.mxu1 %v1574_v6  ;;  %2053 = vmatprep.mubr.msk.bf16.mxu0 %vm2325_vm0, %v2323_v2 }
 0x93c   :  { %2059 = vmatprep.mubr.msk.bf16.mxu1 %vm2325_vm0, %v2323_v2 }
 0x941   :  { %2054 = vmatmul.mubr.bf16.vlgmr.msra.gmra.mrb[40].mxu0 %v1796_v7 }
 0x942   :  { %2060 = vmatmul.mubr.bf16.vlgmr.msra.gmra.mrb[40].mxu1 %v1797_v8 }
 0xa0c   :  { %v1404_v9 = vpop.f32.mrb[36].mxu0 }
 0xa0d   :  { %v2043_v10 = vpop.f32.mrb[37].mxu0  ;;  %v1473_v11 = vpop.f32.mrb[36].mxu1  ;;  %v1411_v12 = vsel %vm1410_vm1, %v1404_v9, -inf }
 0xa0e   :  { %1412 = vmax.xlane.f32.xlu0 %v1411_v12  ;;  %v1407_v13 = vpop.f32.mrb[38].mxu0  ;;  %v2049_v27 = vpop.f32.mrb[37].mxu1  ;;  %v1479_v16 = vsel %vm1410_vm1, %v1473_v11, -inf }
 0xa0f   :  { %v2044_v14 = vpop.f32.mrb[39].mxu0  ;;  %v1476_v15 = vpop.f32.mrb[38].mxu1 }
 0xa10   :  { %v2050_v17 = vpop.f32.mrb[39].mxu1 }
 0xa12   :  { %1480 = vmax.xlane.f32.xlu0 %v1479_v16 }
 0xa14   :  { %v1541_v18 = vpop.f32.mrb[40].mxu0 }
 0xa15   :  { %v2055_v19 = vpop.f32.mrb[41].mxu0  ;;  %v1609_v20 = vpop.f32.mrb[40].mxu1  ;;  %v1547_v21 = vsel %vm1410_vm1, %v1541_v18, -inf }
 0xa16   :  { %1548 = vmax.xlane.f32.xlu1 %v1547_v21  ;;  %v1544_v22 = vpop.f32.mrb[42].mxu0  ;;  %v2061_v42 = vpop.f32.mrb[41].mxu1  ;;  %v1615_v47 = vsel %vm1410_vm1, %v1609_v20, -inf }
 0xa17   :  { %v2056_v45 = vpop.f32.mrb[43].mxu0  ;;  %v1612_v46 = vpop.f32.mrb[42].mxu1 }
 0xa18   :  { %v2062_v48 = vpop.f32.mrb[43].mxu1 }
 0xa1a   :  { %1616 = vmax.xlane.f32.xlu1 %v1615_v47 }
 0xa9b   :  { %v1413_v33 = vpop.xlane.xlu0 %1412 }
 0xa9c   :  { %v1414_v49 = vsub.f32 %v1404_v9, %v1413_v33 }
 0xa9e   :  { %v1415_v50 = vmul.f32 1.442695, %v1414_v49 }
 0xa9f   :  { %v1481_v34 = vpop.xlane.xlu0 %1480 }
 0xaa0   :  { %2236 = vpow2.f32 %v1415_v50  ;;  %v1482_v51 = vsub.f32 %v1473_v11, %v1481_v34 }
 0xaa2   :  { %v1483_v52 = vmul.f32 1.442695, %v1482_v51 }
 0xaa3   :  { %v1549_v55 = vpop.xlane.xlu1 %1548 }
 0xaa4   :  { %2238 = vpow2.f32 %v1483_v52  ;;  %v1550_v57 = vsub.f32 %v1541_v18, %v1549_v55 }
 0xaa6   :  { %v1551_v58 = vmul.f32 1.442695, %v1550_v57 }
 0xaa7   :  { %v1617_v56 = vpop.xlane.xlu1 %1616 }
 0xaa8   :  { %2240 = vpow2.f32 %v1551_v58  ;;  %v1618_v59 = vsub.f32 %v1609_v20, %v1617_v56 }
 0xaaa   :  { %v2237_v3 = vpop.eup %2236  ;;  %v1619_v60 = vmul.f32 1.442695, %v1618_v59 }
 0xaab   :  { %v1417_v61 = vsel %vm1410_vm1, %v2237_v3, 0.0 }
 0xaac   :  { %2242 = vpow2.f32 %v1619_v60  ;;  %1418 = vadd.xlane.f32.xlu0 %v1417_v61 }
 0xaae   :  { %v2239_v62 = vpop.eup %2238 }
 0xaaf   :  { %v1485_v54 = vsel %vm1410_vm1, %v2239_v62, 0.0 }
 0xab0   :  { %1486 = vadd.xlane.f32.xlu1 %v1485_v54 }
 0xab2   :  { %v2241_v63 = vpop.eup %2240 }
 0xab3   :  { %v1553_v0 = vsel %vm1410_vm1, %v2241_v63, 0.0 }
 0xab4   :  { %1554 = vadd.xlane.f32.xlu0 %v1553_v0 }
 0xab6   :  { %v2243_v25 = vpop.eup %2242 }
 0xab7   :  { %v1621_v35 = vsel %vm1410_vm1, %v2243_v25, 0.0 }
 0xab8   :  { %1622 = vadd.xlane.f32.xlu1 %v1621_v35 }
 0xb39   :  { %v1419_v31 = vpop.xlane.xlu0 %1418 }
 0xb3a   :  { %2244 = vlog2.f32 %v1419_v31 }
 0xb3d   :  { %v1487_v37 = vpop.xlane.xlu1 %1486 }
 0xb3e   :  { %2246 = vlog2.f32 %v1487_v37 }
 0xb41   :  { %v1555_v39 = vpop.xlane.xlu0 %1554 }
 0xb42   :  { %2248 = vlog2.f32 %v1555_v39 }
 0xb44   :  { %v2245_v36 = vpop.eup %2244 }
 0xb45   :  { %v1421_v41 = vmul.f32 0.6931472, %v2245_v36  ;;  %v1623_v38 = vpop.xlane.xlu1 %1622 }
 0xb46   :  { %2250 = vlog2.f32 %v1623_v38 }
 0xb47   :  { %2252 = vrcp.f32 %v1623_v38  ;;  %v1422_v40 = vsub.f32 %v1414_v49, %v1421_v41 }
 0xb48   :  { %v2247_v44 = vpop.eup %2246 }
 0xb49   :  { %v1489_v1 = vmul.f32 0.6931472, %v2247_v44  ;;  %v1423_v30 = vmul.f32 %v1794_v43, %v1422_v40 }
 0xb4b   :  { %v1424_v24 = vsel %vm1410_vm1, %v1423_v30, 0.0  ;;  %v1490_v32 = vsub.f32 %v1482_v51, %v1489_v1 }
 0xb4c   :  { %v2249_v4 = vpop.eup %2248  ;;  %1425 = vadd.xlane.f32.xlu0 %v1424_v24 }
 0xb4d   :  { %v1557_v28 = vmul.f32 0.6931472, %v2249_v4  ;;  %v1491_v5 = vmul.f32 %v1794_v43, %v1490_v32 }
 0xb4f   :  { %v1492_v53 = vsel %vm1410_vm1, %v1491_v5, 0.0  ;;  %v1558_v26 = vsub.f32 %v1550_v57, %v1557_v28 }
 0xb50   :  { %v2251_v6 = vpop.eup %2250  ;;  %1493 = vadd.xlane.f32.xlu1 %v1492_v53 }
 0xb51   :  { %v2253_v7 = vpop.eup %2252  ;;  %v1625_v8 = vmul.f32 0.6931472, %v2251_v6  ;;  %v1559_v9 = vmul.f32 %v1794_v43, %v1558_v26 }
 0xb52   :  { %v1628_v10 = vmul.f32 %v2253_v7, %v2243_v25 }
 0xb53   :  { %v1560_v11 = vsel %vm1410_vm1, %v1559_v9, 0.0  ;;  %v1626_v12 = vsub.f32 %v1618_v59, %v1625_v8 }
 0xb54   :  { %v1642_v13 = vsel %vm1410_vm1, %v1628_v10, -inf  ;;  %1561 = vadd.xlane.f32.xlu0 %v1560_v11 }
 0xb55   :  { %v1643_v27 = vrot.slane %v1642_v13, 4  ;;  %v1629_v14 = vmul.f32 %v1794_v43, %v1626_v12 }
 0xb57   :  { %v1644_v15 = vmax.f32 %v1642_v13, %v1643_v27  ;;  %v1630_v16 = vsel %vm1410_vm1, %v1629_v14, 0.0 }
 0xb58   :  { %1631 = vadd.xlane.f32.xlu1 %v1630_v16 }
 0xb59   :  { %v1645_v17 = vrot.slane %v1644_v15, 2 }
 0xb5b   :  { %v1646_v18 = vmax.f32 %v1644_v15, %v1645_v17 }
 0xb5d   :  { %v1647_v19 = vrot.slane %v1646_v18, 1 }
 0xb5f   :  { %v1648_v20 = vmax.f32 %v1646_v18, %v1647_v19 }
 0xb61   :  { %vm1649_vm3 = vcmp.ge.f32.partialorder %v1628_v10, %v1648_v20 }
 0xb62   :  { %v1650_v21 = vsel %vm1649_vm3, %v2573_v29, 2 }
 0xb63   :  { %v1651_v22 = vsel %vm1410_vm1, %v1650_v21, 2147483647 }
 0xb64   :  { %v1652_v42 = vrot.slane %v1651_v22, 4 }
 0xb66   :  { %vm1653_vm4 = vcmp.lt.s32.totalorder %v1651_v22, %v1652_v42 }
 0xb67   :  { %v1654_v45 = vsel %vm1653_vm4, %v1651_v22, %v1652_v42 }
 0xb68   :  { %v1655_v46 = vrot.slane %v1654_v45, 2 }
 0xb6a   :  { %vm1656_vm5 = vcmp.lt.s32.totalorder %v1654_v45, %v1655_v46 }
 0xb6b   :  { %v1657_v47 = vsel %vm1656_vm5, %v1654_v45, %v1655_v46 }
 0xb6c   :  { %v1658_v48 = vrot.slane %v1657_v47, 1 }
 0xb6e   :  { %vm1659_vm6 = vcmp.lt.s32.totalorder %v1657_v47, %v1658_v48 }
 0xb6f   :  { %v1660_v33 = vsel %vm1659_vm6, %v1657_v47, %v1658_v48 }
 0xb70   :  { %vm1661_vm8 = vcmp.eq.s32.totalorder %v1660_v33, %v1364_v23 }
 0xb71   :  { %v1798_v49 = vsel %vm1661_vm8, 1.0, %v2323_v2 }
 0xb72   :  { %v1665_v50 = vsel %vm1664_vm7, %v1798_v49, 0.0 }
 0xb73   :  { %1666 = vadd.xlane.f32.xlu0 %v1665_v50 }
 0xbd9   :  { %v1426_v34 = vpop.xlane.xlu0 %1425 }
 0xbda   :  { %v1427_v51 = vrot.slane %v1426_v34, 4 }
 0xbdc   :  { %v1428_v29 = vadd.f32 %v1427_v51, %v1426_v34 }
 0xbdd   :  { %v1494_v52 = vpop.xlane.xlu1 %1493 }
 0xbde   :  { %v1429_v55 = vrot.slane %v1428_v29, 2  ;;  %v1495_v57 = vrot.slane %v1494_v52, 4 }
 0xbe0   :  { %v1496_v58 = vadd.f32 %v1495_v57, %v1494_v52  ;;  %v1430_v56 = vadd.f32 %v1429_v55, %v1428_v29 }
 0xbe1   :  { %v1562_v59 = vpop.xlane.xlu0 %1561 }
 0xbe2   :  { %v1497_v3 = vrot.slane %v1496_v58, 2  ;;  %v1563_v60 = vrot.slane %v1562_v59, 4  ;;  %v1431_v61 = vrot.slane %v1430_v56, 1 }
 0xbe4   :  { %v1564_v62 = vadd.f32 %v1563_v60, %v1562_v59  ;;  %v1432_v54 = vadd.f32 %v1431_v61, %v1430_v56  ;;  %v1498_v63 = vadd.f32 %v1497_v3, %v1496_v58 }
 0xbe5   :  { %v1632_v0 = vpop.xlane.xlu1 %1631 }
 0xbe6   :  { %v1565_v25 = vrot.slane %v1564_v62, 2  ;;  %v1633_v2 = vrot.slane %v1632_v0, 4  ;;  %2063 = vpush %v1432_v54  ;;  %v1499_v35 = vrot.slane %v1498_v63, 1 }
 0xbe8   :  { %v1634_v31 = vadd.f32 %v1633_v2, %v1632_v0  ;;  %v1500_v37 = vadd.f32 %v1499_v35, %v1498_v63  ;;  %v1566_v23 = vadd.f32 %v1565_v25, %v1564_v62 }
 0xbea   :  { %v1635_v39 = vrot.slane %v1634_v31, 2  ;;  %2065 = vpush %v1500_v37  ;;  %v1567_v36 = vrot.slane %v1566_v23, 1 }
 0xbec   :  { %v1636_v41 = vadd.f32 %v1635_v39, %v1634_v31  ;;  %v1568_v38 = vadd.f32 %v1567_v36, %v1566_v23 }
 0xbee   :  { %2067 = vpush %v1568_v38  ;;  %v1637_v43 = vrot.slane %v1636_v41, 1 }
 0xbf0   :  { %v1638_v40 = vadd.f32 %v1637_v43, %v1636_v41 }
 0xbf2   :  { %2069 = vpush %v1638_v40 }
 0xc00   :  { %v1667_v44 = vpop.xlane.xlu0 %1666 }
 0xc01   :  { %v1671_v1 = vmul.f32 0.5, %v1667_v44 }
 0xc03   :  { %1672 = vst.msk [vmem:[#allocation4] sm:$0x1] %vm1669_vm9, %v1671_v1 }
 0xc04   :  { %2286 = shalt.err (!%p2283_p4)
}
 0xc05   :  { %s2287_s1 = scalar_lea.hbm %s3160_s8, 16 }
 0xc06   :  { %p2288_p5 = scmp.ne.s32.totalorder %s3160_s8, %s2287_s1  ;;  %p2291_p6 = scmp.lt.u32.totalorder %s2287_s1, %s3160_s8 }
 0xc08   :  { %p2293_p7 = pnand %p2291_p6, %p2288_p5 }
 0xc0a   :  { %2296 = shalt.err (!%p2293_p7)
}
 0xc0b   :  { %1692 = dma.vmem_to_hbm [thread:$0]  %s1690_s24, 16, %s3160_s8, [#allocation5]  }
 0xc0c   :  { %s2327_s15 = smov [#allocation2]  }
 0xc0d   :  { %s1679_s16 = sshll.u32 %s2327_s15, 4  ;;  %s1680_s16 = int_to_ptr.vmem [resolvable:$true] %s1679_s16 }
 0xc0e   :  { %s2297_s0 = scalar_lea.vmem %s1680_s16, 16  ;;  %s2301_s8 = scalar_lea.vmem %s1680_s16, 32 }
 0xc0f   :  { %p2298_p8 = scmp.ne.s32.totalorder %s1680_s16, %s2297_s0  ;;  %p2302_p9 = scmp.lt.s32.totalorder %s1680_s16, %s1680_s16 }
 0xc10   :  { %p2303_p10 = scmp.lt.s32.totalorder %s2301_s8, %s2297_s0 }
 0xc12   :  { %p2304_p11 = por %p2303_p10, %p2302_p9 }
 0xc14   :  { %p2305_p12 = pnand %p2304_p11, %p2298_p8 }
 0xc17   :  { %s2064_s13 = spop %2063 }
 0xc18   :  { %v1434_v24 = vstv %s2064_s13 }
 0xc1b   :  { %s2066_s3 = spop %2065 }
 0xc1c   :  { %v1502_v30 = vstv %s2066_s3 }
 0xc1d   :  { %v1503_v4 = vadd.f32 %v1502_v30, %v1434_v24 }
 0xc1f   :  { %s2068_s5 = spop %2067 }
 0xc20   :  { %v1570_v32 = vstv %s2068_s5 }
 0xc21   :  { %v1571_v28 = vadd.f32 %v1570_v32, %v1503_v4 }
 0xc23   :  { %s2070_s14 = spop %2069 }
 0xc24   :  { %v1640_v5 = vstv %s2070_s14 }
 0xc25   :  { %v1641_v53 = vadd.f32 %v1640_v5, %v1571_v28 }
 0xc27   :  { %v1668_v26 = vmul.f32 -0.125, %v1641_v53 }
 0xc29   :  { %1670 = vst.msk [vmem:[#allocation2] sm:$0x1] %vm1669_vm9, %v1668_v26 }
 0xc2a   :  { %2308 = shalt.err (!%p2305_p12)
}
 0xc2b   :  { %s2309_s18 = scalar_lea.hbm %s3159_s7, 16 }
 0xc2c   :  { %p2310_p13 = scmp.ne.s32.totalorder %s3159_s7, %s2309_s18  ;;  %p2313_p0 = scmp.lt.u32.totalorder %s2309_s18, %s3159_s7 }
 0xc2e   :  { %p2315_p1 = pnand %p2313_p0, %p2310_p13 }
 0xc30   :  { %2318 = shalt.err (!%p2315_p1)
}
 0xc31   :  { %1682 = dma.vmem_to_hbm [thread:$0]  %s1680_s16, 16, %s3159_s7, [#allocation3]  }
 0xc32   :  { %2319 = dma.done.wait [#allocation3], 16  }
 0xc33   :  { %2320 = vsyncadd [#allocation3], 4294967280 }
 0xc34   :  { %2321 = dma.done.wait [#allocation5], 16  }
 0xc35   :  { %2322 = vsyncadd [#allocation5], 4294967280 }
 0xc36   :  { %1699 = vsyncpa [#allocation3], 1 }
 0xc37   :  { %1700 = vsyncpa [#allocation5], 1 }

</bundles_post_ra>
